<compile_context>
chip_gen: v5e
topology: v5e:2x2
jax: 0.10.0
libtpu: 0.0.40
codegen_flags: <defaults>
</compile_context>

<pallas_src>
import math

import jax
import jax.numpy as jnp
from jax.experimental import pallas as pl
from jax.experimental.pallas import tpu as pltpu

_BN_EPS = 1e-5


# ----------------------------------------------------------------------------
# Parameter plumbing (PyTorch layouts -> kernel layouts), all host-side algebra
# ----------------------------------------------------------------------------
def _fold_bn(bn):
    """Eval-mode BatchNorm as per-channel affine: y = x * s + t."""
    s = bn["gamma"] * jax.lax.rsqrt(bn["var"] + _BN_EPS)
    t = bn["beta"] - bn["mean"] * s
    return s, t


def _stage_arrays(st, W, post_scale=None, post_shift=None):
    """Kernel-layout params for one (Conv1x1, DWConv3x3) stage.

    post_scale/post_shift: per-channel affine applied AFTER the depthwise conv
    (used to fold the NEXT stage's eval-mode BN into this stage's depthwise
    weights/bias, so the kernel only keeps that stage's ReLU).
    """
    C = st["b1x1"].shape[0]
    # torch Conv2d 1x1 weight (cout, cin, 1, 1) -> (cin, cout) matmul matrix.
    w1 = jnp.transpose(st["w1x1"][:, :, 0, 0], (1, 0)).astype(jnp.bfloat16)
    b1 = st["b1x1"].reshape(1, C).astype(jnp.float32)

    # torch depthwise weight (C, 1, 3, 3) -> (3, 3, C) tap-major.
    w = jnp.transpose(st["wdw"][:, 0, :, :], (1, 2, 0)).astype(jnp.float32)
    e = st["bdw"].astype(jnp.float32)
    if post_scale is not None:
        w = w * post_scale                      # fold next-stage BN scale
        e = e * post_scale + post_shift         # ... and shift

    # Per-tap weights with the W-edge columns pre-masked to zero, so the
    # in-kernel cyclic roll never leaks the wrapped-around column.
    ml = (jnp.arange(W) > 0).astype(jnp.float32)          # kills column 0
    mr = (jnp.arange(W) < W - 1).astype(jnp.float32)      # kills column W-1
    dwl = w[:, 0, :][:, None, None, :] * ml[None, None, :, None]   # (3,1,W,C)
    dwc = w[:, 1, :][:, None, None, :]                              # (3,1,1,C)
    dwr = w[:, 2, :][:, None, None, :] * mr[None, None, :, None]   # (3,1,W,C)

    return [w1, b1,
            dwl.astype(jnp.float32), dwc.astype(jnp.float32),
            dwr.astype(jnp.float32), e.reshape(1, 1, C)]


def _strip_rows(H):
    for th in (4, 2, 1):
        if H % th == 0:
            return th
    return 1


# ----------------------------------------------------------------------------
# Fused kernel
# ----------------------------------------------------------------------------
def _make_kernel(H, W, C, TH):
    def kernel(x_ref,
               s1, t1, w1, b1, dl1, dc1, dr1, e1,     # stage 1
               w2, b2, dl2, dc2, dr2, e2,             # stage 2
               o_ref, pad_ref, v_ref):
        # Zero only the two H-halo rows; interior is fully overwritten each
        # stage and the halo rows are never written.  Per grid step -> safe
        # when the batch axis is sharded across megacore TensorCores.
        zero_row = jnp.zeros((1, W, C), jnp.float32)
        pad_ref[0:1] = zero_row
        pad_ref[H + 1:H + 2] = zero_row

        def stage(a, w_ref, b_ref, dl_ref, dc_ref, dr_ref, e_ref, write_out):
            # 1x1 conv == per-pixel channel matmul on the MXU (bf16 in, f32 acc),
            # done on the whole block so M = H*W >= 256.
            u = jnp.dot(a.reshape(H * W, C).astype(jnp.bfloat16), w_ref[...],
                        preferred_element_type=jnp.float32)
            u = (u + b_ref[...]).reshape(H, W, C)
            # H-only halo: fully tile-aligned interior store.
            pad_ref[1:H + 1] = u

            # Hoist the (edge-pre-masked) tap weights out of the strip loop.
            wl = [dl_ref[d] for d in range(3)]      # (1, W, C)
            wc = [dc_ref[d] for d in range(3)]      # (1, 1, C)
            wr = [dr_ref[d] for d in range(3)]      # (1, W, C)
            bias = e_ref[...]

            # Depthwise 3x3, strip-mined over H (accumulators stay small) with
            # one partial sum per kernel row for ILP.  W +/- 1 taps via XLU
            # sublane roll; static strip indices keep every slice tile-aligned.
            for r0 in range(0, H, TH):
                parts = []
                for di in range(3):
                    slab = pad_ref[r0 + di:r0 + di + TH]        # (TH, W, C)
                    p = slab * wc[di]
                    p = p + pltpu.roll(slab, shift=1, axis=1) * wl[di]
                    p = p + pltpu.roll(slab, shift=W - 1, axis=1) * wr[di]
                    parts.append(p)
                write_out(r0, parts[0] + parts[1] + parts[2] + bias)

        # ---- Stage 1: BN (folded eval affine) + ReLU + 1x1 + DW3x3.
        #      Stage 2's BN is already folded into (dl1, dc1, dr1, e1).
        a1 = jnp.maximum(x_ref[0] * s1[...] + t1[...], 0.0)

        def write_v(r0, val):
            v_ref[r0:r0 + TH] = val

        stage(a1, w1, b1, dl1, dc1, dr1, e1, write_v)

        # ---- Stage 2: ReLU + 1x1 + DW3x3 (its BN applied above).
        a2 = jnp.maximum(v_ref[...], 0.0)

        def write_o(r0, val):
            o_ref[0, r0:r0 + TH] = val.astype(o_ref.dtype)

        stage(a2, w2, b2, dl2, dc2, dr2, e2, write_o)

    return kernel


def double_depthwise_conv_forward(params, x_nchw):
    """Forward pass of Double_DepthWise_Conv. Input/output are NCHW like PyTorch."""
    x = jnp.transpose(x_nchw, (0, 2, 3, 1)).astype(jnp.float32)   # -> NHWC
    B, H, W, C = x.shape
    TH = _strip_rows(H)

    s1, t1 = _fold_bn(params["stage1"]["bn"])
    s2, t2 = _fold_bn(params["stage2"]["bn"])
    stage1_arrs = ([s1.reshape(1, 1, C).astype(jnp.float32),
                    t1.reshape(1, 1, C).astype(jnp.float32)]
                   + _stage_arrays(params["stage1"], W, post_scale=s2, post_shift=t2))
    stage2_arrs = _stage_arrays(params["stage2"], W)
    flat = stage1_arrs + stage2_arrs

    in_specs = [pl.BlockSpec((1, H, W, C), lambda b: (b, 0, 0, 0))]
    for a in flat:
        in_specs.append(pl.BlockSpec(a.shape, lambda b, nd=a.ndim: (0,) * nd))

    out = pl.pallas_call(
        _make_kernel(H, W, C, TH),
        out_shape=jax.ShapeDtypeStruct((B, H, W, C), jnp.float32),
        grid=(B,),
        in_specs=in_specs,
        out_specs=pl.BlockSpec((1, H, W, C), lambda b: (b, 0, 0, 0)),
        scratch_shapes=[pltpu.VMEM((H + 2, W, C), jnp.float32),   # H-halo for u
                        pltpu.VMEM((H, W, C), jnp.float32)],      # stage-1 output
        compiler_params=pltpu.CompilerParams(
            dimension_semantics=("parallel",),   # v7x: shard batch over 2 TCs
        ),
    )(x, *flat)
    return jnp.transpose(out, (0, 3, 1, 2))      # back to NCHW


# ----------------------------------------------------------------------------
# Pure-JAX reference (same bf16 matmul precision, un-folded BN) for the check
# ----------------------------------------------------------------------------
def reference_forward(params, x_nchw):
    x = jnp.transpose(x_nchw, (0, 2, 3, 1)).astype(jnp.float32)
    B, H, W, C = x.shape

    def stage(v, st):
        s, t = _fold_bn(st["bn"])
        a = jnp.maximum(v * s + t, 0.0)
        w = jnp.transpose(st["w1x1"][:, :, 0, 0], (1, 0)).astype(jnp.bfloat16)
        u = jnp.einsum("bhwc,cd->bhwd", a.astype(jnp.bfloat16), w,
                       preferred_element_type=jnp.float32) + st["b1x1"]
        up = jnp.pad(u, ((0, 0), (1, 1), (1, 1), (0, 0)))
        out = jnp.zeros_like(u) + st["bdw"]
        for i in range(3):
            for j in range(3):
                out = out + up[:, i:i + H, j:j + W, :] * st["wdw"][:, 0, i, j]
        return out

    v = stage(x, params["stage1"])
    v = stage(v, params["stage2"])
    return jnp.transpose(v, (0, 3, 1, 2))


# ----------------------------------------------------------------------------
# Deterministic synthetic parameters in PyTorch layouts (eval-mode BN stats)
# ----------------------------------------------------------------------------
def init_params(key, channels):
    c = channels

    def one_stage(k):
        ks = jax.random.split(k, 8)
        return {
            "bn": {
                "gamma": 1.0 + 0.1 * jax.random.normal(ks[0], (c,), jnp.float32),
                "beta": 0.1 * jax.random.normal(ks[1], (c,), jnp.float32),
                "mean": 0.1 * jax.random.normal(ks[2], (c,), jnp.float32),
                "var": 1.0 + 0.1 * jnp.abs(jax.random.normal(ks[3], (c,), jnp.float32)),
            },
            # nn.Conv2d(C, C, 1): weight (cout, cin, 1, 1), bias (cout,)
            "w1x1": jax.random.normal(ks[4], (c, c, 1, 1), jnp.float32) / math.sqrt(c),
            "b1x1": 0.01 * jax.random.normal(ks[5], (c,), jnp.float32),
            # nn.Conv2d(C, C, 3, padding=1, groups=C): weight (C, 1, 3, 3), bias (C,)
            "wdw": jax.random.normal(ks[6], (c, 1, 3, 3), jnp.float32) / 3.0,
            "bdw": 0.01 * jax.random.normal(ks[7], (c,), jnp.float32),
        }

    k1, k2 = jax.random.split(key)
    return {"stage1": one_stage(k1), "stage2": one_stage(k2)}


# ----------------------------------------------------------------------------
if __name__ == "__main__":
    key = jax.random.PRNGKey(0)
    pkey, xkey = jax.random.split(key)

    # Module requires in_channels == out_channels; C=128 keeps the lane dim dense.
    B, C, H, W = 2, 128, 16, 16
    params = init_params(pkey, C)
    x = jax.random.normal(xkey, (B, C, H, W), jnp.float32)

    out = double_depthwise_conv_forward(params, x)
    out = jax.block_until_ready(out)

    assert out.shape == (B, C, H, W), out.shape
    assert bool(jnp.all(jnp.isfinite(out)))

    ref = reference_forward(params, x)
    max_err = float(jnp.max(jnp.abs(out - ref)))
    assert max_err < 1e-1, f"max abs err vs reference: {max_err}"

    print("KERNEL_OK")
</pallas_src>

<mosaic_0001>
module attributes {stable_mosaic.version = 11 : i64} {
  func.func @kernel(%arg0: i32, %arg1: memref<1x16x16x128xf32, #tpu.memory_space<vmem>>, %arg2: memref<1x1x128xf32, #tpu.memory_space<vmem>>, %arg3: memref<1x1x128xf32, #tpu.memory_space<vmem>>, %arg4: memref<128x128xbf16, #tpu.memory_space<vmem>>, %arg5: memref<1x128xf32, #tpu.memory_space<vmem>>, %arg6: memref<3x1x16x128xf32, #tpu.memory_space<vmem>>, %arg7: memref<3x1x1x128xf32, #tpu.memory_space<vmem>>, %arg8: memref<3x1x16x128xf32, #tpu.memory_space<vmem>>, %arg9: memref<1x1x128xf32, #tpu.memory_space<vmem>>, %arg10: memref<128x128xbf16, #tpu.memory_space<vmem>>, %arg11: memref<1x128xf32, #tpu.memory_space<vmem>>, %arg12: memref<3x1x16x128xf32, #tpu.memory_space<vmem>>, %arg13: memref<3x1x1x128xf32, #tpu.memory_space<vmem>>, %arg14: memref<3x1x16x128xf32, #tpu.memory_space<vmem>>, %arg15: memref<1x1x128xf32, #tpu.memory_space<vmem>>, %arg16: memref<1x16x16x128xf32, #tpu.memory_space<vmem>>, %arg17: memref<18x16x128xf32, #tpu.memory_space<vmem>>, %arg18: memref<16x16x128xf32, #tpu.memory_space<vmem>>) attributes {dimension_semantics = [#tpu.dimension_semantics<parallel>], iteration_bounds = array<i64: 2>, scalar_prefetch = 0 : i64, scratch_operands = 2 : i64, tpu.core_type = #tpu.core_type<tc>, window_params = [{transform_indices = @transform_0, window_bounds = array<i64: 1, 16, 16, 128>}, {pipeline_mode = #tpu.pipeline_mode<synchronous>, transform_indices = @transform_1, window_bounds = array<i64: 1, 1, 128>}, {pipeline_mode = #tpu.pipeline_mode<synchronous>, transform_indices = @transform_2, window_bounds = array<i64: 1, 1, 128>}, {pipeline_mode = #tpu.pipeline_mode<synchronous>, transform_indices = @transform_3, window_bounds = array<i64: 128, 128>}, {pipeline_mode = #tpu.pipeline_mode<synchronous>, transform_indices = @transform_4, window_bounds = array<i64: 1, 128>}, {pipeline_mode = #tpu.pipeline_mode<synchronous>, transform_indices = @transform_5, window_bounds = array<i64: 3, 1, 16, 128>}, {pipeline_mode = #tpu.pipeline_mode<synchronous>, transform_indices = @transform_6, window_bounds = array<i64: 3, 1, 1, 128>}, {pipeline_mode = #tpu.pipeline_mode<synchronous>, transform_indices = @transform_7, window_bounds = array<i64: 3, 1, 16, 128>}, {pipeline_mode = #tpu.pipeline_mode<synchronous>, transform_indices = @transform_8, window_bounds = array<i64: 1, 1, 128>}, {pipeline_mode = #tpu.pipeline_mode<synchronous>, transform_indices = @transform_9, window_bounds = array<i64: 128, 128>}, {pipeline_mode = #tpu.pipeline_mode<synchronous>, transform_indices = @transform_10, window_bounds = array<i64: 1, 128>}, {pipeline_mode = #tpu.pipeline_mode<synchronous>, transform_indices = @transform_11, window_bounds = array<i64: 3, 1, 16, 128>}, {pipeline_mode = #tpu.pipeline_mode<synchronous>, transform_indices = @transform_12, window_bounds = array<i64: 3, 1, 1, 128>}, {pipeline_mode = #tpu.pipeline_mode<synchronous>, transform_indices = @transform_13, window_bounds = array<i64: 3, 1, 16, 128>}, {pipeline_mode = #tpu.pipeline_mode<synchronous>, transform_indices = @transform_14, window_bounds = array<i64: 1, 1, 128>}, {transform_indices = @transform_15, window_bounds = array<i64: 1, 16, 16, 128>}]} {
    %cst = arith.constant 0.000000e+00 : f32
    %0 = vector.broadcast %cst : f32 to vector<1x16x128xf32>
    %c0 = arith.constant 0 : index
    %c0_0 = arith.constant 0 : index
    %c0_1 = arith.constant 0 : index
    %1 = vector.load %arg17[%c0, %c0_0, %c0_1] : memref<18x16x128xf32, #tpu.memory_space<vmem>>, vector<1x16x128xf32>
    tpu.vector_store %arg17[%c0, %c0_0, %c0_1], %0 {strides = array<i32>} : memref<18x16x128xf32, #tpu.memory_space<vmem>>, vector<1x16x128xf32>,
    %c17 = arith.constant 17 : index
    %c0_2 = arith.constant 0 : index
    %c0_3 = arith.constant 0 : index
    %2 = vector.load %arg17[%c17, %c0_2, %c0_3] : memref<18x16x128xf32, #tpu.memory_space<vmem>>, vector<1x16x128xf32>
    tpu.vector_store %arg17[%c17, %c0_2, %c0_3], %0 {strides = array<i32>} : memref<18x16x128xf32, #tpu.memory_space<vmem>>, vector<1x16x128xf32>,
    %c0_4 = arith.constant 0 : index
    %c0_5 = arith.constant 0 : index
    %c0_6 = arith.constant 0 : index
    %c0_7 = arith.constant 0 : index
    %3 = vector.load %arg1[%c0_4, %c0_5, %c0_6, %c0_7] : memref<1x16x16x128xf32, #tpu.memory_space<vmem>>, vector<1x16x16x128xf32>
    %4 = vector.shape_cast %3 : vector<1x16x16x128xf32> to vector<16x16x128xf32>
    %c0_8 = arith.constant 0 : index
    %c0_9 = arith.constant 0 : index
    %c0_10 = arith.constant 0 : index
    %5 = vector.load %arg2[%c0_8, %c0_9, %c0_10] : memref<1x1x128xf32, #tpu.memory_space<vmem>>, vector<1x1x128xf32>
    %6 = vector.broadcast %5 : vector<1x1x128xf32> to vector<16x16x128xf32>
    %7 = arith.mulf %4, %6 : vector<16x16x128xf32>
    %c0_11 = arith.constant 0 : index
    %c0_12 = arith.constant 0 : index
    %c0_13 = arith.constant 0 : index
    %8 = vector.load %arg3[%c0_11, %c0_12, %c0_13] : memref<1x1x128xf32, #tpu.memory_space<vmem>>, vector<1x1x128xf32>
    %9 = vector.broadcast %8 : vector<1x1x128xf32> to vector<16x16x128xf32>
    %10 = arith.addf %7, %9 : vector<16x16x128xf32>
    %cst_14 = arith.constant 0.000000e+00 : f32
    %11 = vector.broadcast %cst_14 : f32 to vector<16x16x128xf32>
    %12 = arith.maximumf %10, %11 : vector<16x16x128xf32>
    %13 = vector.shape_cast %12 : vector<16x16x128xf32> to vector<256x128xf32>
    %14 = arith.truncf %13 : vector<256x128xf32> to vector<256x128xbf16>
    %c0_15 = arith.constant 0 : index
    %c0_16 = arith.constant 0 : index
    %15 = vector.load %arg4[%c0_15, %c0_16] : memref<128x128xbf16, #tpu.memory_space<vmem>>, vector<128x128xbf16>
    %cst_17 = arith.constant dense<0.000000e+00> : vector<256x128xf32>
    %16 = tpu.matmul %14, %15, %cst_17 {dimension_numbers = #tpu.dot_dimension_numbers<[1], [0], [0], [1], [0, 0, 1, 1], [], []>} : vector<256x128xbf16>, vector<128x128xbf16>, vector<256x128xf32> -> vector<256x128xf32>
    %c0_18 = arith.constant 0 : index
    %c0_19 = arith.constant 0 : index
    %17 = vector.load %arg5[%c0_18, %c0_19] : memref<1x128xf32, #tpu.memory_space<vmem>>, vector<1x128xf32>
    %18 = vector.broadcast %17 : vector<1x128xf32> to vector<256x128xf32>
    %19 = arith.addf %16, %18 : vector<256x128xf32>
    %20 = vector.shape_cast %19 : vector<256x128xf32> to vector<16x16x128xf32>
    %c1 = arith.constant 1 : index
    %c0_20 = arith.constant 0 : index
    %c0_21 = arith.constant 0 : index
    %21 = vector.load %arg17[%c1, %c0_20, %c0_21] : memref<18x16x128xf32, #tpu.memory_space<vmem>>, vector<16x16x128xf32>
    tpu.vector_store %arg17[%c1, %c0_20, %c0_21], %20 {strides = array<i32>} : memref<18x16x128xf32, #tpu.memory_space<vmem>>, vector<16x16x128xf32>,
    %c0_22 = arith.constant 0 : index
    %c0_23 = arith.constant 0 : index
    %c0_24 = arith.constant 0 : index
    %c0_25 = arith.constant 0 : index
    %22 = vector.load %arg6[%c0_22, %c0_23, %c0_24, %c0_25] : memref<3x1x16x128xf32, #tpu.memory_space<vmem>>, vector<1x1x16x128xf32>
    %23 = vector.shape_cast %22 : vector<1x1x16x128xf32> to vector<1x16x128xf32>
    %c1_26 = arith.constant 1 : index
    %c0_27 = arith.constant 0 : index
    %c0_28 = arith.constant 0 : index
    %c0_29 = arith.constant 0 : index
    %24 = vector.load %arg6[%c1_26, %c0_27, %c0_28, %c0_29] : memref<3x1x16x128xf32, #tpu.memory_space<vmem>>, vector<1x1x16x128xf32>
    %25 = vector.shape_cast %24 : vector<1x1x16x128xf32> to vector<1x16x128xf32>
    %c2 = arith.constant 2 : index
    %c0_30 = arith.constant 0 : index
    %c0_31 = arith.constant 0 : index
    %c0_32 = arith.constant 0 : index
    %26 = vector.load %arg6[%c2, %c0_30, %c0_31, %c0_32] : memref<3x1x16x128xf32, #tpu.memory_space<vmem>>, vector<1x1x16x128xf32>
    %27 = vector.shape_cast %26 : vector<1x1x16x128xf32> to vector<1x16x128xf32>
    %c0_33 = arith.constant 0 : index
    %c0_34 = arith.constant 0 : index
    %c0_35 = arith.constant 0 : index
    %c0_36 = arith.constant 0 : index
    %28 = vector.load %arg7[%c0_33, %c0_34, %c0_35, %c0_36] : memref<3x1x1x128xf32, #tpu.memory_space<vmem>>, vector<1x1x1x128xf32>
    %29 = vector.shape_cast %28 : vector<1x1x1x128xf32> to vector<1x1x128xf32>
    %c1_37 = arith.constant 1 : index
    %c0_38 = arith.constant 0 : index
    %c0_39 = arith.constant 0 : index
    %c0_40 = arith.constant 0 : index
    %30 = vector.load %arg7[%c1_37, %c0_38, %c0_39, %c0_40] : memref<3x1x1x128xf32, #tpu.memory_space<vmem>>, vector<1x1x1x128xf32>
    %31 = vector.shape_cast %30 : vector<1x1x1x128xf32> to vector<1x1x128xf32>
    %c2_41 = arith.constant 2 : index
    %c0_42 = arith.constant 0 : index
    %c0_43 = arith.constant 0 : index
    %c0_44 = arith.constant 0 : index
    %32 = vector.load %arg7[%c2_41, %c0_42, %c0_43, %c0_44] : memref<3x1x1x128xf32, #tpu.memory_space<vmem>>, vector<1x1x1x128xf32>
    %33 = vector.shape_cast %32 : vector<1x1x1x128xf32> to vector<1x1x128xf32>
    %c0_45 = arith.constant 0 : index
    %c0_46 = arith.constant 0 : index
    %c0_47 = arith.constant 0 : index
    %c0_48 = arith.constant 0 : index
    %34 = vector.load %arg8[%c0_45, %c0_46, %c0_47, %c0_48] : memref<3x1x16x128xf32, #tpu.memory_space<vmem>>, vector<1x1x16x128xf32>
    %35 = vector.shape_cast %34 : vector<1x1x16x128xf32> to vector<1x16x128xf32>
    %c1_49 = arith.constant 1 : index
    %c0_50 = arith.constant 0 : index
    %c0_51 = arith.constant 0 : index
    %c0_52 = arith.constant 0 : index
    %36 = vector.load %arg8[%c1_49, %c0_50, %c0_51, %c0_52] : memref<3x1x16x128xf32, #tpu.memory_space<vmem>>, vector<1x1x16x128xf32>
    %37 = vector.shape_cast %36 : vector<1x1x16x128xf32> to vector<1x16x128xf32>
    %c2_53 = arith.constant 2 : index
    %c0_54 = arith.constant 0 : index
    %c0_55 = arith.constant 0 : index
    %c0_56 = arith.constant 0 : index
    %38 = vector.load %arg8[%c2_53, %c0_54, %c0_55, %c0_56] : memref<3x1x16x128xf32, #tpu.memory_space<vmem>>, vector<1x1x16x128xf32>
    %39 = vector.shape_cast %38 : vector<1x1x16x128xf32> to vector<1x16x128xf32>
    %c0_57 = arith.constant 0 : index
    %c0_58 = arith.constant 0 : index
    %c0_59 = arith.constant 0 : index
    %40 = vector.load %arg9[%c0_57, %c0_58, %c0_59] : memref<1x1x128xf32, #tpu.memory_space<vmem>>, vector<1x1x128xf32>
    %c0_60 = arith.constant 0 : index
    %c0_61 = arith.constant 0 : index
    %c0_62 = arith.constant 0 : index
    %41 = vector.load %arg17[%c0_60, %c0_61, %c0_62] : memref<18x16x128xf32, #tpu.memory_space<vmem>>, vector<4x16x128xf32>
    %42 = vector.broadcast %29 : vector<1x1x128xf32> to vector<4x16x128xf32>
    %43 = arith.mulf %41, %42 : vector<4x16x128xf32>
    %c1_i32 = arith.constant 1 : i32
    %44 = tpu.dynamic_rotate %41 by %c1_i32 dim 1 : vector<4x16x128xf32>, i32 -> vector<4x16x128xf32>
    %45 = vector.broadcast %23 : vector<1x16x128xf32> to vector<4x16x128xf32>
    %46 = arith.mulf %44, %45 : vector<4x16x128xf32>
    %47 = arith.addf %43, %46 : vector<4x16x128xf32>
    %c15_i32 = arith.constant 15 : i32
    %48 = tpu.dynamic_rotate %41 by %c15_i32 dim 1 : vector<4x16x128xf32>, i32 -> vector<4x16x128xf32>
    %49 = vector.broadcast %35 : vector<1x16x128xf32> to vector<4x16x128xf32>
    %50 = arith.mulf %48, %49 : vector<4x16x128xf32>
    %51 = arith.addf %47, %50 : vector<4x16x128xf32>
    %c1_63 = arith.constant 1 : index
    %c0_64 = arith.constant 0 : index
    %c0_65 = arith.constant 0 : index
    %52 = vector.load %arg17[%c1_63, %c0_64, %c0_65] : memref<18x16x128xf32, #tpu.memory_space<vmem>>, vector<4x16x128xf32>
    %53 = vector.broadcast %31 : vector<1x1x128xf32> to vector<4x16x128xf32>
    %54 = arith.mulf %52, %53 : vector<4x16x128xf32>
    %c1_i32_66 = arith.constant 1 : i32
    %55 = tpu.dynamic_rotate %52 by %c1_i32_66 dim 1 : vector<4x16x128xf32>, i32 -> vector<4x16x128xf32>
    %56 = vector.broadcast %25 : vector<1x16x128xf32> to vector<4x16x128xf32>
    %57 = arith.mulf %55, %56 : vector<4x16x128xf32>
    %58 = arith.addf %54, %57 : vector<4x16x128xf32>
    %c15_i32_67 = arith.constant 15 : i32
    %59 = tpu.dynamic_rotate %52 by %c15_i32_67 dim 1 : vector<4x16x128xf32>, i32 -> vector<4x16x128xf32>
    %60 = vector.broadcast %37 : vector<1x16x128xf32> to vector<4x16x128xf32>
    %61 = arith.mulf %59, %60 : vector<4x16x128xf32>
    %62 = arith.addf %58, %61 : vector<4x16x128xf32>
    %c2_68 = arith.constant 2 : index
    %c0_69 = arith.constant 0 : index
    %c0_70 = arith.constant 0 : index
    %63 = vector.load %arg17[%c2_68, %c0_69, %c0_70] : memref<18x16x128xf32, #tpu.memory_space<vmem>>, vector<4x16x128xf32>
    %64 = vector.broadcast %33 : vector<1x1x128xf32> to vector<4x16x128xf32>
    %65 = arith.mulf %63, %64 : vector<4x16x128xf32>
    %c1_i32_71 = arith.constant 1 : i32
    %66 = tpu.dynamic_rotate %63 by %c1_i32_71 dim 1 : vector<4x16x128xf32>, i32 -> vector<4x16x128xf32>
    %67 = vector.broadcast %27 : vector<1x16x128xf32> to vector<4x16x128xf32>
    %68 = arith.mulf %66, %67 : vector<4x16x128xf32>
    %69 = arith.addf %65, %68 : vector<4x16x128xf32>
    %c15_i32_72 = arith.constant 15 : i32
    %70 = tpu.dynamic_rotate %63 by %c15_i32_72 dim 1 : vector<4x16x128xf32>, i32 -> vector<4x16x128xf32>
    %71 = vector.broadcast %39 : vector<1x16x128xf32> to vector<4x16x128xf32>
    %72 = arith.mulf %70, %71 : vector<4x16x128xf32>
    %73 = arith.addf %69, %72 : vector<4x16x128xf32>
    %74 = arith.addf %51, %62 : vector<4x16x128xf32>
    %75 = arith.addf %74, %73 : vector<4x16x128xf32>
    %76 = vector.broadcast %40 : vector<1x1x128xf32> to vector<4x16x128xf32>
    %77 = arith.addf %75, %76 : vector<4x16x128xf32>
    %c0_73 = arith.constant 0 : index
    %c0_74 = arith.constant 0 : index
    %c0_75 = arith.constant 0 : index
    %78 = vector.load %arg18[%c0_73, %c0_74, %c0_75] : memref<16x16x128xf32, #tpu.memory_space<vmem>>, vector<4x16x128xf32>
    tpu.vector_store %arg18[%c0_73, %c0_74, %c0_75], %77 {strides = array<i32>} : memref<16x16x128xf32, #tpu.memory_space<vmem>>, vector<4x16x128xf32>,
    %c4 = arith.constant 4 : index
    %c0_76 = arith.constant 0 : index
    %c0_77 = arith.constant 0 : index
    %79 = vector.load %arg17[%c4, %c0_76, %c0_77] : memref<18x16x128xf32, #tpu.memory_space<vmem>>, vector<4x16x128xf32>
    %80 = vector.broadcast %29 : vector<1x1x128xf32> to vector<4x16x128xf32>
    %81 = arith.mulf %79, %80 : vector<4x16x128xf32>
    %c1_i32_78 = arith.constant 1 : i32
    %82 = tpu.dynamic_rotate %79 by %c1_i32_78 dim 1 : vector<4x16x128xf32>, i32 -> vector<4x16x128xf32>
    %83 = vector.broadcast %23 : vector<1x16x128xf32> to vector<4x16x128xf32>
    %84 = arith.mulf %82, %83 : vector<4x16x128xf32>
    %85 = arith.addf %81, %84 : vector<4x16x128xf32>
    %c15_i32_79 = arith.constant 15 : i32
    %86 = tpu.dynamic_rotate %79 by %c15_i32_79 dim 1 : vector<4x16x128xf32>, i32 -> vector<4x16x128xf32>
    %87 = vector.broadcast %35 : vector<1x16x128xf32> to vector<4x16x128xf32>
    %88 = arith.mulf %86, %87 : vector<4x16x128xf32>
    %89 = arith.addf %85, %88 : vector<4x16x128xf32>
    %c5 = arith.constant 5 : index
    %c0_80 = arith.constant 0 : index
    %c0_81 = arith.constant 0 : index
    %90 = vector.load %arg17[%c5, %c0_80, %c0_81] : memref<18x16x128xf32, #tpu.memory_space<vmem>>, vector<4x16x128xf32>
    %91 = vector.broadcast %31 : vector<1x1x128xf32> to vector<4x16x128xf32>
    %92 = arith.mulf %90, %91 : vector<4x16x128xf32>
    %c1_i32_82 = arith.constant 1 : i32
    %93 = tpu.dynamic_rotate %90 by %c1_i32_82 dim 1 : vector<4x16x128xf32>, i32 -> vector<4x16x128xf32>
    %94 = vector.broadcast %25 : vector<1x16x128xf32> to vector<4x16x128xf32>
    %95 = arith.mulf %93, %94 : vector<4x16x128xf32>
    %96 = arith.addf %92, %95 : vector<4x16x128xf32>
    %c15_i32_83 = arith.constant 15 : i32
    %97 = tpu.dynamic_rotate %90 by %c15_i32_83 dim 1 : vector<4x16x128xf32>, i32 -> vector<4x16x128xf32>
    %98 = vector.broadcast %37 : vector<1x16x128xf32> to vector<4x16x128xf32>
    %99 = arith.mulf %97, %98 : vector<4x16x128xf32>
    %100 = arith.addf %96, %99 : vector<4x16x128xf32>
    %c6 = arith.constant 6 : index
    %c0_84 = arith.constant 0 : index
    %c0_85 = arith.constant 0 : index
    %101 = vector.load %arg17[%c6, %c0_84, %c0_85] : memref<18x16x128xf32, #tpu.memory_space<vmem>>, vector<4x16x128xf32>
    %102 = vector.broadcast %33 : vector<1x1x128xf32> to vector<4x16x128xf32>
    %103 = arith.mulf %101, %102 : vector<4x16x128xf32>
    %c1_i32_86 = arith.constant 1 : i32
    %104 = tpu.dynamic_rotate %101 by %c1_i32_86 dim 1 : vector<4x16x128xf32>, i32 -> vector<4x16x128xf32>
    %105 = vector.broadcast %27 : vector<1x16x128xf32> to vector<4x16x128xf32>
    %106 = arith.mulf %104, %105 : vector<4x16x128xf32>
    %107 = arith.addf %103, %106 : vector<4x16x128xf32>
    %c15_i32_87 = arith.constant 15 : i32
    %108 = tpu.dynamic_rotate %101 by %c15_i32_87 dim 1 : vector<4x16x128xf32>, i32 -> vector<4x16x128xf32>
    %109 = vector.broadcast %39 : vector<1x16x128xf32> to vector<4x16x128xf32>
    %110 = arith.mulf %108, %109 : vector<4x16x128xf32>
    %111 = arith.addf %107, %110 : vector<4x16x128xf32>
    %112 = arith.addf %89, %100 : vector<4x16x128xf32>
    %113 = arith.addf %112, %111 : vector<4x16x128xf32>
    %114 = vector.broadcast %40 : vector<1x1x128xf32> to vector<4x16x128xf32>
    %115 = arith.addf %113, %114 : vector<4x16x128xf32>
    %c4_88 = arith.constant 4 : index
    %c0_89 = arith.constant 0 : index
    %c0_90 = arith.constant 0 : index
    %116 = vector.load %arg18[%c4_88, %c0_89, %c0_90] : memref<16x16x128xf32, #tpu.memory_space<vmem>>, vector<4x16x128xf32>
    tpu.vector_store %arg18[%c4_88, %c0_89, %c0_90], %115 {strides = array<i32>} : memref<16x16x128xf32, #tpu.memory_space<vmem>>, vector<4x16x128xf32>,
    %c8 = arith.constant 8 : index
    %c0_91 = arith.constant 0 : index
    %c0_92 = arith.constant 0 : index
    %117 = vector.load %arg17[%c8, %c0_91, %c0_92] : memref<18x16x128xf32, #tpu.memory_space<vmem>>, vector<4x16x128xf32>
    %118 = vector.broadcast %29 : vector<1x1x128xf32> to vector<4x16x128xf32>
    %119 = arith.mulf %117, %118 : vector<4x16x128xf32>
    %c1_i32_93 = arith.constant 1 : i32
    %120 = tpu.dynamic_rotate %117 by %c1_i32_93 dim 1 : vector<4x16x128xf32>, i32 -> vector<4x16x128xf32>
    %121 = vector.broadcast %23 : vector<1x16x128xf32> to vector<4x16x128xf32>
    %122 = arith.mulf %120, %121 : vector<4x16x128xf32>
    %123 = arith.addf %119, %122 : vector<4x16x128xf32>
    %c15_i32_94 = arith.constant 15 : i32
    %124 = tpu.dynamic_rotate %117 by %c15_i32_94 dim 1 : vector<4x16x128xf32>, i32 -> vector<4x16x128xf32>
    %125 = vector.broadcast %35 : vector<1x16x128xf32> to vector<4x16x128xf32>
    %126 = arith.mulf %124, %125 : vector<4x16x128xf32>
    %127 = arith.addf %123, %126 : vector<4x16x128xf32>
    %c9 = arith.constant 9 : index
    %c0_95 = arith.constant 0 : index
    %c0_96 = arith.constant 0 : index
    %128 = vector.load %arg17[%c9, %c0_95, %c0_96] : memref<18x16x128xf32, #tpu.memory_space<vmem>>, vector<4x16x128xf32>
    %129 = vector.broadcast %31 : vector<1x1x128xf32> to vector<4x16x128xf32>
    %130 = arith.mulf %128, %129 : vector<4x16x128xf32>
    %c1_i32_97 = arith.constant 1 : i32
    %131 = tpu.dynamic_rotate %128 by %c1_i32_97 dim 1 : vector<4x16x128xf32>, i32 -> vector<4x16x128xf32>
    %132 = vector.broadcast %25 : vector<1x16x128xf32> to vector<4x16x128xf32>
    %133 = arith.mulf %131, %132 : vector<4x16x128xf32>
    %134 = arith.addf %130, %133 : vector<4x16x128xf32>
    %c15_i32_98 = arith.constant 15 : i32
    %135 = tpu.dynamic_rotate %128 by %c15_i32_98 dim 1 : vector<4x16x128xf32>, i32 -> vector<4x16x128xf32>
    %136 = vector.broadcast %37 : vector<1x16x128xf32> to vector<4x16x128xf32>
    %137 = arith.mulf %135, %136 : vector<4x16x128xf32>
    %138 = arith.addf %134, %137 : vector<4x16x128xf32>
    %c10 = arith.constant 10 : index
    %c0_99 = arith.constant 0 : index
    %c0_100 = arith.constant 0 : index
    %139 = vector.load %arg17[%c10, %c0_99, %c0_100] : memref<18x16x128xf32, #tpu.memory_space<vmem>>, vector<4x16x128xf32>
    %140 = vector.broadcast %33 : vector<1x1x128xf32> to vector<4x16x128xf32>
    %141 = arith.mulf %139, %140 : vector<4x16x128xf32>
    %c1_i32_101 = arith.constant 1 : i32
    %142 = tpu.dynamic_rotate %139 by %c1_i32_101 dim 1 : vector<4x16x128xf32>, i32 -> vector<4x16x128xf32>
    %143 = vector.broadcast %27 : vector<1x16x128xf32> to vector<4x16x128xf32>
    %144 = arith.mulf %142, %143 : vector<4x16x128xf32>
    %145 = arith.addf %141, %144 : vector<4x16x128xf32>
    %c15_i32_102 = arith.constant 15 : i32
    %146 = tpu.dynamic_rotate %139 by %c15_i32_102 dim 1 : vector<4x16x128xf32>, i32 -> vector<4x16x128xf32>
    %147 = vector.broadcast %39 : vector<1x16x128xf32> to vector<4x16x128xf32>
    %148 = arith.mulf %146, %147 : vector<4x16x128xf32>
    %149 = arith.addf %145, %148 : vector<4x16x128xf32>
    %150 = arith.addf %127, %138 : vector<4x16x128xf32>
    %151 = arith.addf %150, %149 : vector<4x16x128xf32>
    %152 = vector.broadcast %40 : vector<1x1x128xf32> to vector<4x16x128xf32>
    %153 = arith.addf %151, %152 : vector<4x16x128xf32>
    %c8_103 = arith.constant 8 : index
    %c0_104 = arith.constant 0 : index
    %c0_105 = arith.constant 0 : index
    %154 = vector.load %arg18[%c8_103, %c0_104, %c0_105] : memref<16x16x128xf32, #tpu.memory_space<vmem>>, vector<4x16x128xf32>
    tpu.vector_store %arg18[%c8_103, %c0_104, %c0_105], %153 {strides = array<i32>} : memref<16x16x128xf32, #tpu.memory_space<vmem>>, vector<4x16x128xf32>,
    %c12 = arith.constant 12 : index
    %c0_106 = arith.constant 0 : index
    %c0_107 = arith.constant 0 : index
    %155 = vector.load %arg17[%c12, %c0_106, %c0_107] : memref<18x16x128xf32, #tpu.memory_space<vmem>>, vector<4x16x128xf32>
    %156 = vector.broadcast %29 : vector<1x1x128xf32> to vector<4x16x128xf32>
    %157 = arith.mulf %155, %156 : vector<4x16x128xf32>
    %c1_i32_108 = arith.constant 1 : i32
    %158 = tpu.dynamic_rotate %155 by %c1_i32_108 dim 1 : vector<4x16x128xf32>, i32 -> vector<4x16x128xf32>
    %159 = vector.broadcast %23 : vector<1x16x128xf32> to vector<4x16x128xf32>
    %160 = arith.mulf %158, %159 : vector<4x16x128xf32>
    %161 = arith.addf %157, %160 : vector<4x16x128xf32>
    %c15_i32_109 = arith.constant 15 : i32
    %162 = tpu.dynamic_rotate %155 by %c15_i32_109 dim 1 : vector<4x16x128xf32>, i32 -> vector<4x16x128xf32>
    %163 = vector.broadcast %35 : vector<1x16x128xf32> to vector<4x16x128xf32>
    %164 = arith.mulf %162, %163 : vector<4x16x128xf32>
    %165 = arith.addf %161, %164 : vector<4x16x128xf32>
    %c13 = arith.constant 13 : index
    %c0_110 = arith.constant 0 : index
    %c0_111 = arith.constant 0 : index
    %166 = vector.load %arg17[%c13, %c0_110, %c0_111] : memref<18x16x128xf32, #tpu.memory_space<vmem>>, vector<4x16x128xf32>
    %167 = vector.broadcast %31 : vector<1x1x128xf32> to vector<4x16x128xf32>
    %168 = arith.mulf %166, %167 : vector<4x16x128xf32>
    %c1_i32_112 = arith.constant 1 : i32
    %169 = tpu.dynamic_rotate %166 by %c1_i32_112 dim 1 : vector<4x16x128xf32>, i32 -> vector<4x16x128xf32>
    %170 = vector.broadcast %25 : vector<1x16x128xf32> to vector<4x16x128xf32>
    %171 = arith.mulf %169, %170 : vector<4x16x128xf32>
    %172 = arith.addf %168, %171 : vector<4x16x128xf32>
    %c15_i32_113 = arith.constant 15 : i32
    %173 = tpu.dynamic_rotate %166 by %c15_i32_113 dim 1 : vector<4x16x128xf32>, i32 -> vector<4x16x128xf32>
    %174 = vector.broadcast %37 : vector<1x16x128xf32> to vector<4x16x128xf32>
    %175 = arith.mulf %173, %174 : vector<4x16x128xf32>
    %176 = arith.addf %172, %175 : vector<4x16x128xf32>
    %c14 = arith.constant 14 : index
    %c0_114 = arith.constant 0 : index
    %c0_115 = arith.constant 0 : index
    %177 = vector.load %arg17[%c14, %c0_114, %c0_115] : memref<18x16x128xf32, #tpu.memory_space<vmem>>, vector<4x16x128xf32>
    %178 = vector.broadcast %33 : vector<1x1x128xf32> to vector<4x16x128xf32>
    %179 = arith.mulf %177, %178 : vector<4x16x128xf32>
    %c1_i32_116 = arith.constant 1 : i32
    %180 = tpu.dynamic_rotate %177 by %c1_i32_116 dim 1 : vector<4x16x128xf32>, i32 -> vector<4x16x128xf32>
    %181 = vector.broadcast %27 : vector<1x16x128xf32> to vector<4x16x128xf32>
    %182 = arith.mulf %180, %181 : vector<4x16x128xf32>
    %183 = arith.addf %179, %182 : vector<4x16x128xf32>
    %c15_i32_117 = arith.constant 15 : i32
    %184 = tpu.dynamic_rotate %177 by %c15_i32_117 dim 1 : vector<4x16x128xf32>, i32 -> vector<4x16x128xf32>
    %185 = vector.broadcast %39 : vector<1x16x128xf32> to vector<4x16x128xf32>
    %186 = arith.mulf %184, %185 : vector<4x16x128xf32>
    %187 = arith.addf %183, %186 : vector<4x16x128xf32>
    %188 = arith.addf %165, %176 : vector<4x16x128xf32>
    %189 = arith.addf %188, %187 : vector<4x16x128xf32>
    %190 = vector.broadcast %40 : vector<1x1x128xf32> to vector<4x16x128xf32>
    %191 = arith.addf %189, %190 : vector<4x16x128xf32>
    %c12_118 = arith.constant 12 : index
    %c0_119 = arith.constant 0 : index
    %c0_120 = arith.constant 0 : index
    %192 = vector.load %arg18[%c12_118, %c0_119, %c0_120] : memref<16x16x128xf32, #tpu.memory_space<vmem>>, vector<4x16x128xf32>
    tpu.vector_store %arg18[%c12_118, %c0_119, %c0_120], %191 {strides = array<i32>} : memref<16x16x128xf32, #tpu.memory_space<vmem>>, vector<4x16x128xf32>,
    %c0_121 = arith.constant 0 : index
    %c0_122 = arith.constant 0 : index
    %c0_123 = arith.constant 0 : index
    %193 = vector.load %arg18[%c0_121, %c0_122, %c0_123] : memref<16x16x128xf32, #tpu.memory_space<vmem>>, vector<16x16x128xf32>
    %cst_124 = arith.constant 0.000000e+00 : f32
    %194 = vector.broadcast %cst_124 : f32 to vector<16x16x128xf32>
    %195 = arith.maximumf %193, %194 : vector<16x16x128xf32>
    %196 = vector.shape_cast %195 : vector<16x16x128xf32> to vector<256x128xf32>
    %197 = arith.truncf %196 : vector<256x128xf32> to vector<256x128xbf16>
    %c0_125 = arith.constant 0 : index
    %c0_126 = arith.constant 0 : index
    %198 = vector.load %arg10[%c0_125, %c0_126] : memref<128x128xbf16, #tpu.memory_space<vmem>>, vector<128x128xbf16>
    %cst_127 = arith.constant dense<0.000000e+00> : vector<256x128xf32>
    %199 = tpu.matmul %197, %198, %cst_127 {dimension_numbers = #tpu.dot_dimension_numbers<[1], [0], [0], [1], [0, 0, 1, 1], [], []>} : vector<256x128xbf16>, vector<128x128xbf16>, vector<256x128xf32> -> vector<256x128xf32>
    %c0_128 = arith.constant 0 : index
    %c0_129 = arith.constant 0 : index
    %200 = vector.load %arg11[%c0_128, %c0_129] : memref<1x128xf32, #tpu.memory_space<vmem>>, vector<1x128xf32>
    %201 = vector.broadcast %200 : vector<1x128xf32> to vector<256x128xf32>
    %202 = arith.addf %199, %201 : vector<256x128xf32>
    %203 = vector.shape_cast %202 : vector<256x128xf32> to vector<16x16x128xf32>
    %c1_130 = arith.constant 1 : index
    %c0_131 = arith.constant 0 : index
    %c0_132 = arith.constant 0 : index
    %204 = vector.load %arg17[%c1_130, %c0_131, %c0_132] : memref<18x16x128xf32, #tpu.memory_space<vmem>>, vector<16x16x128xf32>
    tpu.vector_store %arg17[%c1_130, %c0_131, %c0_132], %203 {strides = array<i32>} : memref<18x16x128xf32, #tpu.memory_space<vmem>>, vector<16x16x128xf32>,
    %c0_133 = arith.constant 0 : index
    %c0_134 = arith.constant 0 : index
    %c0_135 = arith.constant 0 : index
    %c0_136 = arith.constant 0 : index
    %205 = vector.load %arg12[%c0_133, %c0_134, %c0_135, %c0_136] : memref<3x1x16x128xf32, #tpu.memory_space<vmem>>, vector<1x1x16x128xf32>
    %206 = vector.shape_cast %205 : vector<1x1x16x128xf32> to vector<1x16x128xf32>
    %c1_137 = arith.constant 1 : index
    %c0_138 = arith.constant 0 : index
    %c0_139 = arith.constant 0 : index
    %c0_140 = arith.constant 0 : index
    %207 = vector.load %arg12[%c1_137, %c0_138, %c0_139, %c0_140] : memref<3x1x16x128xf32, #tpu.memory_space<vmem>>, vector<1x1x16x128xf32>
    %208 = vector.shape_cast %207 : vector<1x1x16x128xf32> to vector<1x16x128xf32>
    %c2_141 = arith.constant 2 : index
    %c0_142 = arith.constant 0 : index
    %c0_143 = arith.constant 0 : index
    %c0_144 = arith.constant 0 : index
    %209 = vector.load %arg12[%c2_141, %c0_142, %c0_143, %c0_144] : memref<3x1x16x128xf32, #tpu.memory_space<vmem>>, vector<1x1x16x128xf32>
    %210 = vector.shape_cast %209 : vector<1x1x16x128xf32> to vector<1x16x128xf32>
    %c0_145 = arith.constant 0 : index
    %c0_146 = arith.constant 0 : index
    %c0_147 = arith.constant 0 : index
    %c0_148 = arith.constant 0 : index
    %211 = vector.load %arg13[%c0_145, %c0_146, %c0_147, %c0_148] : memref<3x1x1x128xf32, #tpu.memory_space<vmem>>, vector<1x1x1x128xf32>
    %212 = vector.shape_cast %211 : vector<1x1x1x128xf32> to vector<1x1x128xf32>
    %c1_149 = arith.constant 1 : index
    %c0_150 = arith.constant 0 : index
    %c0_151 = arith.constant 0 : index
    %c0_152 = arith.constant 0 : index
    %213 = vector.load %arg13[%c1_149, %c0_150, %c0_151, %c0_152] : memref<3x1x1x128xf32, #tpu.memory_space<vmem>>, vector<1x1x1x128xf32>
    %214 = vector.shape_cast %213 : vector<1x1x1x128xf32> to vector<1x1x128xf32>
    %c2_153 = arith.constant 2 : index
    %c0_154 = arith.constant 0 : index
    %c0_155 = arith.constant 0 : index
    %c0_156 = arith.constant 0 : index
    %215 = vector.load %arg13[%c2_153, %c0_154, %c0_155, %c0_156] : memref<3x1x1x128xf32, #tpu.memory_space<vmem>>, vector<1x1x1x128xf32>
    %216 = vector.shape_cast %215 : vector<1x1x1x128xf32> to vector<1x1x128xf32>
    %c0_157 = arith.constant 0 : index
    %c0_158 = arith.constant 0 : index
    %c0_159 = arith.constant 0 : index
    %c0_160 = arith.constant 0 : index
    %217 = vector.load %arg14[%c0_157, %c0_158, %c0_159, %c0_160] : memref<3x1x16x128xf32, #tpu.memory_space<vmem>>, vector<1x1x16x128xf32>
    %218 = vector.shape_cast %217 : vector<1x1x16x128xf32> to vector<1x16x128xf32>
    %c1_161 = arith.constant 1 : index
    %c0_162 = arith.constant 0 : index
    %c0_163 = arith.constant 0 : index
    %c0_164 = arith.constant 0 : index
    %219 = vector.load %arg14[%c1_161, %c0_162, %c0_163, %c0_164] : memref<3x1x16x128xf32, #tpu.memory_space<vmem>>, vector<1x1x16x128xf32>
    %220 = vector.shape_cast %219 : vector<1x1x16x128xf32> to vector<1x16x128xf32>
    %c2_165 = arith.constant 2 : index
    %c0_166 = arith.constant 0 : index
    %c0_167 = arith.constant 0 : index
    %c0_168 = arith.constant 0 : index
    %221 = vector.load %arg14[%c2_165, %c0_166, %c0_167, %c0_168] : memref<3x1x16x128xf32, #tpu.memory_space<vmem>>, vector<1x1x16x128xf32>
    %222 = vector.shape_cast %221 : vector<1x1x16x128xf32> to vector<1x16x128xf32>
    %c0_169 = arith.constant 0 : index
    %c0_170 = arith.constant 0 : index
    %c0_171 = arith.constant 0 : index
    %223 = vector.load %arg15[%c0_169, %c0_170, %c0_171] : memref<1x1x128xf32, #tpu.memory_space<vmem>>, vector<1x1x128xf32>
    %c0_172 = arith.constant 0 : index
    %c0_173 = arith.constant 0 : index
    %c0_174 = arith.constant 0 : index
    %224 = vector.load %arg17[%c0_172, %c0_173, %c0_174] : memref<18x16x128xf32, #tpu.memory_space<vmem>>, vector<4x16x128xf32>
    %225 = vector.broadcast %212 : vector<1x1x128xf32> to vector<4x16x128xf32>
    %226 = arith.mulf %224, %225 : vector<4x16x128xf32>
    %c1_i32_175 = arith.constant 1 : i32
    %227 = tpu.dynamic_rotate %224 by %c1_i32_175 dim 1 : vector<4x16x128xf32>, i32 -> vector<4x16x128xf32>
    %228 = vector.broadcast %206 : vector<1x16x128xf32> to vector<4x16x128xf32>
    %229 = arith.mulf %227, %228 : vector<4x16x128xf32>
    %230 = arith.addf %226, %229 : vector<4x16x128xf32>
    %c15_i32_176 = arith.constant 15 : i32
    %231 = tpu.dynamic_rotate %224 by %c15_i32_176 dim 1 : vector<4x16x128xf32>, i32 -> vector<4x16x128xf32>
    %232 = vector.broadcast %218 : vector<1x16x128xf32> to vector<4x16x128xf32>
    %233 = arith.mulf %231, %232 : vector<4x16x128xf32>
    %234 = arith.addf %230, %233 : vector<4x16x128xf32>
    %c1_177 = arith.constant 1 : index
    %c0_178 = arith.constant 0 : index
    %c0_179 = arith.constant 0 : index
    %235 = vector.load %arg17[%c1_177, %c0_178, %c0_179] : memref<18x16x128xf32, #tpu.memory_space<vmem>>, vector<4x16x128xf32>
    %236 = vector.broadcast %214 : vector<1x1x128xf32> to vector<4x16x128xf32>
    %237 = arith.mulf %235, %236 : vector<4x16x128xf32>
    %c1_i32_180 = arith.constant 1 : i32
    %238 = tpu.dynamic_rotate %235 by %c1_i32_180 dim 1 : vector<4x16x128xf32>, i32 -> vector<4x16x128xf32>
    %239 = vector.broadcast %208 : vector<1x16x128xf32> to vector<4x16x128xf32>
    %240 = arith.mulf %238, %239 : vector<4x16x128xf32>
    %241 = arith.addf %237, %240 : vector<4x16x128xf32>
    %c15_i32_181 = arith.constant 15 : i32
    %242 = tpu.dynamic_rotate %235 by %c15_i32_181 dim 1 : vector<4x16x128xf32>, i32 -> vector<4x16x128xf32>
    %243 = vector.broadcast %220 : vector<1x16x128xf32> to vector<4x16x128xf32>
    %244 = arith.mulf %242, %243 : vector<4x16x128xf32>
    %245 = arith.addf %241, %244 : vector<4x16x128xf32>
    %c2_182 = arith.constant 2 : index
    %c0_183 = arith.constant 0 : index
    %c0_184 = arith.constant 0 : index
    %246 = vector.load %arg17[%c2_182, %c0_183, %c0_184] : memref<18x16x128xf32, #tpu.memory_space<vmem>>, vector<4x16x128xf32>
    %247 = vector.broadcast %216 : vector<1x1x128xf32> to vector<4x16x128xf32>
    %248 = arith.mulf %246, %247 : vector<4x16x128xf32>
    %c1_i32_185 = arith.constant 1 : i32
    %249 = tpu.dynamic_rotate %246 by %c1_i32_185 dim 1 : vector<4x16x128xf32>, i32 -> vector<4x16x128xf32>
    %250 = vector.broadcast %210 : vector<1x16x128xf32> to vector<4x16x128xf32>
    %251 = arith.mulf %249, %250 : vector<4x16x128xf32>
    %252 = arith.addf %248, %251 : vector<4x16x128xf32>
    %c15_i32_186 = arith.constant 15 : i32
    %253 = tpu.dynamic_rotate %246 by %c15_i32_186 dim 1 : vector<4x16x128xf32>, i32 -> vector<4x16x128xf32>
    %254 = vector.broadcast %222 : vector<1x16x128xf32> to vector<4x16x128xf32>
    %255 = arith.mulf %253, %254 : vector<4x16x128xf32>
    %256 = arith.addf %252, %255 : vector<4x16x128xf32>
    %257 = arith.addf %234, %245 : vector<4x16x128xf32>
    %258 = arith.addf %257, %256 : vector<4x16x128xf32>
    %259 = vector.broadcast %223 : vector<1x1x128xf32> to vector<4x16x128xf32>
    %260 = arith.addf %258, %259 : vector<4x16x128xf32>
    %c0_187 = arith.constant 0 : index
    %c0_188 = arith.constant 0 : index
    %c0_189 = arith.constant 0 : index
    %c0_190 = arith.constant 0 : index
    %261 = vector.load %arg16[%c0_187, %c0_188, %c0_189, %c0_190] : memref<1x16x16x128xf32, #tpu.memory_space<vmem>>, vector<1x4x16x128xf32>
    %262 = vector.shape_cast %261 : vector<1x4x16x128xf32> to vector<4x16x128xf32>
    %263 = vector.shape_cast %260 : vector<4x16x128xf32> to vector<1x4x16x128xf32>
    tpu.vector_store %arg16[%c0_187, %c0_188, %c0_189, %c0_190], %263 {strides = array<i32>} : memref<1x16x16x128xf32, #tpu.memory_space<vmem>>, vector<1x4x16x128xf32>,
    %c4_191 = arith.constant 4 : index
    %c0_192 = arith.constant 0 : index
    %c0_193 = arith.constant 0 : index
    %264 = vector.load %arg17[%c4_191, %c0_192, %c0_193] : memref<18x16x128xf32, #tpu.memory_space<vmem>>, vector<4x16x128xf32>
    %265 = vector.broadcast %212 : vector<1x1x128xf32> to vector<4x16x128xf32>
    %266 = arith.mulf %264, %265 : vector<4x16x128xf32>
    %c1_i32_194 = arith.constant 1 : i32
    %267 = tpu.dynamic_rotate %264 by %c1_i32_194 dim 1 : vector<4x16x128xf32>, i32 -> vector<4x16x128xf32>
    %268 = vector.broadcast %206 : vector<1x16x128xf32> to vector<4x16x128xf32>
    %269 = arith.mulf %267, %268 : vector<4x16x128xf32>
    %270 = arith.addf %266, %269 : vector<4x16x128xf32>
    %c15_i32_195 = arith.constant 15 : i32
    %271 = tpu.dynamic_rotate %264 by %c15_i32_195 dim 1 : vector<4x16x128xf32>, i32 -> vector<4x16x128xf32>
    %272 = vector.broadcast %218 : vector<1x16x128xf32> to vector<4x16x128xf32>
    %273 = arith.mulf %271, %272 : vector<4x16x128xf32>
    %274 = arith.addf %270, %273 : vector<4x16x128xf32>
    %c5_196 = arith.constant 5 : index
    %c0_197 = arith.constant 0 : index
    %c0_198 = arith.constant 0 : index
    %275 = vector.load %arg17[%c5_196, %c0_197, %c0_198] : memref<18x16x128xf32, #tpu.memory_space<vmem>>, vector<4x16x128xf32>
    %276 = vector.broadcast %214 : vector<1x1x128xf32> to vector<4x16x128xf32>
    %277 = arith.mulf %275, %276 : vector<4x16x128xf32>
    %c1_i32_199 = arith.constant 1 : i32
    %278 = tpu.dynamic_rotate %275 by %c1_i32_199 dim 1 : vector<4x16x128xf32>, i32 -> vector<4x16x128xf32>
    %279 = vector.broadcast %208 : vector<1x16x128xf32> to vector<4x16x128xf32>
    %280 = arith.mulf %278, %279 : vector<4x16x128xf32>
    %281 = arith.addf %277, %280 : vector<4x16x128xf32>
    %c15_i32_200 = arith.constant 15 : i32
    %282 = tpu.dynamic_rotate %275 by %c15_i32_200 dim 1 : vector<4x16x128xf32>, i32 -> vector<4x16x128xf32>
    %283 = vector.broadcast %220 : vector<1x16x128xf32> to vector<4x16x128xf32>
    %284 = arith.mulf %282, %283 : vector<4x16x128xf32>
    %285 = arith.addf %281, %284 : vector<4x16x128xf32>
    %c6_201 = arith.constant 6 : index
    %c0_202 = arith.constant 0 : index
    %c0_203 = arith.constant 0 : index
    %286 = vector.load %arg17[%c6_201, %c0_202, %c0_203] : memref<18x16x128xf32, #tpu.memory_space<vmem>>, vector<4x16x128xf32>
    %287 = vector.broadcast %216 : vector<1x1x128xf32> to vector<4x16x128xf32>
    %288 = arith.mulf %286, %287 : vector<4x16x128xf32>
    %c1_i32_204 = arith.constant 1 : i32
    %289 = tpu.dynamic_rotate %286 by %c1_i32_204 dim 1 : vector<4x16x128xf32>, i32 -> vector<4x16x128xf32>
    %290 = vector.broadcast %210 : vector<1x16x128xf32> to vector<4x16x128xf32>
    %291 = arith.mulf %289, %290 : vector<4x16x128xf32>
    %292 = arith.addf %288, %291 : vector<4x16x128xf32>
    %c15_i32_205 = arith.constant 15 : i32
    %293 = tpu.dynamic_rotate %286 by %c15_i32_205 dim 1 : vector<4x16x128xf32>, i32 -> vector<4x16x128xf32>
    %294 = vector.broadcast %222 : vector<1x16x128xf32> to vector<4x16x128xf32>
    %295 = arith.mulf %293, %294 : vector<4x16x128xf32>
    %296 = arith.addf %292, %295 : vector<4x16x128xf32>
    %297 = arith.addf %274, %285 : vector<4x16x128xf32>
    %298 = arith.addf %297, %296 : vector<4x16x128xf32>
    %299 = vector.broadcast %223 : vector<1x1x128xf32> to vector<4x16x128xf32>
    %300 = arith.addf %298, %299 : vector<4x16x128xf32>
    %c0_206 = arith.constant 0 : index
    %c4_207 = arith.constant 4 : index
    %c0_208 = arith.constant 0 : index
    %c0_209 = arith.constant 0 : index
    %301 = vector.load %arg16[%c0_206, %c4_207, %c0_208, %c0_209] : memref<1x16x16x128xf32, #tpu.memory_space<vmem>>, vector<1x4x16x128xf32>
    %302 = vector.shape_cast %301 : vector<1x4x16x128xf32> to vector<4x16x128xf32>
    %303 = vector.shape_cast %300 : vector<4x16x128xf32> to vector<1x4x16x128xf32>
    tpu.vector_store %arg16[%c0_206, %c4_207, %c0_208, %c0_209], %303 {strides = array<i32>} : memref<1x16x16x128xf32, #tpu.memory_space<vmem>>, vector<1x4x16x128xf32>,
    %c8_210 = arith.constant 8 : index
    %c0_211 = arith.constant 0 : index
    %c0_212 = arith.constant 0 : index
    %304 = vector.load %arg17[%c8_210, %c0_211, %c0_212] : memref<18x16x128xf32, #tpu.memory_space<vmem>>, vector<4x16x128xf32>
    %305 = vector.broadcast %212 : vector<1x1x128xf32> to vector<4x16x128xf32>
    %306 = arith.mulf %304, %305 : vector<4x16x128xf32>
    %c1_i32_213 = arith.constant 1 : i32
    %307 = tpu.dynamic_rotate %304 by %c1_i32_213 dim 1 : vector<4x16x128xf32>, i32 -> vector<4x16x128xf32>
    %308 = vector.broadcast %206 : vector<1x16x128xf32> to vector<4x16x128xf32>
    %309 = arith.mulf %307, %308 : vector<4x16x128xf32>
    %310 = arith.addf %306, %309 : vector<4x16x128xf32>
    %c15_i32_214 = arith.constant 15 : i32
    %311 = tpu.dynamic_rotate %304 by %c15_i32_214 dim 1 : vector<4x16x128xf32>, i32 -> vector<4x16x128xf32>
    %312 = vector.broadcast %218 : vector<1x16x128xf32> to vector<4x16x128xf32>
    %313 = arith.mulf %311, %312 : vector<4x16x128xf32>
    %314 = arith.addf %310, %313 : vector<4x16x128xf32>
    %c9_215 = arith.constant 9 : index
    %c0_216 = arith.constant 0 : index
    %c0_217 = arith.constant 0 : index
    %315 = vector.load %arg17[%c9_215, %c0_216, %c0_217] : memref<18x16x128xf32, #tpu.memory_space<vmem>>, vector<4x16x128xf32>
    %316 = vector.broadcast %214 : vector<1x1x128xf32> to vector<4x16x128xf32>
    %317 = arith.mulf %315, %316 : vector<4x16x128xf32>
    %c1_i32_218 = arith.constant 1 : i32
    %318 = tpu.dynamic_rotate %315 by %c1_i32_218 dim 1 : vector<4x16x128xf32>, i32 -> vector<4x16x128xf32>
    %319 = vector.broadcast %208 : vector<1x16x128xf32> to vector<4x16x128xf32>
    %320 = arith.mulf %318, %319 : vector<4x16x128xf32>
    %321 = arith.addf %317, %320 : vector<4x16x128xf32>
    %c15_i32_219 = arith.constant 15 : i32
    %322 = tpu.dynamic_rotate %315 by %c15_i32_219 dim 1 : vector<4x16x128xf32>, i32 -> vector<4x16x128xf32>
    %323 = vector.broadcast %220 : vector<1x16x128xf32> to vector<4x16x128xf32>
    %324 = arith.mulf %322, %323 : vector<4x16x128xf32>
    %325 = arith.addf %321, %324 : vector<4x16x128xf32>
    %c10_220 = arith.constant 10 : index
    %c0_221 = arith.constant 0 : index
    %c0_222 = arith.constant 0 : index
    %326 = vector.load %arg17[%c10_220, %c0_221, %c0_222] : memref<18x16x128xf32, #tpu.memory_space<vmem>>, vector<4x16x128xf32>
    %327 = vector.broadcast %216 : vector<1x1x128xf32> to vector<4x16x128xf32>
    %328 = arith.mulf %326, %327 : vector<4x16x128xf32>
    %c1_i32_223 = arith.constant 1 : i32
    %329 = tpu.dynamic_rotate %326 by %c1_i32_223 dim 1 : vector<4x16x128xf32>, i32 -> vector<4x16x128xf32>
    %330 = vector.broadcast %210 : vector<1x16x128xf32> to vector<4x16x128xf32>
    %331 = arith.mulf %329, %330 : vector<4x16x128xf32>
    %332 = arith.addf %328, %331 : vector<4x16x128xf32>
    %c15_i32_224 = arith.constant 15 : i32
    %333 = tpu.dynamic_rotate %326 by %c15_i32_224 dim 1 : vector<4x16x128xf32>, i32 -> vector<4x16x128xf32>
    %334 = vector.broadcast %222 : vector<1x16x128xf32> to vector<4x16x128xf32>
    %335 = arith.mulf %333, %334 : vector<4x16x128xf32>
    %336 = arith.addf %332, %335 : vector<4x16x128xf32>
    %337 = arith.addf %314, %325 : vector<4x16x128xf32>
    %338 = arith.addf %337, %336 : vector<4x16x128xf32>
    %339 = vector.broadcast %223 : vector<1x1x128xf32> to vector<4x16x128xf32>
    %340 = arith.addf %338, %339 : vector<4x16x128xf32>
    %c0_225 = arith.constant 0 : index
    %c8_226 = arith.constant 8 : index
    %c0_227 = arith.constant 0 : index
    %c0_228 = arith.constant 0 : index
    %341 = vector.load %arg16[%c0_225, %c8_226, %c0_227, %c0_228] : memref<1x16x16x128xf32, #tpu.memory_space<vmem>>, vector<1x4x16x128xf32>
    %342 = vector.shape_cast %341 : vector<1x4x16x128xf32> to vector<4x16x128xf32>
    %343 = vector.shape_cast %340 : vector<4x16x128xf32> to vector<1x4x16x128xf32>
    tpu.vector_store %arg16[%c0_225, %c8_226, %c0_227, %c0_228], %343 {strides = array<i32>} : memref<1x16x16x128xf32, #tpu.memory_space<vmem>>, vector<1x4x16x128xf32>,
    %c12_229 = arith.constant 12 : index
    %c0_230 = arith.constant 0 : index
    %c0_231 = arith.constant 0 : index
    %344 = vector.load %arg17[%c12_229, %c0_230, %c0_231] : memref<18x16x128xf32, #tpu.memory_space<vmem>>, vector<4x16x128xf32>
    %345 = vector.broadcast %212 : vector<1x1x128xf32> to vector<4x16x128xf32>
    %346 = arith.mulf %344, %345 : vector<4x16x128xf32>
    %c1_i32_232 = arith.constant 1 : i32
    %347 = tpu.dynamic_rotate %344 by %c1_i32_232 dim 1 : vector<4x16x128xf32>, i32 -> vector<4x16x128xf32>
    %348 = vector.broadcast %206 : vector<1x16x128xf32> to vector<4x16x128xf32>
    %349 = arith.mulf %347, %348 : vector<4x16x128xf32>
    %350 = arith.addf %346, %349 : vector<4x16x128xf32>
    %c15_i32_233 = arith.constant 15 : i32
    %351 = tpu.dynamic_rotate %344 by %c15_i32_233 dim 1 : vector<4x16x128xf32>, i32 -> vector<4x16x128xf32>
    %352 = vector.broadcast %218 : vector<1x16x128xf32> to vector<4x16x128xf32>
    %353 = arith.mulf %351, %352 : vector<4x16x128xf32>
    %354 = arith.addf %350, %353 : vector<4x16x128xf32>
    %c13_234 = arith.constant 13 : index
    %c0_235 = arith.constant 0 : index
    %c0_236 = arith.constant 0 : index
    %355 = vector.load %arg17[%c13_234, %c0_235, %c0_236] : memref<18x16x128xf32, #tpu.memory_space<vmem>>, vector<4x16x128xf32>
    %356 = vector.broadcast %214 : vector<1x1x128xf32> to vector<4x16x128xf32>
    %357 = arith.mulf %355, %356 : vector<4x16x128xf32>
    %c1_i32_237 = arith.constant 1 : i32
    %358 = tpu.dynamic_rotate %355 by %c1_i32_237 dim 1 : vector<4x16x128xf32>, i32 -> vector<4x16x128xf32>
    %359 = vector.broadcast %208 : vector<1x16x128xf32> to vector<4x16x128xf32>
    %360 = arith.mulf %358, %359 : vector<4x16x128xf32>
    %361 = arith.addf %357, %360 : vector<4x16x128xf32>
    %c15_i32_238 = arith.constant 15 : i32
    %362 = tpu.dynamic_rotate %355 by %c15_i32_238 dim 1 : vector<4x16x128xf32>, i32 -> vector<4x16x128xf32>
    %363 = vector.broadcast %220 : vector<1x16x128xf32> to vector<4x16x128xf32>
    %364 = arith.mulf %362, %363 : vector<4x16x128xf32>
    %365 = arith.addf %361, %364 : vector<4x16x128xf32>
    %c14_239 = arith.constant 14 : index
    %c0_240 = arith.constant 0 : index
    %c0_241 = arith.constant 0 : index
    %366 = vector.load %arg17[%c14_239, %c0_240, %c0_241] : memref<18x16x128xf32, #tpu.memory_space<vmem>>, vector<4x16x128xf32>
    %367 = vector.broadcast %216 : vector<1x1x128xf32> to vector<4x16x128xf32>
    %368 = arith.mulf %366, %367 : vector<4x16x128xf32>
    %c1_i32_242 = arith.constant 1 : i32
    %369 = tpu.dynamic_rotate %366 by %c1_i32_242 dim 1 : vector<4x16x128xf32>, i32 -> vector<4x16x128xf32>
    %370 = vector.broadcast %210 : vector<1x16x128xf32> to vector<4x16x128xf32>
    %371 = arith.mulf %369, %370 : vector<4x16x128xf32>
    %372 = arith.addf %368, %371 : vector<4x16x128xf32>
    %c15_i32_243 = arith.constant 15 : i32
    %373 = tpu.dynamic_rotate %366 by %c15_i32_243 dim 1 : vector<4x16x128xf32>, i32 -> vector<4x16x128xf32>
    %374 = vector.broadcast %222 : vector<1x16x128xf32> to vector<4x16x128xf32>
    %375 = arith.mulf %373, %374 : vector<4x16x128xf32>
    %376 = arith.addf %372, %375 : vector<4x16x128xf32>
    %377 = arith.addf %354, %365 : vector<4x16x128xf32>
    %378 = arith.addf %377, %376 : vector<4x16x128xf32>
    %379 = vector.broadcast %223 : vector<1x1x128xf32> to vector<4x16x128xf32>
    %380 = arith.addf %378, %379 : vector<4x16x128xf32>
    %c0_244 = arith.constant 0 : index
    %c12_245 = arith.constant 12 : index
    %c0_246 = arith.constant 0 : index
    %c0_247 = arith.constant 0 : index
    %381 = vector.load %arg16[%c0_244, %c12_245, %c0_246, %c0_247] : memref<1x16x16x128xf32, #tpu.memory_space<vmem>>, vector<1x4x16x128xf32>
    %382 = vector.shape_cast %381 : vector<1x4x16x128xf32> to vector<4x16x128xf32>
    %383 = vector.shape_cast %380 : vector<4x16x128xf32> to vector<1x4x16x128xf32>
    tpu.vector_store %arg16[%c0_244, %c12_245, %c0_246, %c0_247], %383 {strides = array<i32>} : memref<1x16x16x128xf32, #tpu.memory_space<vmem>>, vector<1x4x16x128xf32>,
    return
  }
  func.func @transform_0(%arg0: i32) -> (i32, i32, i32, i32) {
    %c0_i32 = arith.constant 0 : i32
    %c0_i32_0 = arith.constant 0 : i32
    %c0_i32_1 = arith.constant 0 : i32
    %c0_i32_2 = arith.constant 0 : i32
    return %arg0, %c0_i32, %c0_i32_0, %c0_i32_1 : i32, i32, i32, i32
  }
  func.func @transform_1(%arg0: i32) -> (i32, i32, i32) {
    %c0_i32 = arith.constant 0 : i32
    %c0_i32_0 = arith.constant 0 : i32
    %c0_i32_1 = arith.constant 0 : i32
    %c0_i32_2 = arith.constant 0 : i32
    return %c0_i32, %c0_i32_0, %c0_i32_1 : i32, i32, i32
  }
  func.func @transform_2(%arg0: i32) -> (i32, i32, i32) {
    %c0_i32 = arith.constant 0 : i32
    %c0_i32_0 = arith.constant 0 : i32
    %c0_i32_1 = arith.constant 0 : i32
    %c0_i32_2 = arith.constant 0 : i32
    return %c0_i32, %c0_i32_0, %c0_i32_1 : i32, i32, i32
  }
  func.func @transform_3(%arg0: i32) -> (i32, i32) {
    %c0_i32 = arith.constant 0 : i32
    %c0_i32_0 = arith.constant 0 : i32
    %c0_i32_1 = arith.constant 0 : i32
    return %c0_i32, %c0_i32_0 : i32, i32
  }
  func.func @transform_4(%arg0: i32) -> (i32, i32) {
    %c0_i32 = arith.constant 0 : i32
    %c0_i32_0 = arith.constant 0 : i32
    %c0_i32_1 = arith.constant 0 : i32
    return %c0_i32, %c0_i32_0 : i32, i32
  }
  func.func @transform_5(%arg0: i32) -> (i32, i32, i32, i32) {
    %c0_i32 = arith.constant 0 : i32
    %c0_i32_0 = arith.constant 0 : i32
    %c0_i32_1 = arith.constant 0 : i32
    %c0_i32_2 = arith.constant 0 : i32
    %c0_i32_3 = arith.constant 0 : i32
    return %c0_i32, %c0_i32_0, %c0_i32_1, %c0_i32_2 : i32, i32, i32, i32
  }
  func.func @transform_6(%arg0: i32) -> (i32, i32, i32, i32) {
    %c0_i32 = arith.constant 0 : i32
    %c0_i32_0 = arith.constant 0 : i32
    %c0_i32_1 = arith.constant 0 : i32
    %c0_i32_2 = arith.constant 0 : i32
    %c0_i32_3 = arith.constant 0 : i32
    return %c0_i32, %c0_i32_0, %c0_i32_1, %c0_i32_2 : i32, i32, i32, i32
  }
  func.func @transform_7(%arg0: i32) -> (i32, i32, i32, i32) {
    %c0_i32 = arith.constant 0 : i32
    %c0_i32_0 = arith.constant 0 : i32
    %c0_i32_1 = arith.constant 0 : i32
    %c0_i32_2 = arith.constant 0 : i32
    %c0_i32_3 = arith.constant 0 : i32
    return %c0_i32, %c0_i32_0, %c0_i32_1, %c0_i32_2 : i32, i32, i32, i32
  }
  func.func @transform_8(%arg0: i32) -> (i32, i32, i32) {
    %c0_i32 = arith.constant 0 : i32
    %c0_i32_0 = arith.constant 0 : i32
    %c0_i32_1 = arith.constant 0 : i32
    %c0_i32_2 = arith.constant 0 : i32
    return %c0_i32, %c0_i32_0, %c0_i32_1 : i32, i32, i32
  }
  func.func @transform_9(%arg0: i32) -> (i32, i32) {
    %c0_i32 = arith.constant 0 : i32
    %c0_i32_0 = arith.constant 0 : i32
    %c0_i32_1 = arith.constant 0 : i32
    return %c0_i32, %c0_i32_0 : i32, i32
  }
  func.func @transform_10(%arg0: i32) -> (i32, i32) {
    %c0_i32 = arith.constant 0 : i32
    %c0_i32_0 = arith.constant 0 : i32
    %c0_i32_1 = arith.constant 0 : i32
    return %c0_i32, %c0_i32_0 : i32, i32
  }
  func.func @transform_11(%arg0: i32) -> (i32, i32, i32, i32) {
    %c0_i32 = arith.constant 0 : i32
    %c0_i32_0 = arith.constant 0 : i32
    %c0_i32_1 = arith.constant 0 : i32
    %c0_i32_2 = arith.constant 0 : i32
    %c0_i32_3 = arith.constant 0 : i32
    return %c0_i32, %c0_i32_0, %c0_i32_1, %c0_i32_2 : i32, i32, i32, i32
  }
  func.func @transform_12(%arg0: i32) -> (i32, i32, i32, i32) {
    %c0_i32 = arith.constant 0 : i32
    %c0_i32_0 = arith.constant 0 : i32
    %c0_i32_1 = arith.constant 0 : i32
    %c0_i32_2 = arith.constant 0 : i32
    %c0_i32_3 = arith.constant 0 : i32
    return %c0_i32, %c0_i32_0, %c0_i32_1, %c0_i32_2 : i32, i32, i32, i32
  }
  func.func @transform_13(%arg0: i32) -> (i32, i32, i32, i32) {
    %c0_i32 = arith.constant 0 : i32
    %c0_i32_0 = arith.constant 0 : i32
    %c0_i32_1 = arith.constant 0 : i32
    %c0_i32_2 = arith.constant 0 : i32
    %c0_i32_3 = arith.constant 0 : i32
    return %c0_i32, %c0_i32_0, %c0_i32_1, %c0_i32_2 : i32, i32, i32, i32
  }
  func.func @transform_14(%arg0: i32) -> (i32, i32, i32) {
    %c0_i32 = arith.constant 0 : i32
    %c0_i32_0 = arith.constant 0 : i32
    %c0_i32_1 = arith.constant 0 : i32
    %c0_i32_2 = arith.constant 0 : i32
    return %c0_i32, %c0_i32_0, %c0_i32_1 : i32, i32, i32
  }
  func.func @transform_15(%arg0: i32) -> (i32, i32, i32, i32) {
    %c0_i32 = arith.constant 0 : i32
    %c0_i32_0 = arith.constant 0 : i32
    %c0_i32_1 = arith.constant 0 : i32
    %c0_i32_2 = arith.constant 0 : i32
    return %arg0, %c0_i32, %c0_i32_0, %c0_i32_1 : i32, i32, i32, i32
  }
}

</mosaic_0001>

<bundles_post_ra>
// kernel: tpu_custom_call.1
= control target key start
LH: loop header
LB: loop body
LE: loop exit
PB: predicated region body
PF: predicated region fallthrough
CT: control target
= control target key end

     0   :  { %s7143_s0 = inlined_call_operand.hbm [shape: f32[2,16,16,128], index: 0, kind: input, shape index: {}]   ;;  %s7144_s1 = inlined_call_operand.hbm [shape: f32[1,1,128], index: 1, kind: input, shape index: {}]   ;;  %s7145_s2 = inlined_call_operand.hbm [shape: f32[1,1,128], index: 2, kind: input, shape index: {}]   ;;  %s7146_s3 = inlined_call_operand.hbm [shape: bf16[128,128], index: 3, kind: input, shape index: {}]   ;;  %s7147_s4 = inlined_call_operand.hbm [shape: f32[1,128], index: 4, kind: input, shape index: {}]   ;;  %s7148_s5 = inlined_call_operand.hbm [shape: f32[3,1,16,128], index: 5, kind: input, shape index: {}]   ;;  %s7149_s6 = inlined_call_operand.vmem [shape: f32[3,1,1,128], index: 6, kind: input, shape index: {}]   ;;  %s7150_s7 = inlined_call_operand.hbm [shape: f32[3,1,16,128], index: 7, kind: input, shape index: {}]   ;;  %s7151_s8 = inlined_call_operand.vmem [shape: f32[1,1,128], index: 8, kind: input, shape index: {}]   ;;  %s7152_s9 = inlined_call_operand.hbm [shape: bf16[128,128], index: 9, kind: input, shape index: {}]   ;;  %s7153_s10 = inlined_call_operand.vmem [shape: f32[1,128], index: 10, kind: input, shape index: {}]   ;;  %s7154_s11 = inlined_call_operand.hbm [shape: f32[3,1,16,128], index: 11, kind: input, shape index: {}]   ;;  %s7155_s12 = inlined_call_operand.vmem [shape: f32[3,1,1,128], index: 12, kind: input, shape index: {}]   ;;  %s7156_s13 = inlined_call_operand.hbm [shape: f32[3,1,16,128], index: 13, kind: input, shape index: {}]   ;;  %s7157_s14 = inlined_call_operand.vmem [shape: f32[1,1,128], index: 14, kind: input, shape index: {}]   ;;  %s7158_s15 = inlined_call_operand.hbm [shape: f32[2,16,16,128], index: 15, kind: output, shape index: {}]  }
   0x1   :  { %7274 = sst [smem:[#allocation78_spill]] %s7143_s0 }
   0x2   :  { %7275 = sst [smem:[#allocation79_spill]] %s7144_s1 }
   0x3   :  { %7276 = sst [smem:[#allocation80_spill]] %s7146_s3 }
   0x4   :  { %7277 = sst [smem:[#allocation81_spill]] %s7148_s5 }
   0x5   :  { %7278 = sst [smem:[#allocation82_spill]] %s7151_s8 }
   0x6   :  { %7279 = sst [smem:[#allocation83_spill]] %s7152_s9 }
   0x7   :  { %7280 = sst [smem:[#allocation84_spill]] %s7153_s10 }
   0x8   :  { %7281 = sst [smem:[#allocation85_spill]] %s7155_s12 }
   0x9   :  { %7282 = sst [smem:[#allocation86_spill]] %s7157_s14 }
   0xa   :  { %7283 = sst [smem:[#allocation87_spill]] %s7158_s15 }
   0xb   :  { %20 = vsyncpa [#allocation5], 0 }
   0xc   :  { %22 = vsyncpa [#allocation5 + $0x1], 0 }
   0xd   :  { %23 = vsyncpa [#allocation8], 0 }
   0xe   :  { %24 = vsyncpa [#allocation11], 0 }
   0xf   :  { %25 = vsyncpa [#allocation14], 0 }
  0x10   :  { %26 = vsyncpa [#allocation17], 0 }
  0x11   :  { %27 = vsyncpa [#allocation20], 0 }
  0x12   :  { %28 = vsyncpa [#allocation6], 0 }
  0x13   :  { %30 = vsyncpa [#allocation6 + $0x1], 0  ;;  %s4548_s18 = smov 0   ;;  %s4550_s19 = smov 0  }
  0x14   :  { %s4552_s20 = smov 0   ;;  %s4554_s21 = smov 0  }
  0x15 LB: > { %s7284_s1 = sld [smem:[#allocation79_spill]]  ;;  %s4572_s25 = sadd.s32 4294967295, %s4450_s21   ;;  %s4450_s21 = sphi %s4554_s21, %s7547_s21   ;;  %s4446_s20 = sphi %s4552_s20, %s7546_s20   ;;  %s4442_s19 = sphi %s4550_s19, %s7545_s19   ;;  %s4438_s18 = sphi %s4548_s18, %s7544_s18  }
  0x16   : > { %p3714_p0 = scmp.ge.s32.totalorder %s4450_s21, 1  ;;  %p57_p1 = scmp.eq.s32.totalorder %s4572_s25, 0 }
  0x17   : > { %p387_p2 = scmp.lt.s32.totalorder %s4450_s21, 3  ;;  %s4452_s27 = smov [#allocation7]  }
  0x18   : > { %s401_s28 = sshll.u32 %s4452_s27, 4  ;;  %s7286_s3 = sld [smem:[#allocation80_spill]]  ;;  %s402_s28 = int_to_ptr.vmem [resolvable:$true] %s401_s28 }
  0x19   : > { %p4577_p3 = pnand %p3714_p0, %p387_p2  ;;  %s4453_s22 = smov [#allocation10]  }
  0x1a   : > { %s424_s23 = sshll.u32 %s4453_s22, 4  ;;  %s4454_s27 = smov 64   ;;  %s425_s23 = int_to_ptr.vmem [resolvable:$true] %s424_s23 }
  0x1b   : > { %s399_s24 = sshll.u32 %s7284_s1, 4  ;;  %p3911_p5 = pneg %p4577_p3  ;;  %s400_s24 = int_to_ptr.hbm [resolvable:$true] %s399_s24 }
  0x1c   : > { %s4455_s1 = smov 4   ;;  %s7288_s5 = sld [smem:[#allocation81_spill]] }
  0x1d   : > { %p4589_p6 = pnand %p3911_p5, %p57_p1  ;;  %s4456_s15 = smov [#allocation13]  }
  0x1e   : > { %s422_s16 = sshll.u32 %s7286_s3, 4  ;;  %s450_s14 = sshll.u32 %s4456_s15, 4  ;;  %s423_s16 = int_to_ptr.hbm [resolvable:$true] %s422_s16  ;;  %s451_s14 = int_to_ptr.vmem [resolvable:$true] %s450_s14 }
  0x1f   : > { %3914 = dma.hbm_to_vmem [thread:$0]  (!%p4589_p6), %s400_s24, 16, %s402_s28, [#allocation8]  }
  0x20   : > { %3920 = dma.hbm_to_vmem [thread:$0]  (!%p4589_p6), %s423_s16, 1024, %s425_s23, [#allocation11], %s4454_s27, %s4454_s27, %s4455_s1  }
  0x21   : > { %s7289_s9 = sld [smem:[#allocation83_spill]]  ;;  %s7164_s8 = smov 128  }
  0x22   : > { %s448_s3 = sshll.u32 %s7288_s5, 4  ;;  %s7165_s24 = smov 8   ;;  %s449_s3 = int_to_ptr.hbm [resolvable:$true] %s448_s3 }
  0x23   : > { %3926 = dma.hbm_to_vmem [thread:$0]  (!%p4589_p6), %s449_s3, 768, %s451_s14, [#allocation14], %s7164_s8, %s7164_s8, %s7165_s24  }
  0x24   : > { %s4459_s28 = smov [#allocation16]   ;;  %s411_s15 = sshll.u32 %s7145_s2, 4  ;;  %s412_s15 = int_to_ptr.hbm [resolvable:$true] %s411_s15 }
  0x25   : > { %s484_s16 = sshll.u32 %s4459_s28, 4  ;;  %s437_s30 = sshll.u32 %s7147_s4, 4  ;;  %s485_s16 = int_to_ptr.vmem [resolvable:$true] %s484_s16  ;;  %s438_s30 = int_to_ptr.hbm [resolvable:$true] %s437_s30 }
  0x26   : > { %s4460_s5 = smov [#allocation9]   ;;  %s4461_s3 = smov [#allocation12]  }
  0x27   : > { %s482_s22 = sshll.u32 %s7289_s9, 4  ;;  %s413_s9 = sshll.u32 %s4460_s5, 4  ;;  %s483_s22 = int_to_ptr.hbm [resolvable:$true] %s482_s22  ;;  %s414_s9 = int_to_ptr.vmem [resolvable:$true] %s413_s9 }
  0x28   : > { %3932 = dma.hbm_to_vmem [thread:$0]  (!%p4589_p6), %s483_s22, 1024, %s485_s16, [#allocation17], %s4454_s27, %s4454_s27, %s4455_s1  }
  0x29   : > { %3917 = dma.hbm_to_vmem [thread:$0]  (!%p4589_p6), %s412_s15, 16, %s414_s9, [#allocation8]  }
  0x2a   : > { %s439_s14 = sshll.u32 %s4461_s3, 4  ;;  %s465_s29 = sshll.u32 %s7150_s7, 4  ;;  %s440_s14 = int_to_ptr.vmem [resolvable:$true] %s439_s14  ;;  %s466_s29 = int_to_ptr.hbm [resolvable:$true] %s465_s29 }
  0x2b   : > { %3923 = dma.hbm_to_vmem [thread:$0]  (!%p4589_p6), %s438_s30, 16, %s440_s14, [#allocation11]  }
  0x2c   : > { %s499_s5 = sshll.u32 %s7154_s11, 4  ;;  %s4462_s22 = smov [#allocation15]   ;;  %s500_s5 = int_to_ptr.hbm [resolvable:$true] %s499_s5 }
  0x2d   : > { %s467_s9 = sshll.u32 %s4462_s22, 4  ;;  %s4463_s16 = smov [#allocation18]   ;;  %s468_s9 = int_to_ptr.vmem [resolvable:$true] %s467_s9 }
  0x2e   : > { %3929 = dma.hbm_to_vmem [thread:$0]  (!%p4589_p6), %s466_s29, 768, %s468_s9, [#allocation14], %s7164_s8, %s7164_s8, %s7165_s24  }
  0x2f   : > { %s501_s15 = sshll.u32 %s4463_s16, 4  ;;  %s516_s30 = sshll.u32 %s7156_s13, 4  ;;  %s502_s15 = int_to_ptr.vmem [resolvable:$true] %s501_s15  ;;  %s517_s30 = int_to_ptr.hbm [resolvable:$true] %s516_s30 }
  0x30   : > { %3935 = dma.hbm_to_vmem [thread:$0]  (!%p4589_p6), %s500_s5, 768, %s502_s15, [#allocation17], %s7164_s8, %s7164_s8, %s7165_s24  }
  0x31   : > { %s4464_s3 = smov [#allocation19]   ;;  %s3713_s28 = sadd.s32 4294967294, %s4450_s21  }
  0x32   : > { %s518_s14 = sshll.u32 %s4464_s3, 4  ;;  %s4646_s23 = sadd.s32 1, %s4450_s21   ;;  %s519_s14 = int_to_ptr.vmem [resolvable:$true] %s518_s14 }
  0x33   : > { %3938 = dma.hbm_to_vmem [thread:$0]  (!%p4589_p6), %s517_s30, 768, %s519_s14, [#allocation20], %s7164_s8, %s7164_s8, %s7165_s24  }
  0x34   : > { %s43_s29 = sadd.s32 1, %s4446_s20  ;;  %s40_s1 = ssub.s32 %s4450_s21, %s4646_s23 }
  0x35   : > { %p50_p7 = scmp.ne.s32.totalorder %s4446_s20, %s4442_s19  ;;  %p41_p8 = scmp.eq.s32.totalorder %s40_s1, 0 }
  0x36   : > { %p51_p9 = scmp.eq.s32.totalorder %s4450_s21, 0  ;;  %p56_p10 = scmp.ne.s32.totalorder %s4442_s19, %s4438_s18 }
  0x37   : > { %p374_p11 = scmp.eq.s32.totalorder %s4572_s25, 1  ;;  %p380_p0 = scmp.eq.s32.totalorder %s3713_s28, 1 }
  0x38   : > { %s4658_s27 = scalar_select %p41_p8, %s4446_s20, %s43_s29  }
  0x39   : > { %p4662_p12 = por %p57_p1, %p56_p10  ;;  %p4666_p13 = por %p374_p11, %p50_p7 }
  0x3a   : > { %p52_p2 = por %p51_p9, %p50_p7  ;;  %s535_s22 = sand.u32 1, %s4446_s20  }
  0x3b   : > { %p4671_p5 = por %p380_p0, %p56_p10  ;;  %p3956_p6 = scmp.lt.s32.totalorder %s4450_s21, 2 }
  0x3c   : > { %s3725_s16 = sshll.u32 %s535_s22, 8  ;;  %s3837_s15 = sshll.u32 %s4450_s21, 8 }
  0x3d   : > { %s7293_s0 = sld [smem:[#allocation78_spill]]  ;;  %s539_s14 = scalar_lea.vmem [#allocation4], %s3725_s16 }
  0x3e   : > { %s547_s29 = sshll.u32 %s539_s14, 4  ;;  %p4680_p8 = pnand %p3956_p6, %p52_p2  ;;  %s548_s29 = int_to_ptr.vmem [resolvable:$true] %s547_s29 }
  0x3f   : > { %s536_s1 = scalar_lea.sflag [#allocation5], %s535_s22 }
  0x40   : > { %p4338_p9 = pneg %p4680_p8 }
  0x43   : > { %s544_s30 = scalar_lea.hbm %s7293_s0, %s3837_s15  ;;  %s4341_s16 = scalar_lea.hbm %s7293_s0, 512 }
  0x44   : > { %s545_s3 = sshll.u32 %s544_s30, 4  ;;  %s546_s3 = int_to_ptr.hbm [resolvable:$true] %s545_s3 }
  0x45   : > { %s4334_s8 = sshra.s32 %s546_s3, 4  ;;  %s4335_s8 = int_to_ptr.hbm [resolvable:$true] %s4334_s8 }
  0x46   : > { %s4336_s24 = scalar_lea.hbm %s4335_s8, 256  ;;  %p4342_p0 = scmp.lt.s32.totalorder %s4335_s8, %s7293_s0 }
  0x47   : > { %p4337_p7 = scmp.ne.s32.totalorder %s4335_s8, %s4336_s24  ;;  %p4343_p2 = scmp.lt.s32.totalorder %s4341_s16, %s4336_s24 }
  0x49   : > { %p4339_p10 = pnand %p4338_p9, %p4337_p7  ;;  %p4344_p6 = por %p4343_p2, %p4342_p0 }
  0x4b   : > { %p4340_p11 = pneg %p4339_p10 }
  0x4d   : > { %p4345_p4 = pnand %p4344_p6, %p4340_p11 }
  0x4f   : > { %4348 = shalt.err (!%p4345_p4)
}
  0x50   : > { %s7295_s22 = smov 8   ;;  %s7296_s14 = smov 128  }
  0x51   : > { %3942 = dma.hbm_to_vmem [thread:$0]  (!%p4680_p8), %s546_s3, 4096, %s548_s29, %s536_s1, %s7296_s14, %s7296_s14, %s7295_s22  }
  0x52   : > { %559 = sbr.rel (%p4577_p3) target bundleno = 708 (0x2c4), region = 80 }
  0x57   : > { %s4700_s15 = sand.u32 1, %s4442_s19  }
  0x58   : > { %s3729_s8 = sshll.u32 %s4700_s15, 8  ;;  %s562_s24 = scalar_lea.sflag [#allocation5], %s4700_s15 }
  0x59   : > { %s4706_s10 = scalar_lea.vmem [#allocation4], %s3729_s8 }
  0x5a   : > { %4409 = dma.done.wait (%p4662_p12), %s562_s24, 4096  }
  0x5b   : > { %4411 = vsyncadd (%p4662_p12), %s562_s24, 4294963200 }
  0x5c   : > { %4413 = dma.done.wait (%p57_p1), [#allocation8], 32  }
  0x5d   : > { %4415 = vsyncadd (%p57_p1), [#allocation8], 4294967264 }
  0x5e   : > { %4417 = dma.done.wait (%p57_p1), [#allocation11], 1040  }
  0x5f   : > { %4419 = vsyncadd (%p57_p1), [#allocation11], 4294966256 }
  0x60   : > { %4421 = dma.done.wait (%p57_p1), [#allocation14], 1536  }
  0x61   : > { %4423 = vsyncadd (%p57_p1), [#allocation14], 4294965760 }
  0x62   : > { %4425 = dma.done.wait (%p57_p1), [#allocation17], 1792  }
  0x63   : > { %4427 = vsyncadd (%p57_p1), [#allocation17], 4294965504 }
  0x64   : > { %4429 = dma.done.wait (%p57_p1), [#allocation20], 768  }
  0x65   : > { %4431 = vsyncadd (%p57_p1), [#allocation20], 4294966528  ;;  %v3845_v0 = vld [vmem:[#allocation10 + $0x38] sm:$0xff]  ;;  %v3844_v1 = vld [vmem:[#allocation10 + $0x30] sm:$0xff]  ;;  %s7300_s30 = sld [smem:[#allocation82_spill]]  ;;  %s6072_s16 = scalar_lea.vmem [#allocation21], %s3729_s8 }
  0x66   : > { %883 = vmatpush.bf16.msra.mxu0 %v3845_v0  ;;  %3855 = vmatpush.bf16.msra.mxu2 %v3845_v0  ;;  %v3843_v2 = vld [vmem:[#allocation10 + $0x28] sm:$0xff]  ;;  %v3842_v3 = vld [vmem:[#allocation10 + $0x20] sm:$0xff]  ;;  %v4732_v4 = vld [vmem:[#allocation7] ss:$0 sm:$0xff]  ;;  %s7400_s28 = sld [smem:[#allocation84_spill]]  ;;  %s3854_s12 = sshll.u32 %s4572_s25, 8 }
  0x67   : > { %v3841_v5 = vld [vmem:[#allocation10 + $0x18] sm:$0xff]  ;;  %v664_v7 = vld [vmem:[%s4706_s10 + $0x8] sm:$0xff]  ;;  %v3840_v11 = vld [vmem:[#allocation10 + $0x10] sm:$0xff]  ;;  %s7403_s14 = sld [smem:[#allocation85_spill]]  ;;  %s3551_s26 = sshll.u32 %s6072_s16, 4  ;;  %s3552_s26 = int_to_ptr.vmem [resolvable:$true] %s3551_s26 }
  0x68   : > { %v663_v6 = vld [vmem:[%s4706_s10] sm:$0xff]  ;;  %v700_v9 = vmul.f32 %v4732_v4, %v664_v7  ;;  %v3839_v14 = vld [vmem:[#allocation10 + $0x8] sm:$0xff]  ;;  %v666_v20 = vld [vmem:[%s4706_s10 + $0x18] sm:$0xff]  ;;  %s7450_s1 = sld [smem:[#allocation86_spill]]  ;;  %s3539_s3 = scalar_lea.sflag [#allocation6], %s4700_s15 }
  0x69   : > { %v699_v8 = vmul.f32 %v4732_v4, %v663_v6  ;;  %v4738_v10 = vld [vmem:[#allocation9] ss:$0 sm:$0xff]  ;;  %v3838_v17 = vld [vmem:[#allocation10] sm:$0xff]  ;;  %v665_v19 = vld [vmem:[%s4706_s10 + $0x10] sm:$0xff]  ;;  %v702_v22 = vmul.f32 %v4732_v4, %v666_v20 }
  0x6a   : > { %884 = vmatpush.bf16.msra.mxu0 %v3844_v1  ;;  %3856 = vmatpush.bf16.msra.mxu2 %v3844_v1  ;;  %v736_v13 = vadd.f32 %v4738_v10, %v700_v9  ;;  %v701_v21 = vmul.f32 %v4732_v4, %v665_v19  ;;  %v679_v27 = vld [vmem:[%s4706_s10 + $0x80] sm:$0xff]  ;;  %v680_v28 = vld [vmem:[%s4706_s10 + $0x88] sm:$0xff]  ;;  %v681_v45 = vld [vmem:[%s4706_s10 + $0x90] sm:$0xff] }
  0x6b   : > { %v735_v12 = vadd.f32 %v4738_v10, %v699_v8  ;;  %v738_v24 = vadd.f32 %v4738_v10, %v702_v22  ;;  %v715_v29 = vmul.f32 %v4732_v4, %v679_v27  ;;  %v716_v30 = vmul.f32 %v4732_v4, %v680_v28  ;;  %v667_v32 = vld [vmem:[%s4706_s10 + $0x20] sm:$0xff]  ;;  %v668_v33 = vld [vmem:[%s4706_s10 + $0x28] sm:$0xff]  ;;  %v682_v46 = vld [vmem:[%s4706_s10 + $0x98] sm:$0xff] }
  0x6c   : > { %v768_v16 = vmax.f32 %v736_v13, 0.0  ;;  %v737_v23 = vadd.f32 %v4738_v10, %v701_v21  ;;  %v703_v38 = vmul.f32 %v4732_v4, %v667_v32  ;;  %v704_v39 = vmul.f32 %v4732_v4, %v668_v33  ;;  %v669_v50 = vld [vmem:[%s4706_s10 + $0x30] sm:$0xff]  ;;  %v670_v51 = vld [vmem:[%s4706_s10 + $0x38] sm:$0xff]  ;;  %v683_v63 = vld [vmem:[%s4706_s10 + $0xa0] sm:$0xff] }
  0x6d   : > { %v767_v15 = vmax.f32 %v735_v12, 0.0  ;;  %v770_v26 = vmax.f32 %v738_v24, 0.0  ;;  %v751_v34 = vadd.f32 %v4738_v10, %v715_v29  ;;  %v752_v35 = vadd.f32 %v4738_v10, %v716_v30  ;;  %v684_v0 = vld [vmem:[%s4706_s10 + $0xa8] sm:$0xff]  ;;  %v685_v19 = vld [vmem:[%s4706_s10 + $0xb0] sm:$0xff]  ;;  %v686_v20 = vld [vmem:[%s4706_s10 + $0xb8] sm:$0xff] }
  0x6e   : > { %885 = vmatpush.bf16.msra.mxu0 %v3843_v2  ;;  %3857 = vmatpush.bf16.msra.mxu2 %v3843_v2  ;;  %v769_v25 = vmax.f32 %v737_v23, 0.0  ;;  %v739_v41 = vadd.f32 %v4738_v10, %v703_v38  ;;  %v740_v42 = vadd.f32 %v4738_v10, %v704_v39  ;;  %v717_v47 = vmul.f32 %v4732_v4, %v681_v45  ;;  %v672_v6 = vld [vmem:[%s4706_s10 + $0x48] sm:$0xff]  ;;  %v673_v24 = vld [vmem:[%s4706_s10 + $0x50] sm:$0xff] }
  0x6f   : > { %v799_v18 = vpack.c.bf16 %v768_v16, %v767_v15  ;;  %v783_v36 = vmax.f32 %v751_v34, 0.0  ;;  %v784_v37 = vmax.f32 %v752_v35, 0.0  ;;  %v718_v48 = vmul.f32 %v4732_v4, %v682_v46  ;;  %v688_v38 = vld [vmem:[%s4706_s10 + $0xc8] sm:$0xff] }
  0x70   : > { %v800_v31 = vpack.c.bf16 %v770_v26, %v769_v25  ;;  %v771_v43 = vmax.f32 %v739_v41, 0.0  ;;  %v772_v44 = vmax.f32 %v740_v42, 0.0  ;;  %v753_v52 = vadd.f32 %v4738_v10, %v717_v47  ;;  %v674_v25 = vld [vmem:[%s4706_s10 + $0x58] sm:$0xff]  ;;  %v675_v42 = vld [vmem:[%s4706_s10 + $0x60] sm:$0xff] }
  0x71   : > { %v807_v40 = vpack.c.bf16 %v784_v37, %v783_v36  ;;  %v754_v53 = vadd.f32 %v4738_v10, %v718_v48  ;;  %v705_v56 = vmul.f32 %v4732_v4, %v669_v50  ;;  %v706_v57 = vmul.f32 %v4732_v4, %v670_v51  ;;  %v687_v37 = vld [vmem:[%s4706_s10 + $0xc0] sm:$0xff] }
  0x72   : > { %886 = vmatpush.bf16.msra.mxu0 %v3842_v3  ;;  %3858 = vmatpush.bf16.msra.mxu2 %v3842_v3  ;;  %v801_v49 = vpack.c.bf16 %v772_v44, %v771_v43  ;;  %v785_v54 = vmax.f32 %v753_v52, 0.0  ;;  %v719_v1 = vmul.f32 %v4732_v4, %v683_v63  ;;  %v720_v2 = vmul.f32 %v4732_v4, %v684_v0  ;;  %v676_v43 = vld [vmem:[%s4706_s10 + $0x68] sm:$0xff] }
  0x73   : > { %v786_v55 = vmax.f32 %v754_v53, 0.0  ;;  %v741_v59 = vadd.f32 %v4738_v10, %v705_v56  ;;  %v742_v60 = vadd.f32 %v4738_v10, %v706_v57  ;;  %v708_v13 = vmul.f32 %v4732_v4, %v672_v6  ;;  %v690_v56 = vld [vmem:[%s4706_s10 + $0xd8] sm:$0xff] }
  0x74   : > { %v755_v7 = vadd.f32 %v4738_v10, %v719_v1  ;;  %v756_v8 = vadd.f32 %v4738_v10, %v720_v2  ;;  %v721_v21 = vmul.f32 %v4732_v4, %v685_v19  ;;  %v722_v22 = vmul.f32 %v4732_v4, %v686_v20 }
  0x75   : > { %v808_v58 = vpack.c.bf16 %v786_v55, %v785_v54  ;;  %v773_v61 = vmax.f32 %v741_v59, 0.0  ;;  %v774_v62 = vmax.f32 %v742_v60, 0.0  ;;  %v744_v16 = vadd.f32 %v4738_v10, %v708_v13  ;;  %v689_v55 = vld [vmem:[%s4706_s10 + $0xd0] sm:$0xff]  ;;  %v692_v13 = vld [vmem:[%s4706_s10 + $0xe8] sm:$0xff] }
  0x76   : > { %887 = vmatpush.bf16.msra.mxu0 %v3841_v5  ;;  %3859 = vmatpush.bf16.msra.mxu2 %v3841_v5  ;;  %v671_v5 = vld [vmem:[%s4706_s10 + $0x40] sm:$0xff]  ;;  %v787_v9 = vmax.f32 %v755_v7, 0.0  ;;  %v757_v26 = vadd.f32 %v4738_v10, %v721_v21  ;;  %v758_v27 = vadd.f32 %v4738_v10, %v722_v22  ;;  %v709_v30 = vmul.f32 %v4732_v4, %v673_v24  ;;  %v677_v60 = vld [vmem:[%s4706_s10 + $0x70] sm:$0xff] }
  0x77   : > { %v802_v3 = vpack.c.bf16 %v774_v62, %v773_v61  ;;  %v707_v12 = vmul.f32 %v4732_v4, %v671_v5  ;;  %v723_v39 = vmul.f32 %v4732_v4, %v687_v37  ;;  %v711_v48 = vmul.f32 %v4732_v4, %v675_v42  ;;  %v678_v61 = vld [vmem:[%s4706_s10 + $0x78] sm:$0xff]  ;;  %v3851_v22 = vld [vmem:[#allocation16 + $0x28] sm:$0xff]  ;;  %v3850_v24 = vld [vmem:[#allocation16 + $0x20] sm:$0xff] }
  0x78   : > { %v789_v28 = vmax.f32 %v757_v26, 0.0  ;;  %v790_v29 = vmax.f32 %v758_v27, 0.0  ;;  %v745_v33 = vadd.f32 %v4738_v10, %v709_v30  ;;  %v725_v57 = vmul.f32 %v4732_v4, %v689_v55  ;;  %v693_v26 = vld [vmem:[%s4706_s10 + $0xf0] sm:$0xff]  ;;  %v694_v27 = vld [vmem:[%s4706_s10 + $0xf8] sm:$0xff]  ;;  %v4871_v55 = vld [vmem:[%s7149_s6 + $0x1] ss:$0 sm:$0xff] }
  0x79   : > { %v743_v15 = vadd.f32 %v4738_v10, %v707_v12  ;;  %v759_v44 = vadd.f32 %v4738_v10, %v723_v39  ;;  %v747_v51 = vadd.f32 %v4738_v10, %v711_v48  ;;  %v713_v2 = vmul.f32 %v4732_v4, %v677_v60  ;;  %v691_v12 = vld [vmem:[%s4706_s10 + $0xe0] sm:$0xff]  ;;  %v3848_v30 = vld [vmem:[#allocation16 + $0x10] sm:$0xff]  ;;  %s7542_s10 = sld [smem:[#allocation87_spill]] }
  0x7a   : > { %888 = vmatpush.bf16.msra.mxu0 %v3840_v11  ;;  %3860 = vmatpush.bf16.msra.mxu2 %v3840_v11  ;;  %v788_v11 = vmax.f32 %v756_v8, 0.0  ;;  %v810_v32 = vpack.c.bf16 %v790_v29, %v789_v28  ;;  %v777_v35 = vmax.f32 %v745_v33, 0.0  ;;  %v761_v62 = vadd.f32 %v4738_v10, %v725_v57  ;;  %v4832_v39 = vld [vmem:[#allocation12] ss:$0 sm:$0xff]  ;;  %v4852_v48 = vld [vmem:[%s7149_s6] ss:$0 sm:$0xff] }
  0x7b   : > { %v791_v46 = vmax.f32 %v759_v44, 0.0  ;;  %v779_v53 = vmax.f32 %v747_v51, 0.0  ;;  %v749_v6 = vadd.f32 %v4738_v10, %v713_v2  ;;  %v729_v28 = vmul.f32 %v4732_v4, %v693_v26  ;;  %v4856_v51 = vld [vmem:[#allocation13 + $0x18] sm:$0xff]  ;;  %v4891_v2 = vld [vmem:[#allocation15] sm:$0xff] }
  0x7c   : > { %v793_v0 = vmax.f32 %v761_v62, 0.0  ;;  %v730_v29 = vmul.f32 %v4732_v4, %v694_v27  ;;  %v4465_v44 = vmov 0.0   ;;  %v4932_v27 = vld [vmem:[#allocation13 + $0x20] sm:$0xff] }
  0x7d   : > { %v781_v8 = vmax.f32 %v749_v6, 0.0  ;;  %v4896_v6 = vld [vmem:[#allocation15 + $0x8] sm:$0xff] }
  0x7e   : > { %889 = vmatpush.bf16.msra.mxu0 %v3839_v14  ;;  %3861 = vmatpush.bf16.msra.mxu2 %v3839_v14  ;;  %v809_v14 = vpack.c.bf16 %v788_v11, %v787_v9  ;;  %v3853_v11 = vld [vmem:[#allocation16 + $0x38] sm:$0xff]  ;;  %v766_v33 = vadd.f32 %v4738_v10, %v730_v29 }
  0x7f   : > { %2292 = vmatpush.bf16.msra.mxu1 %v3853_v11  ;;  %3863 = vmatpush.bf16.msra.mxu3 %v3853_v11  ;;  %s3550_s25 = scalar_lea.hbm %s7542_s10, %s3854_s12  ;;  %s4384_s24 = scalar_lea.hbm %s7542_s10, 512 }
  0x80   : > { %s3553_s17 = sshll.u32 %s3550_s25, 4  ;;  %s3554_s17 = int_to_ptr.hbm [resolvable:$true] %s3553_s17 }
  0x81   : > { %s4378_s29 = sshra.s32 %s3554_s17, 4  ;;  %s4379_s29 = int_to_ptr.hbm [resolvable:$true] %s4378_s29 }
  0x82   : > { %890 = vmatpush.bf16.msra.mxu0 %v3838_v17  ;;  %3862 = vmatpush.bf16.msra.mxu2 %v3838_v17  ;;  %v775_v17 = vmax.f32 %v743_v15, 0.0  ;;  %v728_v15 = vmul.f32 %v4732_v4, %v692_v13  ;;  %s4380_s8 = scalar_lea.hbm %s4379_s29, 256  ;;  %p4385_p12 = scmp.lt.s32.totalorder %s4379_s29, %s7542_s10 }
  0x83   : > { %p4381_p1 = scmp.ne.s32.totalorder %s4379_s29, %s4380_s8  ;;  %p4386_p8 = scmp.lt.s32.totalorder %s4384_s24, %s4380_s8 }
  0x84   : > { %v764_v19 = vadd.f32 %v4738_v10, %v728_v15 }
  0x85   : > { %891 = vmatmul.bf16.vlgmr.msra.gmra.mxu0 %v799_v18  ;;  %931 = vmatmul.bf16.vlgmr.msra.gmra.mxu2 %v807_v40  ;;  %v776_v18 = vmax.f32 %v744_v16, 0.0  ;;  %v724_v40 = vmul.f32 %v4732_v4, %v688_v38  ;;  %v1054_v38 = vlaneseq  ;;  %p4382_p3 = pnand %p4381_p1, %p4666_p13  ;;  %p4387_p7 = por %p4386_p8, %p4385_p12 }
  0x86   : > { %v796_v21 = vmax.f32 %v764_v19, 0.0 }
  0x87   : > { %v803_v23 = vpack.c.bf16 %v776_v18, %v775_v17  ;;  %v760_v45 = vadd.f32 %v4738_v10, %v724_v40  ;;  %v3852_v17 = vld [vmem:[#allocation16 + $0x30] sm:$0xff]  ;;  %v3846_v40 = vld [vmem:[#allocation16] sm:$0xff]  ;;  %p4383_p4 = pneg %p4382_p3 }
  0x88   : > { %2293 = vmatpush.bf16.msra.mxu1 %v3852_v17  ;;  %3864 = vmatpush.bf16.msra.mxu3 %v3852_v17 }
  0x89   : > { %v792_v47 = vmax.f32 %v760_v45, 0.0  ;;  %v4844_v45 = vrot.slane %v4465_v44, 7  ;;  %p4388_p9 = pnand %p4387_p7, %p4383_p4 }
  0x8b   : > { %v811_v50 = vpack.c.bf16 %v792_v47, %v791_v46  ;;  %7298 = vst [vmem:[#allocation30_spill] sm:$0xff] %v4844_v45  ;;  %v4847_v47 = vld [vmem:[#allocation13] sm:$0xff] }
  0x8c   : > { %2294 = vmatpush.bf16.msra.mxu1 %v3851_v22  ;;  %3865 = vmatpush.bf16.msra.mxu3 %v3851_v22  ;;  %v1065_v57 = vmul.f32 %v4844_v45, %v4847_v47 }
  0x90   : > { %2295 = vmatpush.bf16.msra.mxu1 %v3850_v24  ;;  %3866 = vmatpush.bf16.msra.mxu3 %v3850_v24 }
  0x95   : > { %896 = vmatmul.bf16.gmra.mxu0 %v800_v31  ;;  %936 = vmatmul.bf16.gmra.mxu2 %v808_v58  ;;  %v710_v31 = vmul.f32 %v4732_v4, %v674_v25  ;;  %v726_v58 = vmul.f32 %v4732_v4, %v690_v56  ;;  %v3849_v25 = vld [vmem:[#allocation16 + $0x18] sm:$0xff]  ;;  %v1038_v56 = vmul.f32 0.0, %v4852_v48 }
  0x96   : > { %2296 = vmatpush.bf16.msra.mxu1 %v3849_v25  ;;  %3867 = vmatpush.bf16.msra.mxu3 %v3849_v25 }
  0x97   : > { %v746_v34 = vadd.f32 %v4738_v10, %v710_v31  ;;  %v762_v63 = vadd.f32 %v4738_v10, %v726_v58 }
  0x99   : > { %v778_v36 = vmax.f32 %v746_v34, 0.0  ;;  %v794_v1 = vmax.f32 %v762_v63, 0.0 }
  0x9a   : > { %2297 = vmatpush.bf16.msra.mxu1 %v3848_v30  ;;  %3868 = vmatpush.bf16.msra.mxu3 %v3848_v30 }
  0x9b   : > { %v804_v41 = vpack.c.bf16 %v778_v36, %v777_v35  ;;  %v812_v5 = vpack.c.bf16 %v794_v1, %v793_v0  ;;  %v798_v35 = vmax.f32 %v766_v33, 0.0  ;;  %v3847_v36 = vld [vmem:[#allocation16 + $0x8] sm:$0xff]  ;;  %v4936_v33 = vld [vmem:[#allocation15 + $0x20] sm:$0xff] }
  0x9e   : > { %2298 = vmatpush.bf16.msra.mxu1 %v3847_v36  ;;  %3869 = vmatpush.bf16.msra.mxu3 %v3847_v36 }
  0xa2   : > { %2299 = vmatpush.bf16.msra.mxu1 %v3846_v40  ;;  %3870 = vmatpush.bf16.msra.mxu3 %v3846_v40 }
  0xa5   : > { %901 = vmatmul.bf16.gmra.mxu0 %v801_v49  ;;  %941 = vmatmul.bf16.gmra.mxu2 %v809_v14  ;;  %v712_v49 = vmul.f32 %v4732_v4, %v676_v43  ;;  %v727_v14 = vmul.f32 %v4732_v4, %v691_v12 }
  0xa7   : > { %v748_v52 = vadd.f32 %v4738_v10, %v712_v49  ;;  %v763_v18 = vadd.f32 %v4738_v10, %v727_v14  ;;  %v4854_v49 = vld [vmem:[#allocation13 + $0x8] sm:$0xff] }
  0xa9   : > { %v780_v54 = vmax.f32 %v748_v52, 0.0  ;;  %v795_v20 = vmax.f32 %v763_v18, 0.0 }
  0xab   : > { %v805_v59 = vpack.c.bf16 %v780_v54, %v779_v53  ;;  %v4866_v54 = vld [vmem:[#allocation13 + $0x10] sm:$0xff] }
  0xb5   : > { %906 = vmatmul.bf16.gmra.mxu0 %v802_v3  ;;  %946 = vmatmul.bf16.gmra.mxu2 %v810_v32  ;;  %v714_v3 = vmul.f32 %v4732_v4, %v678_v61  ;;  %v765_v32 = vadd.f32 %v4738_v10, %v729_v28  ;;  %v4881_v61 = vrot.slane %v4465_v44, 1  ;;  %v4934_v28 = vld [vmem:[#allocation13 + $0x28] sm:$0xff] }
  0xb7   : > { %v750_v7 = vadd.f32 %v4738_v10, %v714_v3  ;;  %v797_v34 = vmax.f32 %v765_v32, 0.0  ;;  %v4837_v10 = vshrl.u32 %v1054_v38, 7  ;;  %7299 = vst [vmem:[#allocation31_spill] sm:$0xff] %v4881_v61  ;;  %v1073_v3 = vadd.f32 %v1065_v57, %v1038_v56 }
  0xb8   : > { %v1098_v15 = vmul.f32 %v4881_v61, %v4891_v2 }
  0xb9   : > { %v782_v9 = vmax.f32 %v750_v7, 0.0  ;;  %v814_v37 = vpack.c.bf16 %v798_v35, %v797_v34  ;;  %7297 = vst [vmem:[#allocation29_spill] sm:$0xff] %v4837_v10  ;;  %vm1056_vm0 = vcmp.lt.s32.totalorder %v4837_v10, 1  ;;  %vm1089_vm1 = vcmp.lt.s32.totalorder %v4837_v10, 7  ;;  %v4898_v7 = vld [vmem:[#allocation15 + $0x10] sm:$0xff]  ;;  %v4938_v34 = vld [vmem:[#allocation15 + $0x28] sm:$0xff] }
  0xba   : > { %v1106_v29 = vadd.f32 %v1098_v15, %v1073_v3 }
  0xbb   : > { %v806_v16 = vpack.c.bf16 %v782_v9, %v781_v8  ;;  %v4900_v8 = vld [vmem:[#allocation15 + $0x18] sm:$0xff] }
  0xc5   : > { %911 = vmatmul.bf16.gmra.mxu0 %v803_v23  ;;  %951 = vmatmul.bf16.gmra.mxu2 %v811_v50  ;;  %v813_v23 = vpack.c.bf16 %v796_v21, %v795_v20  ;;  %v4924_v21 = vld [vmem:[%s7149_s6 + $0x2] ss:$0 sm:$0xff] }
  0xd5   : > { %916 = vmatmul.bf16.gmra.mxu0 %v804_v41  ;;  %956 = vmatmul.bf16.gmra.mxu2 %v812_v5 }
  0xe5   : > { %921 = vmatmul.bf16.gmra.mxu0 %v805_v59  ;;  %961 = vmatmul.bf16.gmra.mxu2 %v813_v23  ;;  %v1066_v59 = vmul.f32 %v4844_v45, %v4854_v49 }
  0xe7   : > { %v1074_v9 = vadd.f32 %v1066_v59, %v1038_v56 }
  0xf5   : > { %926 = vmatmul.bf16.gmra.mxu0 %v806_v16  ;;  %966 = vmatmul.bf16.gmra.mxu2 %v814_v37  ;;  %v1099_v16 = vmul.f32 %v4881_v61, %v4896_v6 }
  0xf7   : > { %v1107_v30 = vadd.f32 %v1099_v16, %v1074_v9 }
 0x102   : > { %v892_v31 = vpop.f32.mrf.mxu0 }
 0x103   : > { %v4840_v42 = vadd.f32 %v4832_v39, %v892_v31 }
 0x105   : > { %v1047_v46 = vrot.slane %v4840_v42, 7  ;;  %v1082_v63 = vrot.slane %v4840_v42, 1  ;;  %v1125_v0 = vmul.f32 %v4871_v55, %v4840_v42 }
 0x108   : > { %v4926_v22 = vpop.f32.mrf.mxu2 }
 0x10a   : > { %v894_v4 = vpop.f32.mrf.mxu0 }
 0x10b   : > { %v4835_v41 = vadd.f32 %v4832_v39, %v894_v4 }
 0x10d   : > { %v1051_v43 = vrot.slane %v4835_v41, 7  ;;  %v1086_v58 = vrot.slane %v4835_v41, 1  ;;  %v1126_v1 = vmul.f32 %v4871_v55, %v4835_v41 }
 0x10f   : > { %v4860_v52 = vsel %vm1056_vm0, %v1047_v46, %v1051_v43  ;;  %v4864_v53 = vsel %vm1056_vm0, %v1051_v43, %v1047_v46  ;;  %v4904_v11 = vsel %vm1089_vm1, %v1082_v63, %v1086_v58  ;;  %v4908_v12 = vsel %vm1089_vm1, %v1086_v58, %v1082_v63 }
 0x110   : > { %v1150_v60 = vmul.f32 %v4860_v52, %v4856_v51  ;;  %v1149_v62 = vmul.f32 %v4864_v53, %v4866_v54  ;;  %v1181_v19 = vmul.f32 %v4904_v11, %v4898_v7  ;;  %v1182_v20 = vmul.f32 %v4908_v12, %v4900_v8 }
 0x111   : > { %v1068_v15 = vmul.f32 %v4860_v52, %v4854_v49  ;;  %v1067_v16 = vmul.f32 %v4864_v53, %v4847_v47 }
 0x112   : > { %v897_v50 = vpop.f32.mrf.mxu0  ;;  %v1158_v13 = vadd.f32 %v1150_v60, %v1126_v1  ;;  %v1157_v17 = vadd.f32 %v1149_v62, %v1125_v0  ;;  %v4971_v0 = vld [vmem:[%s7300_s30] ss:$0 sm:$0xff]  ;;  %v934_v1 = vpop.f32.mrf.mxu2 }
 0x113   : > { %v4894_v5 = vadd.f32 %v4832_v39, %v897_v50 }
 0x114   : > { %v1189_v31 = vadd.f32 %v1181_v19, %v1157_v17  ;;  %v1190_v32 = vadd.f32 %v1182_v20, %v1158_v13 }
 0x115   : > { %v1048_v23 = vrot.slane %v4894_v5, 7  ;;  %v1083_v24 = vrot.slane %v4894_v5, 1  ;;  %v1209_v40 = vmul.f32 %v4924_v21, %v4894_v5  ;;  %v1127_v17 = vmul.f32 %v4871_v55, %v4894_v5 }
 0x116   : > { %v1281_v62 = vadd.f32 %v1189_v31, %v1106_v29  ;;  %v1282_v63 = vadd.f32 %v1190_v32, %v1107_v30 }
 0x11a   : > { %v899_v14 = vpop.f32.mrf.mxu0 }
 0x11b   : > { %v4915_v18 = vadd.f32 %v4832_v39, %v899_v14 }
 0x11d   : > { %v1052_v25 = vrot.slane %v4915_v18, 7  ;;  %v1087_v26 = vrot.slane %v4915_v18, 1  ;;  %v1210_v4 = vmul.f32 %v4924_v21, %v4915_v18  ;;  %v1128_v19 = vmul.f32 %v4871_v55, %v4915_v18 }
 0x11f   : > { %v4942_v35 = vsel %vm1056_vm0, %v1048_v23, %v1052_v25  ;;  %v4946_v36 = vsel %vm1056_vm0, %v1052_v25, %v1048_v23  ;;  %v4950_v37 = vsel %vm1089_vm1, %v1083_v24, %v1087_v26  ;;  %v4954_v38 = vsel %vm1089_vm1, %v1087_v26, %v1083_v24 }
 0x120   : > { %v1233_v43 = vmul.f32 %v4946_v36, %v4932_v27  ;;  %v1234_v44 = vmul.f32 %v4942_v35, %v4934_v28  ;;  %v1265_v57 = vmul.f32 %v4950_v37, %v4936_v33  ;;  %v1266_v58 = vmul.f32 %v4954_v38, %v4938_v34 }
 0x121   : > { %v1151_v13 = vmul.f32 %v4946_v36, %v4866_v54  ;;  %v1152_v14 = vmul.f32 %v4942_v35, %v4856_v51  ;;  %v1040_v24 = vmul.f32 %v4852_v48, %v4840_v42  ;;  %v1041_v25 = vmul.f32 %v4852_v48, %v4835_v41 }
 0x122   : > { %v902_v46 = vpop.f32.mrf.mxu0  ;;  %v1241_v50 = vadd.f32 %v1233_v43, %v1209_v40  ;;  %v1242_v56 = vadd.f32 %v1234_v44, %v1210_v4  ;;  %v1183_v44 = vmul.f32 %v4950_v37, %v4898_v7  ;;  %v1184_v42 = vmul.f32 %v4954_v38, %v4900_v8 }
 0x123   : > { %v903_v52 = vadd.f32 %v4832_v39, %v902_v46  ;;  %v1159_v30 = vadd.f32 %v1151_v13, %v1127_v17  ;;  %v1160_v31 = vadd.f32 %v1152_v14, %v1128_v19  ;;  %v1076_v32 = vadd.f32 %v1068_v15, %v1041_v25 }
 0x124   : > { %v1273_v59 = vadd.f32 %v1265_v57, %v1241_v50  ;;  %v1274_v60 = vadd.f32 %v1266_v58, %v1242_v56  ;;  %v1075_v43 = vadd.f32 %v1067_v16, %v1040_v24  ;;  %v5001_v57 = vpop.f32.mrf.mxu2  ;;  %v1100_v58 = vmul.f32 %v4904_v11, %v4891_v2 }
 0x125   : > { %v1049_v41 = vrot.slane %v903_v52, 7  ;;  %v1084_v50 = vrot.slane %v903_v52, 1  ;;  %v5032_v16 = vadd.f32 %v4832_v39, %v4926_v22  ;;  %v1043_v22 = vmul.f32 %v4852_v48, %v4915_v18 }
 0x126   : > { %v1289_v3 = vadd.f32 %v1281_v62, %v1273_v59  ;;  %v1290_v9 = vadd.f32 %v1282_v63, %v1274_v60  ;;  %v1101_v59 = vmul.f32 %v4908_v12, %v4896_v6  ;;  %v1191_v60 = vadd.f32 %v1183_v44, %v1159_v30 }
 0x127   : > { %v1192_v62 = vadd.f32 %v1184_v42, %v1160_v31  ;;  %v1211_v12 = vmul.f32 %v4924_v21, %v903_v52  ;;  %v1108_v17 = vadd.f32 %v1100_v58, %v1075_v43  ;;  %v5044_v43 = vadd.f32 %v4832_v39, %v934_v1 }
 0x128   : > { %v1300_v20 = vadd.f32 %v4971_v0, %v1289_v3  ;;  %v1301_v23 = vadd.f32 %v4971_v0, %v1290_v9  ;;  %v1109_v19 = vadd.f32 %v1101_v59, %v1076_v32  ;;  %v1069_v44 = vmul.f32 %v4946_v36, %v4847_v47 }
 0x129   : > { %v1283_v31 = vadd.f32 %v1191_v60, %v1108_v17  ;;  %v5055_v18 = vmul.f32 %v4852_v48, %v5032_v16  ;;  %v5059_v1 = vmul.f32 %v4871_v55, %v5032_v16  ;;  %v1070_v36 = vmul.f32 %v4942_v35, %v4854_v49 }
 0x12a   : > { %v904_v26 = vpop.f32.mrf.mxu0  ;;  %v2176_v53 = vmax.f32 %v1300_v20, 0.0  ;;  %v2177_v29 = vmax.f32 %v1301_v23, 0.0  ;;  %v1129_v58 = vmul.f32 %v4871_v55, %v903_v52 }
 0x12b   : > { %v4993_v40 = vadd.f32 %v4832_v39, %v904_v26  ;;  %7301 = vst [vmem:[#allocation32_spill] sm:$0xff] %v5055_v18 }
 0x12c   : > { %v2208_v4 = vpack.c.bf16 %v2177_v29, %v2176_v53  ;;  %v1042_v53 = vmul.f32 %v4852_v48, %v4894_v5  ;;  %v939_v42 = vpop.f32.mrf.mxu2 }
 0x12d   : > { %v1053_v46 = vrot.slane %v4993_v40, 7  ;;  %v1088_v56 = vrot.slane %v4993_v40, 1  ;;  %v1212_v13 = vmul.f32 %v4924_v21, %v4993_v40  ;;  %v1130_v59 = vmul.f32 %v4871_v55, %v4993_v40 }
 0x12e   : > { %2300 = vmatmul.bf16.vlgmr.msra.gmra.mxu1 %v2208_v4  ;;  %v1284_v4 = vadd.f32 %v1192_v62, %v1109_v19 }
 0x12f   : > { %v5009_v63 = vsel %vm1056_vm0, %v1049_v41, %v1053_v46  ;;  %v5013_v3 = vsel %vm1056_vm0, %v1053_v46, %v1049_v41  ;;  %v5017_v9 = vsel %vm1089_vm1, %v1084_v50, %v1088_v56  ;;  %v5021_v11 = vsel %vm1089_vm1, %v1088_v56, %v1084_v50 }
 0x130   : > { %v1235_v14 = vmul.f32 %v5013_v3, %v4932_v27  ;;  %v1236_v15 = vmul.f32 %v5009_v63, %v4934_v28  ;;  %v1267_v25 = vmul.f32 %v5017_v9, %v4936_v33  ;;  %v1268_v26 = vmul.f32 %v5021_v11, %v4938_v34 }
 0x131   : > { %v1153_v5 = vmul.f32 %v5013_v3, %v4866_v54  ;;  %v1154_v46 = vmul.f32 %v5009_v63, %v4856_v51  ;;  %v5134_v56 = vadd.f32 %v4832_v39, %v939_v42 }
 0x132   : > { %v907_v20 = vpop.f32.mrf.mxu0  ;;  %v1243_v23 = vadd.f32 %v1235_v14, %v1211_v12  ;;  %v1244_v24 = vadd.f32 %v1236_v15, %v1212_v13  ;;  %v5069_v12 = vmul.f32 %v4852_v48, %v903_v52  ;;  %v1077_v15 = vadd.f32 %v1069_v44, %v1042_v53 }
 0x133   : > { %v908_v13 = vadd.f32 %v4832_v39, %v907_v20  ;;  %v1078_v52 = vadd.f32 %v1070_v36, %v1043_v22  ;;  %v1102_v20 = vmul.f32 %v4950_v37, %v4891_v2  ;;  %v1185_v53 = vmul.f32 %v5017_v9, %v4898_v7 }
 0x134   : > { %v1275_v29 = vadd.f32 %v1267_v25, %v1243_v23  ;;  %v1276_v30 = vadd.f32 %v1268_v26, %v1244_v24  ;;  %v1161_v23 = vadd.f32 %v1153_v5, %v1129_v58  ;;  %v1162_v24 = vadd.f32 %v1154_v46, %v1130_v59  ;;  %v942_v5 = vpop.f32.mrf.mxu2 }
 0x135   : > { %v1168_v44 = vrot.slane %v908_v13, 1  ;;  %v5091_v22 = vadd.f32 %v4832_v39, %v5001_v57  ;;  %v1103_v37 = vmul.f32 %v4954_v38, %v4896_v6  ;;  %v1213_v38 = vmul.f32 %v4924_v21, %v908_v13 }
 0x136   : > { %v1291_v41 = vadd.f32 %v1283_v31, %v1275_v29  ;;  %v1292_v50 = vadd.f32 %v1284_v4, %v1276_v30  ;;  %v5079_v29 = vmul.f32 %v4852_v48, %v5044_v43  ;;  %v1186_v31 = vmul.f32 %v5021_v11, %v4900_v8 }
 0x137   : > { %v1136_v4 = vrot.slane %v908_v13, 7  ;;  %v1193_v46 = vadd.f32 %v1185_v53, %v1161_v23  ;;  %v5122_v23 = vmul.f32 %v4871_v55, %v5044_v43 }
 0x138   : > { %v1302_v60 = vadd.f32 %v4971_v0, %v1291_v41  ;;  %v1303_v62 = vadd.f32 %v4971_v0, %v1292_v50  ;;  %7302 = vst [vmem:[#allocation33_spill] sm:$0xff] %v5079_v29  ;;  %v1194_v36 = vadd.f32 %v1186_v31, %v1162_v24  ;;  %v1110_v24 = vadd.f32 %v1102_v20, %v1077_v15 }
 0x139   : > { %v1071_v15 = vmul.f32 %v5013_v3, %v4847_v47 }
 0x13a   : > { %v909_v17 = vpop.f32.mrf.mxu0  ;;  %v2178_v19 = vmax.f32 %v1302_v60, 0.0  ;;  %v2179_v35 = vmax.f32 %v1303_v62, 0.0 }
 0x13b   : > { %v5074_v25 = vadd.f32 %v4832_v39, %v909_v17 }
 0x13c   : > { %v2209_v30 = vpack.c.bf16 %v2179_v35, %v2178_v19  ;;  %v1045_v35 = vmul.f32 %v4852_v48, %v4993_v40  ;;  %v1072_v40 = vmul.f32 %v5009_v63, %v4854_v49  ;;  %v944_v42 = vpop.f32.mrf.mxu2 }
 0x13d   : > { %v1140_v41 = vrot.slane %v5074_v25, 7  ;;  %v1172_v50 = vrot.slane %v5074_v25, 1  ;;  %v1214_v62 = vmul.f32 %v4924_v21, %v5074_v25  ;;  %v1132_v63 = vmul.f32 %v4871_v55, %v5074_v25 }
 0x13e   : > { %2305 = vmatmul.bf16.gmra.mxu1 %v2209_v30  ;;  %v1111_v30 = vadd.f32 %v1103_v37, %v1078_v52  ;;  %v1285_v37 = vadd.f32 %v1193_v46, %v1110_v24  ;;  %v5153_v24 = vmul.f32 %v4852_v48, %v5134_v56 }
 0x13f   : > { %v5097_v58 = vsel %vm1056_vm0, %v1136_v4, %v1140_v41  ;;  %v5101_v59 = vsel %vm1056_vm0, %v1140_v41, %v1136_v4  ;;  %v5105_v60 = vsel %vm1089_vm1, %v1168_v44, %v1172_v50  ;;  %v5109_v57 = vsel %vm1089_vm1, %v1172_v50, %v1168_v44 }
 0x140   : > { %v1237_v17 = vmul.f32 %v5101_v59, %v4932_v27  ;;  %v1238_v19 = vmul.f32 %v5097_v58, %v4934_v28  ;;  %v1269_v44 = vmul.f32 %v5105_v60, %v4936_v33  ;;  %v1270_v41 = vmul.f32 %v5109_v57, %v4938_v34  ;;  %7305 = vst [vmem:[#allocation36_spill] sm:$0xff] %v5153_v24 }
 0x141   : > { %v5130_v50 = vmul.f32 %v4852_v48, %v5091_v22  ;;  %v1155_v3 = vmul.f32 %v5101_v59, %v4866_v54  ;;  %v1156_v46 = vmul.f32 %v5097_v58, %v4856_v51 }
 0x142   : > { %v912_v53 = vpop.f32.mrf.mxu0  ;;  %v1245_v31 = vadd.f32 %v1237_v17, %v1213_v38  ;;  %v1246_v4 = vadd.f32 %v1238_v19, %v1214_v62  ;;  %v1286_v38 = vadd.f32 %v1194_v36, %v1111_v30  ;;  %v1131_v62 = vmul.f32 %v4871_v55, %v908_v13 }
 0x143   : > { %7303 = vst [vmem:[#allocation34_spill] sm:$0xff] %v5130_v50  ;;  %v5142_v19 = vmul.f32 %v4871_v55, %v5091_v22  ;;  %v1325_v36 = vmul.f32 %v4852_v48, %v908_v13  ;;  %v5165_v13 = vmul.f32 %v4871_v55, %v5134_v56  ;;  %v1164_v30 = vadd.f32 %v1156_v46, %v1132_v63 }
 0x144   : > { %v1277_v52 = vadd.f32 %v1269_v44, %v1245_v31  ;;  %v1278_v20 = vadd.f32 %v1270_v41, %v1246_v4  ;;  %v1079_v31 = vadd.f32 %v1071_v15, %v5069_v12  ;;  %v1163_v17 = vadd.f32 %v1155_v3, %v1131_v62  ;;  %v947_v63 = vpop.f32.mrf.mxu2 }
 0x145   : > { %7304 = vst [vmem:[#allocation35_spill] sm:$0xff] %v5142_v19 }
 0x146   : > { %v1293_v26 = vadd.f32 %v1285_v37, %v1277_v52  ;;  %v1294_v32 = vadd.f32 %v1286_v38, %v1278_v20  ;;  %v913_v52 = vadd.f32 %v4832_v39, %v912_v53  ;;  %7306 = vst [vmem:[#allocation37_spill] sm:$0xff] %v5165_v13  ;;  %v1080_v20 = vadd.f32 %v1072_v40, %v1045_v35 }
 0x147   : > { %v1104_v37 = vmul.f32 %v5017_v9, %v4891_v2  ;;  %v1105_v53 = vmul.f32 %v5021_v11, %v4896_v6  ;;  %v5175_v35 = vadd.f32 %v4832_v39, %v942_v5  ;;  %v1187_v9 = vmul.f32 %v5105_v60, %v4898_v7 }
 0x148   : > { %v1304_v4 = vadd.f32 %v4971_v0, %v1293_v26  ;;  %v1305_v44 = vadd.f32 %v4971_v0, %v1294_v32  ;;  %v1326_v32 = vmul.f32 %v4852_v48, %v5074_v25  ;;  %v1188_v40 = vmul.f32 %v5109_v57, %v4900_v8 }
 0x149   : > { %v1112_v41 = vadd.f32 %v1104_v37, %v1079_v31  ;;  %7307 = vst [vmem:[#allocation38_spill] sm:$0xff] %v5175_v35  ;;  %v1220_v62 = vrot.slane %v913_v52, 7  ;;  %v1252_v3 = vrot.slane %v913_v52, 1  ;;  %v5183_v11 = vmul.f32 %v4852_v48, %v5175_v35 }
 0x14a   : > { %v914_v12 = vpop.f32.mrf.mxu0  ;;  %v2180_v15 = vmax.f32 %v1304_v4, 0.0  ;;  %v2181_v38 = vmax.f32 %v1305_v44, 0.0  ;;  %v1113_v31 = vadd.f32 %v1105_v53, %v1080_v20  ;;  %v1195_v4 = vadd.f32 %v1187_v9, %v1163_v17 }
 0x14b   : > { %v915_v26 = vadd.f32 %v4832_v39, %v914_v12  ;;  %7308 = vst [vmem:[#allocation39_spill] sm:$0xff] %v5183_v11  ;;  %v1196_v5 = vadd.f32 %v1188_v40, %v1164_v30  ;;  %v1215_v20 = vmul.f32 %v4924_v21, %v913_v52  ;;  %v5209_v53 = vadd.f32 %v4832_v39, %v944_v42 }
 0x14c   : > { %v2210_v14 = vpack.c.bf16 %v2181_v38, %v2180_v15  ;;  %v1349_v9 = vmul.f32 %v5101_v59, %v4847_v47  ;;  %v1350_v40 = vmul.f32 %v5097_v58, %v4854_v49  ;;  %v5220_v38 = vmul.f32 %v4852_v48, %v913_v52 }
 0x14d   : > { %v1224_v46 = vrot.slane %v915_v26, 7  ;;  %v1256_v25 = vrot.slane %v915_v26, 1  ;;  %v1216_v17 = vmul.f32 %v4924_v21, %v915_v26  ;;  %7309 = vst [vmem:[#allocation40_spill] sm:$0xff] %v5209_v53  ;;  %v1406_v42 = vmul.f32 %v4871_v55, %v913_v52 }
 0x14e   : > { %2310 = vmatmul.bf16.gmra.mxu1 %v2210_v14  ;;  %v5226_v59 = vmul.f32 %v4871_v55, %v5175_v35  ;;  %v1357_v24 = vadd.f32 %v1349_v9, %v1325_v36  ;;  %v1358_v50 = vadd.f32 %v1350_v40, %v1326_v32  ;;  %v1382_v36 = vmul.f32 %v5109_v57, %v4896_v6  ;;  %v949_v32 = vpop.f32.mrf.mxu2 }
 0x14f   : > { %v5187_v44 = vsel %vm1056_vm0, %v1220_v62, %v1224_v46  ;;  %v5191_v37 = vsel %vm1056_vm0, %v1224_v46, %v1220_v62  ;;  %v5195_v12 = vsel %vm1089_vm1, %v1252_v3, %v1256_v25  ;;  %v5199_v14 = vsel %vm1089_vm1, %v1256_v25, %v1252_v3 }
 0x150   : > { %v1239_v30 = vmul.f32 %v5191_v37, %v4932_v27  ;;  %v1240_v15 = vmul.f32 %v5187_v44, %v4934_v28  ;;  %v1271_v25 = vmul.f32 %v5195_v12, %v4936_v33  ;;  %v1272_v61 = vmul.f32 %v5199_v14, %v4938_v34  ;;  %7310 = vst [vmem:[#allocation41_spill] sm:$0xff] %v5226_v59 }
 0x151   : > { %v1430_v45 = vmul.f32 %v5191_v37, %v4866_v54  ;;  %v1431_v59 = vmul.f32 %v5187_v44, %v4856_v51  ;;  %v5250_v40 = vmul.f32 %v4871_v55, %v5209_v53 }
 0x152   : > { %v917_v62 = vpop.f32.mrf.mxu0  ;;  %v1247_v3 = vadd.f32 %v1239_v30, %v1215_v20  ;;  %v1248_v46 = vadd.f32 %v1240_v15, %v1216_v17  ;;  %v1287_v17 = vadd.f32 %v1195_v4, %v1112_v41  ;;  %v1288_v30 = vadd.f32 %v1196_v5, %v1113_v31 }
 0x153   : > { %v5230_v15 = vmul.f32 %v4852_v48, %v5209_v53  ;;  %v5239_v41 = vadd.f32 %v4832_v39, %v947_v63  ;;  %v1381_v31 = vmul.f32 %v5105_v60, %v4891_v2  ;;  %v1407_v4 = vmul.f32 %v4871_v55, %v915_v26  ;;  %7313 = vst [vmem:[#allocation44_spill] sm:$0xff] %v5250_v40 }
 0x154   : > { %v1279_v58 = vadd.f32 %v1271_v25, %v1247_v3  ;;  %v1280_v20 = vadd.f32 %v1272_v61, %v1248_v46  ;;  %v1328_v63 = vmul.f32 %v4852_v48, %v915_v26  ;;  %v918_v3 = vadd.f32 %v4832_v39, %v917_v62 }
 0x155   : > { %7311 = vst [vmem:[#allocation42_spill] sm:$0xff] %v5230_v15  ;;  %v1389_v46 = vadd.f32 %v1381_v31, %v1357_v24  ;;  %v1390_v60 = vadd.f32 %v1382_v36, %v1358_v50  ;;  %v5263_v24 = vmul.f32 %v4852_v48, %v5239_v41  ;;  %v1462_v50 = vmul.f32 %v5195_v12, %v4898_v7 }
 0x156   : > { %v1295_v13 = vadd.f32 %v1287_v17, %v1279_v58  ;;  %v1296_v52 = vadd.f32 %v1288_v30, %v1280_v20  ;;  %7312 = vst [vmem:[#allocation43_spill] sm:$0xff] %v5239_v41  ;;  %v1438_v20 = vadd.f32 %v1430_v45, %v1406_v42  ;;  %v1439_v17 = vadd.f32 %v1431_v59, %v1407_v4  ;;  %v952_v61 = vpop.f32.mrf.mxu2 }
 0x157   : > { %7315 = vst [vmem:[#allocation46_spill] sm:$0xff] %v5263_v24  ;;  %v1463_v45 = vmul.f32 %v5199_v14, %v4900_v8  ;;  %v1335_v62 = vrot.slane %v918_v3, 7  ;;  %v1367_v42 = vrot.slane %v918_v3, 1 }
 0x158   : > { %v1306_v5 = vadd.f32 %v4971_v0, %v1295_v13  ;;  %v1307_v9 = vadd.f32 %v4971_v0, %v1296_v52  ;;  %v5257_v13 = vmul.f32 %v4871_v55, %v5239_v41  ;;  %v1470_v36 = vadd.f32 %v1462_v50, %v1438_v20 }
 0x159   : > { %v1471_v4 = vadd.f32 %v1463_v45, %v1439_v17  ;;  %v5291_v50 = vadd.f32 %v4832_v39, %v949_v32  ;;  %v1329_v45 = vmul.f32 %v4852_v48, %v918_v3 }
 0x15a   : > { %v919_v25 = vpop.f32.mrf.mxu0  ;;  %v2182_v58 = vmax.f32 %v1306_v5, 0.0  ;;  %v2183_v57 = vmax.f32 %v1307_v9, 0.0  ;;  %7314 = vst [vmem:[#allocation45_spill] sm:$0xff] %v5257_v13  ;;  %v1487_v5 = vmul.f32 %v4924_v21, %v918_v3  ;;  %v1351_v9 = vmul.f32 %v5191_v37, %v4847_v47 }
 0x15b   : > { %v920_v30 = vadd.f32 %v4832_v39, %v919_v25  ;;  %7316 = vst [vmem:[#allocation47_spill] sm:$0xff] %v5291_v50  ;;  %v1559_v13 = vadd.f32 %v1470_v36, %v1389_v46  ;;  %v1560_v15 = vadd.f32 %v1471_v4, %v1390_v60  ;;  %v1384_v46 = vmul.f32 %v5199_v14, %v4896_v6 }
 0x15c   : > { %v2211_v26 = vpack.c.bf16 %v2183_v57, %v2182_v58  ;;  %v1359_v40 = vadd.f32 %v1351_v9, %v5220_v38  ;;  %v7318_v60 = vrot.slane %v5044_v43, 7  ;;  %v7319_v36 = vrot.slane %v5032_v16, 7 }
 0x15d   : > { %v1339_v59 = vrot.slane %v920_v30, 7  ;;  %v1371_v31 = vrot.slane %v920_v30, 1  ;;  %v1488_v17 = vmul.f32 %v4924_v21, %v920_v30 }
 0x15e   : > { %2315 = vmatmul.bf16.gmra.mxu1 %v2211_v26  ;;  %v5320_v38 = vsel %vm1056_vm0, %v7319_v36, %v7318_v60  ;;  %v7321_v14 = vmov %v7318_v60 }
 0x15f   : > { %v5274_v25 = vsel %vm1056_vm0, %v1335_v62, %v1339_v59  ;;  %v1347_v58 = vsel %vm1056_vm0, %v1339_v59, %v1335_v62  ;;  %v5280_v57 = vsel %vm1089_vm1, %v1367_v42, %v1371_v31  ;;  %v5284_v20 = vsel %vm1089_vm1, %v1371_v31, %v1367_v42 }
 0x160   : > { %v1511_v26 = vmul.f32 %v1347_v58, %v4932_v27  ;;  %v1512_v37 = vmul.f32 %v5274_v25, %v4934_v28  ;;  %v1408_v62 = vmul.f32 %v4871_v55, %v918_v3  ;;  %v1543_v59 = vmul.f32 %v5280_v57, %v4936_v33 }
 0x161   : > { %v1352_v42 = vmul.f32 %v5187_v44, %v4854_v49  ;;  %v1544_v24 = vmul.f32 %v5284_v20, %v4938_v34  ;;  %v1432_v32 = vmul.f32 %v1347_v58, %v4866_v54  ;;  %v5304_v3 = vmul.f32 %v4871_v55, %v5291_v50 }
 0x162   : > { %v922_v31 = vpop.f32.mrf.mxu0  ;;  %v1519_v52 = vadd.f32 %v1511_v26, %v1487_v5  ;;  %v1520_v11 = vadd.f32 %v1512_v37, %v1488_v17  ;;  %v1433_v5 = vmul.f32 %v5274_v25, %v4856_v51  ;;  %v1383_v26 = vmul.f32 %v5195_v12, %v4891_v2 }
 0x163   : > { %7317 = vst [vmem:[#allocation48_spill] sm:$0xff] %v5304_v3  ;;  %v1360_v17 = vadd.f32 %v1352_v42, %v1328_v63  ;;  %v1440_v4 = vadd.f32 %v1432_v32, %v1408_v62  ;;  %v923_v63 = vadd.f32 %v4832_v39, %v922_v31  ;;  %v7320_v12 = vmov %v7319_v36 }
 0x164   : > { %v1551_v41 = vadd.f32 %v1543_v59, %v1519_v52  ;;  %v1552_v19 = vadd.f32 %v1544_v24, %v1520_v11  ;;  %v1409_v11 = vmul.f32 %v4871_v55, %v920_v30  ;;  %v1391_v9 = vadd.f32 %v1383_v26, %v1359_v40 }
 0x165   : > { %v5330_v37 = vsel %vm1056_vm0, %v7321_v14, %v7320_v12  ;;  %v7322_v59 = vrot.slane %v5044_v43, 1  ;;  %v7323_v42 = vrot.slane %v5032_v16, 1  ;;  %v1330_v62 = vmul.f32 %v4852_v48, %v920_v30 }
 0x166   : > { %v1567_v52 = vadd.f32 %v1559_v13, %v1551_v41  ;;  %v1568_v24 = vadd.f32 %v1560_v15, %v1552_v19  ;;  %v1441_v40 = vadd.f32 %v1433_v5, %v1409_v11  ;;  %v1464_v13 = vmul.f32 %v5280_v57, %v4898_v7 }
 0x167   : > { %v5338_v41 = vsel %vm1089_vm1, %v7323_v42, %v7322_v59  ;;  %v5346_v31 = vadd.f32 %v4832_v39, %v952_v61  ;;  %v1465_v32 = vmul.f32 %v5284_v20, %v4900_v8  ;;  %v7325_v26 = vmov %v7323_v42 }
 0x168   : > { %v1575_v19 = vadd.f32 %v4971_v0, %v1567_v52  ;;  %v1576_v15 = vadd.f32 %v4971_v0, %v1568_v24  ;;  %v7326_v60 = vmov %v7322_v59  ;;  %v1472_v24 = vadd.f32 %v1464_v13, %v1440_v4  ;;  %v954_v59 = vpop.f32.mrf.mxu2 }
 0x169   : > { %7324 = vst [vmem:[#allocation49_spill] sm:$0xff] %v5346_v31  ;;  %v5356_v36 = vsel %vm1089_vm1, %v7326_v60, %v7325_v26  ;;  %v1353_v30 = vmul.f32 %v1347_v58, %v4847_v47  ;;  %v5360_v61 = vmul.f32 %v4852_v48, %v923_v63  ;;  %v1392_v14 = vadd.f32 %v1384_v46, %v1360_v17 }
 0x16a   : > { %v924_v5 = vpop.f32.mrf.mxu0  ;;  %v2184_v11 = vmax.f32 %v1575_v19, 0.0  ;;  %v2185_v52 = vmax.f32 %v1576_v15, 0.0  ;;  %v7327_v42 = vrot.slane %v5134_v56, 7  ;;  %v7328_v44 = vrot.slane %v5091_v22, 7 }
 0x16b   : > { %v925_v12 = vadd.f32 %v4832_v39, %v924_v5  ;;  %v1336_v19 = vrot.slane %v923_v63, 7  ;;  %v1368_v15 = vrot.slane %v923_v63, 1  ;;  %v1473_v13 = vadd.f32 %v1465_v32, %v1441_v40 }
 0x16c   : > { %v5369_v26 = vsel %vm1056_vm0, %v7328_v44, %v7327_v42  ;;  %v2212_v4 = vpack.c.bf16 %v2185_v52, %v2184_v11  ;;  %v1410_v58 = vmul.f32 %v4871_v55, %v923_v63  ;;  %v1354_v17 = vmul.f32 %v5274_v25, %v4854_v49 }
 0x16d   : > { %7329 = vst [vmem:[#allocation50_spill] sm:$0xff] %v5369_v26  ;;  %v1340_v60 = vrot.slane %v925_v12, 7  ;;  %v1372_v3 = vrot.slane %v925_v12, 1  ;;  %v1489_v46 = vmul.f32 %v4924_v21, %v923_v63  ;;  %v1561_v5 = vadd.f32 %v1472_v24, %v1391_v9 }
 0x16e   : > { %2320 = vmatmul.bf16.gmra.mxu1 %v2212_v4  ;;  %v5376_v31 = vadd.f32 %v4832_v39, %v954_v59  ;;  %v1361_v44 = vadd.f32 %v1353_v30, %v1329_v45  ;;  %v1490_v63 = vmul.f32 %v4924_v21, %v925_v12  ;;  %v1562_v11 = vadd.f32 %v1473_v13, %v1392_v14 }
 0x16f   : > { %v5380_v42 = vsel %vm1056_vm0, %v1336_v19, %v1340_v60  ;;  %v5384_v40 = vsel %vm1056_vm0, %v1340_v60, %v1336_v19  ;;  %v5388_v32 = vsel %vm1089_vm1, %v1368_v15, %v1372_v3  ;;  %v5392_v25 = vsel %vm1089_vm1, %v1372_v3, %v1368_v15 }
 0x170   : > { %7330 = vst [vmem:[#allocation51_spill] sm:$0xff] %v5376_v31  ;;  %v1513_v45 = vmul.f32 %v5384_v40, %v4932_v27  ;;  %v1514_v9 = vmul.f32 %v5380_v42, %v4934_v28  ;;  %v1545_v52 = vmul.f32 %v5388_v32, %v4936_v33  ;;  %v1546_v24 = vmul.f32 %v5392_v25, %v4938_v34 }
 0x171   : > { %v1362_v30 = vadd.f32 %v1354_v17, %v1330_v62  ;;  %v1385_v3 = vmul.f32 %v5280_v57, %v4891_v2  ;;  %v1434_v4 = vmul.f32 %v5384_v40, %v4866_v54  ;;  %v1435_v60 = vmul.f32 %v5380_v42, %v4856_v51 }
 0x172   : > { %v927_v59 = vpop.f32.mrf.mxu0  ;;  %v1521_v19 = vadd.f32 %v1513_v45, %v1489_v46  ;;  %v1522_v15 = vadd.f32 %v1514_v9, %v1490_v63  ;;  %v1411_v14 = vmul.f32 %v4871_v55, %v925_v12  ;;  %v1386_v13 = vmul.f32 %v5284_v20, %v4896_v6 }
 0x173   : > { %v7331_v31 = vrot.slane %v5091_v22, 7  ;;  %v7332_v62 = vrot.slane %v5134_v56, 7  ;;  %v1706_v17 = vmul.f32 %v5330_v37, %v4866_v54  ;;  %v928_v46 = vadd.f32 %v4832_v39, %v927_v59 }
 0x174   : > { %v1553_v63 = vadd.f32 %v1545_v52, %v1521_v19  ;;  %v1554_v45 = vadd.f32 %v1546_v24, %v1522_v15  ;;  %v7334_v9 = vrot.slane %v5134_v56, 1  ;;  %v7335_v50 = vrot.slane %v5091_v22, 1 }
 0x175   : > { %v5418_v57 = vsel %vm1056_vm0, %v7332_v62, %v7331_v31  ;;  %v1393_v29 = vadd.f32 %v1385_v3, %v1361_v44  ;;  %v1442_v18 = vadd.f32 %v1434_v4, %v1410_v58  ;;  %v1443_v35 = vadd.f32 %v1435_v60, %v1411_v14 }
 0x176   : > { %7333 = vst [vmem:[#allocation52_spill] sm:$0xff] %v5418_v57  ;;  %v5429_v20 = vsel %vm1089_vm1, %v7335_v50, %v7334_v9  ;;  %v7337_v31 = vmov %v7335_v50  ;;  %v7338_v62 = vmov %v7334_v9  ;;  %v5440_v52 = vmul.f32 %v4852_v48, %v925_v12 }
 0x177   : > { %7336 = vst [vmem:[#allocation53_spill] sm:$0xff] %v5429_v20  ;;  %v5437_v59 = vsel %vm1089_vm1, %v7338_v62, %v7337_v31  ;;  %v1569_v24 = vadd.f32 %v1561_v5, %v1553_v63  ;;  %v1570_v19 = vadd.f32 %v1562_v11, %v1554_v45  ;;  %v1394_v15 = vadd.f32 %v1386_v13, %v1362_v30  ;;  %v5454_v30 = vpop.f32.mrf.mxu2 }
 0x178   : > { %7339 = vst [vmem:[#allocation54_spill] sm:$0xff] %v5437_v59  ;;  %v1466_v50 = vmul.f32 %v5388_v32, %v4898_v7  ;;  %v1467_v58 = vmul.f32 %v5392_v25, %v4900_v8  ;;  %v1707_v44 = vmul.f32 %v5320_v38, %v4856_v51  ;;  %v1714_v3 = vadd.f32 %v1706_v17, %v5059_v1 }
 0x179   : > { %v5450_v4 = vmul.f32 %v4871_v55, %v928_v46  ;;  %v1417_v60 = vrot.slane %v928_v46, 7  ;;  %v1577_v12 = vadd.f32 %v4971_v0, %v1569_v24  ;;  %v1578_v5 = vadd.f32 %v4971_v0, %v1570_v19  ;;  %7340 = vst [vmem:[#allocation55_spill] sm:$0xff] %v5454_v30 }
 0x17a   : > { %v1449_v11 = vrot.slane %v928_v46, 1  ;;  %v1474_v14 = vadd.f32 %v1466_v50, %v1442_v18  ;;  %v1475_v13 = vadd.f32 %v1467_v58, %v1443_v35  ;;  %v1738_v63 = vmul.f32 %v5338_v41, %v4898_v7  ;;  %v929_v45 = vpop.f32.mrf.mxu0 }
 0x17b   : > { %v2186_v9 = vmax.f32 %v1577_v12, 0.0  ;;  %v2187_v31 = vmax.f32 %v1578_v5, 0.0  ;;  %v1763_v1 = vmul.f32 %v4924_v21, %v5091_v22  ;;  %v1787_v17 = vmul.f32 %v5418_v57, %v4932_v27 }
 0x17c   : > { %v1601_v62 = vmul.f32 %v4852_v48, %v928_v46  ;;  %v930_v24 = vadd.f32 %v4832_v39, %v929_v45  ;;  %v1491_v19 = vmul.f32 %v4924_v21, %v928_v46  ;;  %v1715_v18 = vadd.f32 %v1707_v44, %v5122_v23 }
 0x17d   : > { %v2213_v35 = vpack.c.bf16 %v2187_v31, %v2186_v9  ;;  %v1739_v50 = vmul.f32 %v5356_v36, %v4900_v8  ;;  %v1764_v58 = vmul.f32 %v4924_v21, %v5134_v56  ;;  %v1788_v22 = vmul.f32 %v5369_v26, %v4934_v28 }
 0x17e   : > { %v1421_v12 = vrot.slane %v930_v24, 7  ;;  %v1453_v5 = vrot.slane %v930_v24, 1  ;;  %v1563_v30 = vadd.f32 %v1474_v14, %v1393_v29  ;;  %v1564_v57 = vadd.f32 %v1475_v13, %v1394_v15 }
 0x17f   : > { %2325 = vmatmul.bf16.gmra.mxu1 %v2213_v35  ;;  %v1746_v39 = vadd.f32 %v1738_v63, %v1714_v3  ;;  %v1795_v45 = vadd.f32 %v1787_v17, %v1763_v1  ;;  %v1819_v23 = vmul.f32 %v5429_v20, %v4936_v33  ;;  %v1820_v46 = vmul.f32 %v5437_v59, %v4938_v34 }
 0x180   : > { %v1425_v44 = vsel %vm1056_vm0, %v1417_v60, %v1421_v12  ;;  %v1429_v56 = vsel %vm1056_vm0, %v1421_v12, %v1417_v60  ;;  %v1457_v9 = vsel %vm1089_vm1, %v1449_v11, %v1453_v5  ;;  %v1461_v29 = vsel %vm1089_vm1, %v1453_v5, %v1449_v11 }
 0x181   : > { %v1492_v15 = vmul.f32 %v4924_v21, %v930_v24  ;;  %v1515_v3 = vmul.f32 %v1429_v56, %v4932_v27  ;;  %v1516_v14 = vmul.f32 %v1425_v44, %v4934_v28  ;;  %v1796_v13 = vadd.f32 %v1788_v22, %v1764_v58 }
 0x182   : > { %v1602_v63 = vmul.f32 %v4852_v48, %v930_v24  ;;  %v1625_v31 = vmul.f32 %v1429_v56, %v4847_v47  ;;  %v1626_v1 = vmul.f32 %v1425_v44, %v4854_v49  ;;  %v1355_v60 = vmul.f32 %v5384_v40, %v4847_v47  ;;  %v5496_v48 = vpop.f32.mrf.mxu2 }
 0x183   : > { %v1523_v17 = vadd.f32 %v1515_v3, %v1491_v19  ;;  %v1524_v35 = vadd.f32 %v1516_v14, %v1492_v15  ;;  %v1547_v11 = vmul.f32 %v1457_v9, %v4936_v33  ;;  %v1548_v12 = vmul.f32 %v1461_v29, %v4938_v34  ;;  %7341 = vst [vmem:[#allocation56_spill] sm:$0xff] %v5496_v48 }
 0x184   : > { %v1633_v5 = vadd.f32 %v1625_v31, %v1601_v62  ;;  %v1634_v59 = vadd.f32 %v1626_v1, %v1602_v63  ;;  %v1657_v20 = vmul.f32 %v1457_v9, %v4891_v2  ;;  %v1658_v58 = vmul.f32 %v1461_v29, %v4896_v6 }
 0x185   : > { %v1555_v22 = vadd.f32 %v1547_v11, %v1523_v17  ;;  %v1556_v26 = vadd.f32 %v1548_v12, %v1524_v35  ;;  %v1747_v10 = vadd.f32 %v1739_v50, %v1715_v18  ;;  %v1356_v47 = vmul.f32 %v5380_v42, %v4854_v49  ;;  %v7342_v35 = vld [vmem:[#allocation40_spill] sm:$0xff]  ;;  %v7344_v12 = vld [vmem:[#allocation38_spill] sm:$0xff] }
 0x186   : > { %v1413_v40 = vmul.f32 %v4871_v55, %v930_v24  ;;  %v1665_v19 = vadd.f32 %v1657_v20, %v1633_v5  ;;  %v1666_v15 = vadd.f32 %v1658_v58, %v1634_v59  ;;  %v1363_v3 = vadd.f32 %v1355_v60, %v5360_v61 }
 0x187   : > { %v1571_v62 = vadd.f32 %v1563_v30, %v1555_v22  ;;  %v1572_v14 = vadd.f32 %v1564_v57, %v1556_v26  ;;  %v1827_v63 = vadd.f32 %v1819_v23, %v1795_v45  ;;  %v1828_v31 = vadd.f32 %v1820_v46, %v1796_v13 }
 0x188   : > { %v1835_v1 = vadd.f32 %v1746_v39, %v1665_v19  ;;  %v1836_v53 = vadd.f32 %v1747_v10, %v1666_v15  ;;  %v1364_v48 = vadd.f32 %v1356_v47, %v5440_v52  ;;  %v1387_v18 = vmul.f32 %v5388_v32, %v4891_v2 }
 0x189   : > { %v1579_v50 = vadd.f32 %v4971_v0, %v1571_v62  ;;  %v1580_v49 = vadd.f32 %v4971_v0, %v1572_v14  ;;  %v1388_v55 = vmul.f32 %v5392_v25, %v4896_v6  ;;  %v1436_v61 = vmul.f32 %v1429_v56, %v4866_v54 }
 0x18a   : > { %v1843_v42 = vadd.f32 %v1835_v1, %v1827_v63  ;;  %v1844_v26 = vadd.f32 %v1836_v53, %v1828_v31  ;;  %v1395_v57 = vadd.f32 %v1387_v18, %v1363_v3  ;;  %v1437_v20 = vmul.f32 %v1425_v44, %v4856_v51  ;;  %v5520_v44 = vpop.f32.mrf.mxu2  ;;  %v5546_v3 = vld [vmem:[#allocation13] sm:$0xff]  ;;  %v5550_v63 = vld [vmem:[#allocation13 + $0x8] sm:$0xff] }
 0x18b   : > { %v2188_v10 = vmax.f32 %v1579_v50, 0.0  ;;  %v2189_v59 = vmax.f32 %v1580_v49, 0.0  ;;  %v1396_v52 = vadd.f32 %v1388_v55, %v1364_v48  ;;  %v1444_v30 = vadd.f32 %v1436_v61, %v5450_v4  ;;  %7349 = vst [vmem:[#allocation40_spill] sm:$0xff] %v5546_v3 }
 0x18c   : > { %v1851_v32 = vadd.f32 %v4971_v0, %v1843_v42  ;;  %v1852_v24 = vadd.f32 %v4971_v0, %v1844_v26  ;;  %v1445_v39 = vadd.f32 %v1437_v20, %v1413_v40  ;;  %v1468_v45 = vmul.f32 %v1457_v9, %v4898_v7  ;;  %7350 = vst [vmem:[#allocation38_spill] sm:$0xff] %v5550_v63  ;;  %v7355_v42 = vld [vmem:[#allocation32_spill] sm:$0xff] }
 0x18d   : > { %v2214_v25 = vpack.c.bf16 %v2189_v59, %v2188_v10  ;;  %v1469_v54 = vmul.f32 %v1461_v29, %v4900_v8  ;;  %v1493_v53 = vmul.f32 %v4924_v21, %v5032_v16  ;;  %v1494_v51 = vmul.f32 %v4924_v21, %v5044_v43  ;;  %v7356_v10 = vld [vmem:[#allocation33_spill] sm:$0xff] }
 0x18e   : > { %v2192_v23 = vmax.f32 %v1851_v32, 0.0  ;;  %v2193_v46 = vmax.f32 %v1852_v24, 0.0  ;;  %v1476_v4 = vadd.f32 %v1468_v45, %v1444_v30  ;;  %v1517_v56 = vmul.f32 %v5330_v37, %v4932_v27  ;;  %v7358_v30 = vld [vmem:[#allocation52_spill] sm:$0xff] }
 0x18f   : > { %2330 = vmatmul.bf16.gmra.mxu1 %v2214_v25  ;;  %v1477_v13 = vadd.f32 %v1469_v54, %v1445_v39  ;;  %v1518_v9 = vmul.f32 %v5320_v38, %v4934_v28  ;;  %v1549_v29 = vmul.f32 %v5338_v41, %v4936_v33  ;;  %v1550_v16 = vmul.f32 %v5356_v36, %v4938_v34  ;;  %v5580_v24 = vld [vmem:[#allocation13 + $0x18] sm:$0xff]  ;;  %v7360_v39 = vld [vmem:[#allocation50_spill] sm:$0xff] }
 0x190   : > { %v2216_v43 = vpack.c.bf16 %v2193_v46, %v2192_v23  ;;  %v1525_v60 = vadd.f32 %v1517_v56, %v1493_v53  ;;  %v1565_v17 = vadd.f32 %v1476_v4, %v1395_v57  ;;  %v7343_v11 = vrot.slane %v7342_v35, 7  ;;  %7359 = vst [vmem:[#allocation32_spill] sm:$0xff] %v5580_v24  ;;  %v7363_v23 = vld [vmem:[#allocation35_spill] sm:$0xff]  ;;  %v7364_v4 = vld [vmem:[#allocation37_spill] sm:$0xff] }
 0x191   : > { %v7345_v5 = vrot.slane %v7344_v12, 7  ;;  %v1526_v22 = vadd.f32 %v1518_v9, %v1494_v51  ;;  %v1566_v47 = vadd.f32 %v1477_v13, %v1396_v52  ;;  %v1627_v62 = vmul.f32 %v5546_v3, %v5330_v37  ;;  %v5576_v52 = vld [vmem:[#allocation13 + $0x10] sm:$0xff] }
 0x192   : > { %v7348_v19 = vmov %v7343_v11  ;;  %2340 = vmatmul.bf16.vlgmr.msra.gmra.mxu3 %v2216_v43  ;;  %v1557_v14 = vadd.f32 %v1549_v29, %v1525_v60  ;;  %v1628_v31 = vmul.f32 %v5550_v63, %v5320_v38  ;;  %v7351_v1 = vrot.slane %v7342_v35, 1  ;;  %7357 = vst [vmem:[#allocation29_spill] sm:$0xff] %v5576_v52 }
 0x193   : > { %v5536_v48 = vsel %vm1056_vm0, %v7345_v5, %v7343_v11  ;;  %v7347_v40 = vmov %v7345_v5  ;;  %v7352_v18 = vrot.slane %v7344_v12, 1  ;;  %v1558_v61 = vadd.f32 %v1550_v16, %v1526_v22 }
 0x194   : > { %v5544_v15 = vsel %vm1056_vm0, %v7348_v19, %v7347_v40  ;;  %v7354_v55 = vmov %v7351_v1  ;;  %v1635_v26 = vadd.f32 %v1627_v62, %v7355_v42  ;;  %v1659_v38 = vmul.f32 %v5338_v41, %v4891_v2  ;;  %v7361_v2 = vld [vmem:[#allocation53_spill] sm:$0xff]  ;;  %v5610_v19 = vld [vmem:[%s7149_s6] ss:$0 sm:$0xff] }
 0x195   : > { %v5560_v50 = vsel %vm1089_vm1, %v7352_v18, %v7351_v1  ;;  %v7353_v49 = vmov %v7352_v18  ;;  %v1660_v57 = vmul.f32 %v5356_v36, %v4896_v6  ;;  %v1573_v20 = vadd.f32 %v1565_v17, %v1557_v14  ;;  %v7362_v6 = vld [vmem:[#allocation54_spill] sm:$0xff]  ;;  %v5600_v17 = vpop.f32.mrf.mxu2  ;;  %7366 = vst [vmem:[#allocation33_spill] sm:$0xff] %v5610_v19  ;;  %v7367_v62 = vld [vmem:[#allocation49_spill] sm:$0xff]  ;;  %v5627_v18 = vld [vmem:[%s7149_s6 + $0x1] ss:$0 sm:$0xff] }
 0x196   : > { %v5568_v37 = vsel %vm1089_vm1, %v7354_v55, %v7353_v49  ;;  %v1636_v59 = vadd.f32 %v1628_v31, %v7356_v10  ;;  %v1708_v32 = vmul.f32 %v5576_v52, %v7358_v30  ;;  %v1709_v45 = vmul.f32 %v5580_v24, %v7360_v39  ;;  %7369 = vst [vmem:[#allocation50_spill] sm:$0xff] %v5627_v18  ;;  %v5639_v10 = vld [vmem:[#allocation12] ss:$0 sm:$0xff]  ;;  %v7407_v31 = vld [vmem:[#allocation30_spill] sm:$0xff] }
 0x197   : > { %v1574_v25 = vadd.f32 %v1566_v47, %v1558_v61  ;;  %v1667_v54 = vadd.f32 %v1659_v38, %v1635_v26  ;;  %v1740_v41 = vmul.f32 %v7361_v2, %v4898_v7  ;;  %v1741_v36 = vmul.f32 %v7362_v6, %v4900_v8  ;;  %v7370_v61 = vld [vmem:[#allocation51_spill] sm:$0xff] }
 0x198   : > { %v1581_v53 = vadd.f32 %v4971_v0, %v1573_v20  ;;  %v1668_v51 = vadd.f32 %v1660_v57, %v1636_v59  ;;  %v1716_v46 = vadd.f32 %v1708_v32, %v7363_v23  ;;  %v1717_v56 = vadd.f32 %v1709_v45, %v7364_v4  ;;  %v7372_v59 = vld [vmem:[#allocation55_spill] sm:$0xff]  ;;  %v7376_v4 = vld [vmem:[#allocation36_spill] sm:$0xff] }
 0x199   : > { %v1582_v13 = vadd.f32 %v4971_v0, %v1574_v25  ;;  %v1765_v9 = vmul.f32 %v4924_v21, %v7344_v12  ;;  %v1766_v29 = vmul.f32 %v4924_v21, %v7342_v35  ;;  %v1789_v7 = vmul.f32 %v5544_v15, %v4932_v27  ;;  %v7365_v21 = vld [vmem:[#allocation47_spill] sm:$0xff] }
 0x19a   : > { %v2190_v16 = vmax.f32 %v1581_v53, 0.0  ;;  %v1748_v8 = vadd.f32 %v1740_v41, %v1716_v46  ;;  %v1749_v43 = vadd.f32 %v1741_v36, %v1717_v56  ;;  %v1790_v60 = vmul.f32 %v5536_v48, %v4934_v28  ;;  %v5649_v36 = vld [vmem:[#allocation15] sm:$0xff] }
 0x19b   : > { %v2191_v11 = vmax.f32 %v1582_v13, 0.0  ;;  %v1797_v5 = vadd.f32 %v1789_v7, %v1765_v9  ;;  %v1821_v22 = vmul.f32 %v5560_v50, %v4936_v33  ;;  %v1822_v12 = vmul.f32 %v5568_v37, %v4938_v34  ;;  %7374 = vst [vmem:[#allocation54_spill] sm:$0xff] %v5649_v36  ;;  %v7378_v13 = vld [vmem:[#allocation43_spill] sm:$0xff] }
 0x19c   : > { %v1729_v35 = vrot.slane %v7365_v21, 1  ;;  %v1798_v47 = vadd.f32 %v1790_v60, %v1766_v29  ;;  %v1837_v27 = vadd.f32 %v1748_v8, %v1667_v54  ;;  %v1838_v40 = vadd.f32 %v1749_v43, %v1668_v51  ;;  %v7373_v54 = vld [vmem:[#allocation34_spill] sm:$0xff]  ;;  %v5653_v51 = vld [vmem:[#allocation15 + $0x8] sm:$0xff] }
 0x19d   : > { %v5614_v28 = vmul.f32 %v5610_v19, %v7365_v21  ;;  %v1829_v33 = vadd.f32 %v1821_v22, %v1797_v5  ;;  %v1629_v34 = vmul.f32 %v5546_v3, %v7358_v30  ;;  %v5622_v1 = vmul.f32 %v5610_v19, %v7367_v62  ;;  %7375 = vst [vmem:[#allocation35_spill] sm:$0xff] %v5653_v51 }
 0x19e   : > { %v5631_v49 = vmul.f32 %v5627_v18, %v7367_v62  ;;  %v1830_v55 = vadd.f32 %v1822_v12, %v1798_v47  ;;  %v1778_v42 = vrot.slane %v7370_v61, 7  ;;  %v2215_v38 = vpack.c.bf16 %v2191_v11, %v2190_v16  ;;  %v967_v11 = vpop.f32.mrf.mxu2 }
 0x19f   : > { %7368 = vst [vmem:[#allocation52_spill] sm:$0xff] %v5622_v1  ;;  %v1845_v57 = vadd.f32 %v1837_v27, %v1829_v33  ;;  %v5637_v20 = vmul.f32 %v5610_v19, %v7370_v61  ;;  %v5643_v30 = vadd.f32 %v5639_v10, %v7372_v59  ;;  %v1630_v45 = vmul.f32 %v5550_v63, %v7360_v39  ;;  %v5697_v59 = vld [vmem:[#allocation15 + $0x18] sm:$0xff] }
 0x1a0   : > { %v1846_v32 = vadd.f32 %v1838_v40, %v1830_v55  ;;  %2335 = vmatmul.bf16.gmra.mxu1 %v2215_v38  ;;  %v1637_v41 = vadd.f32 %v1629_v34, %v7373_v54  ;;  %v1661_v53 = vmul.f32 %v5649_v36, %v7361_v2  ;;  %v1662_v23 = vmul.f32 %v5653_v51, %v7362_v6  ;;  %v7384_v40 = vld [vmem:[#allocation41_spill] sm:$0xff]  ;;  %v7385_v34 = vld [vmem:[#allocation44_spill] sm:$0xff] }
 0x1a1   : > { %7371 = vst [vmem:[#allocation53_spill] sm:$0xff] %v5637_v20  ;;  %v1853_v25 = vadd.f32 %v4971_v0, %v1845_v57  ;;  %v1638_v56 = vadd.f32 %v1630_v45, %v7376_v4  ;;  %v7377_v39 = vrot.slane %v7365_v21, 7  ;;  %v7379_v9 = vrot.slane %v7378_v13, 7  ;;  %v5693_v38 = vld [vmem:[#allocation15 + $0x10] sm:$0xff]  ;;  %v5714_v4 = vld [vmem:[#allocation13 + $0x28] sm:$0xff] }
 0x1a2   : > { %v1854_v46 = vadd.f32 %v4971_v0, %v1846_v32  ;;  %v1669_v0 = vadd.f32 %v1661_v53, %v1637_v41  ;;  %v1710_v8 = vmul.f32 %v5576_v52, %v5544_v15  ;;  %v1711_v43 = vmul.f32 %v5580_v24, %v5536_v48  ;;  %7386 = vst [vmem:[#allocation37_spill] sm:$0xff] %v5693_v38  ;;  %v5710_v41 = vld [vmem:[#allocation13 + $0x20] sm:$0xff] }
 0x1a3   : > { %v5665_v29 = vsel %vm1056_vm0, %v7379_v9, %v7377_v39  ;;  %v7380_v7 = vmov %v7379_v9  ;;  %v7381_v2 = vmov %v7377_v39  ;;  %v2194_v6 = vmax.f32 %v1853_v25, 0.0  ;;  %7387 = vst [vmem:[#allocation47_spill] sm:$0xff] %v5697_v59  ;;  %v5718_v39 = vld [vmem:[#allocation15 + $0x20] sm:$0xff]  ;;  %v7392_v9 = vld [vmem:[#allocation56_spill] sm:$0xff] }
 0x1a4   : > { %v5673_v16 = vsel %vm1056_vm0, %v7381_v2, %v7380_v7  ;;  %v2195_v60 = vmax.f32 %v1854_v46, 0.0  ;;  %v1670_v5 = vadd.f32 %v1662_v23, %v1638_v56  ;;  %v7382_v22 = vrot.slane %v7378_v13, 1  ;;  %7389 = vst [vmem:[#allocation51_spill] sm:$0xff] %v5710_v41 }
 0x1a5   : > { %v1718_v33 = vadd.f32 %v1710_v8, %v7384_v40  ;;  %v1719_v55 = vadd.f32 %v1711_v43, %v7385_v34  ;;  %v1742_v57 = vmul.f32 %v5693_v38, %v5560_v50  ;;  %v1743_v32 = vmul.f32 %v5697_v59, %v5568_v37  ;;  %7390 = vst [vmem:[#allocation55_spill] sm:$0xff] %v5714_v4 }
 0x1a6   : > { %v5683_v12 = vsel %vm1089_vm1, %v7382_v22, %v1729_v35  ;;  %v7383_v47 = vmov %v7382_v22  ;;  %v2217_v45 = vpack.c.bf16 %v2195_v60, %v2194_v6  ;;  %v1791_v53 = vmul.f32 %v5710_v41, %v5673_v16  ;;  %7391 = vst [vmem:[#allocation34_spill] sm:$0xff] %v5718_v39  ;;  %v5730_v6 = vld [vmem:[#allocation15 + $0x28] sm:$0xff] }
 0x1a7   : > { %v5689_v27 = vsel %vm1089_vm1, %v1729_v35, %v7383_v47  ;;  %v5704_v35 = vld [vmem:[%s7149_s6 + $0x2] ss:$0 sm:$0xff]  ;;  %v1750_v23 = vadd.f32 %v1742_v57, %v1718_v33  ;;  %v1751_v46 = vadd.f32 %v1743_v32, %v1719_v55  ;;  %v1792_v56 = vmul.f32 %v5714_v4, %v5665_v29  ;;  %7393 = vst [vmem:[#allocation36_spill] sm:$0xff] %v5730_v6  ;;  %v7405_v33 = vld [vmem:[#allocation42_spill] sm:$0xff] }
 0x1a8   : > { %7388 = vst [vmem:[#allocation49_spill] sm:$0xff] %v5704_v35  ;;  %v1767_v25 = vmul.f32 %v5704_v35, %v7378_v13  ;;  %v1768_v54 = vmul.f32 %v5704_v35, %v7365_v21  ;;  %v1823_v13 = vmul.f32 %v5718_v39, %v5683_v12  ;;  %v5724_v21 = vmul.f32 %v5627_v18, %v7370_v61 }
 0x1a9   : > { %v5728_v7 = vadd.f32 %v5639_v10, %v7392_v9  ;;  %2345 = vmatmul.bf16.gmra.mxu3 %v2217_v45  ;;  %v1824_v8 = vmul.f32 %v5730_v6, %v5689_v27  ;;  %v5736_v43 = vadd.f32 %v5639_v10, %v5520_v44  ;;  %v1839_v22 = vadd.f32 %v1750_v23, %v1669_v0  ;;  %v7404_v45 = vld [vmem:[#allocation39_spill] sm:$0xff] }
 0x1aa   : > { %v1799_v2 = vadd.f32 %v1791_v53, %v1767_v25  ;;  %v1800_v60 = vadd.f32 %v1792_v56, %v1768_v54  ;;  %v1840_v47 = vadd.f32 %v1751_v46, %v1670_v5  ;;  %v5740_v40 = vmul.f32 %v5610_v19, %v5643_v30  ;;  %v5767_v46 = vld [vmem:[%s7400_s28] ss:$0 sm:$0xff] }
 0x1ab   : > { %7394 = vst [vmem:[#allocation43_spill] sm:$0xff] %v5736_v43  ;;  %v5746_v57 = vmul.f32 %v5627_v18, %v5643_v30  ;;  %v5750_v44 = vmul.f32 %v5610_v19, %v5728_v7  ;;  %v5754_v0 = vadd.f32 %v5639_v10, %v5600_v17  ;;  %v5760_v25 = vmul.f32 %v5627_v18, %v5728_v7  ;;  %v2301_v9 = vpop.f32.mrf.mxu1 }
 0x1ac   : > { %7395 = vst [vmem:[#allocation41_spill] sm:$0xff] %v5740_v40  ;;  %v1831_v55 = vadd.f32 %v1823_v13, %v1799_v2  ;;  %v1832_v5 = vadd.f32 %v1824_v8, %v1800_v60  ;;  %v1631_v56 = vmul.f32 %v5546_v3, %v5544_v15  ;;  %v5773_v13 = vmul.f32 %v5627_v18, %v5736_v43  ;;  %v5778_v2 = vld [vmem:[%s7300_s30] ss:$0 sm:$0xff]  ;;  %v969_v60 = vpop.f32.mrf.mxu2 }
 0x1ad   : > { %7396 = vst [vmem:[#allocation44_spill] sm:$0xff] %v5746_v57  ;;  %v1663_v15 = vmul.f32 %v5649_v36, %v5560_v50  ;;  %v5790_v23 = vadd.f32 %v5639_v10, %v967_v11  ;;  %v1664_v50 = vmul.f32 %v5653_v51, %v5568_v37  ;;  %v5806_v11 = vadd.f32 %v5639_v10, %v969_v60  ;;  %v7408_v60 = vld [vmem:[#allocation45_spill] sm:$0xff] }
 0x1ae   : > { %7397 = vst [vmem:[#allocation56_spill] sm:$0xff] %v5750_v44  ;;  %v1847_v54 = vadd.f32 %v1839_v22, %v1831_v55  ;;  %v1848_v17 = vadd.f32 %v1840_v47, %v1832_v5  ;;  %v5781_v22 = vld [vmem:[#allocation18] sm:$0xff]  ;;  %v1632_v47 = vmul.f32 %v5550_v63, %v5536_v48  ;;  %v1639_v48 = vadd.f32 %v1631_v56, %v7404_v45 }
 0x1af   : > { %7398 = vst [vmem:[#allocation57_spill] sm:$0xff] %v5754_v0  ;;  %v5803_v5 = vadd.f32 %v5767_v46, %v2301_v9  ;;  %v2470_v26 = vmul.f32 %v5781_v22, %v7407_v31  ;;  %v1713_v37 = vmul.f32 %v5580_v24, %v5665_v29  ;;  %v1744_v45 = vmul.f32 %v5693_v38, %v5683_v12 }
 0x1b0   : > { %7399 = vst [vmem:[#allocation58_spill] sm:$0xff] %v5760_v25  ;;  %v1855_v8 = vadd.f32 %v5778_v2, %v1847_v54  ;;  %v5795_v54 = vld [vmem:[%s7403_s14] ss:$0 sm:$0xff]  ;;  %v1856_v53 = vadd.f32 %v5778_v2, %v1848_v17  ;;  %v1640_v32 = vadd.f32 %v1632_v47, %v7405_v33  ;;  %v1712_v33 = vmul.f32 %v5576_v52, %v5673_v16 }
 0x1b1   : > { %7401 = vst [vmem:[#allocation59_spill] sm:$0xff] %v5773_v13  ;;  %v2446_v55 = vmul.f32 0.0, %v5795_v54  ;;  %v1745_v10 = vmul.f32 %v5697_v59, %v5689_v27  ;;  %v1769_v56 = vmul.f32 %v5704_v35, %v7367_v62  ;;  %v7409_v47 = vrot.slane %v7367_v62, 7 }
 0x1b2   : > { %7402 = vst [vmem:[#allocation60_spill] sm:$0xff] %v5790_v23  ;;  %v2196_v34 = vmax.f32 %v1855_v8, 0.0  ;;  %v2197_v17 = vmax.f32 %v1856_v53, 0.0  ;;  %v1671_v8 = vadd.f32 %v1663_v15, %v1639_v48  ;;  %v1672_v14 = vadd.f32 %v1664_v50, %v1640_v32  ;;  %v7410_v48 = vld [vmem:[#allocation48_spill] sm:$0xff] }
 0x1b3   : > { %7406 = vst [vmem:[#allocation39_spill] sm:$0xff] %v5806_v11  ;;  %v1720_v53 = vadd.f32 %v1712_v33, %v7408_v60  ;;  %v1770_v32 = vmul.f32 %v5704_v35, %v7370_v61  ;;  %v5830_v15 = vsel %vm1056_vm0, %v7409_v47, %v1778_v42  ;;  %v1721_v50 = vadd.f32 %v1713_v37, %v7410_v48  ;;  %v2303_v37 = vpop.f32.mrf.mxu1  ;;  %v5851_v48 = vld [vmem:[#allocation18 + $0x8] sm:$0xff] }
 0x1b4   : > { %v2218_v9 = vpack.c.bf16 %v2197_v17, %v2196_v34  ;;  %v7411_v19 = vmov %v7409_v47  ;;  %v1794_v17 = vmul.f32 %v5714_v4, %v5830_v15  ;;  %v7412_v33 = vrot.slane %v7370_v61, 1  ;;  %7415 = vst [vmem:[#allocation45_spill] sm:$0xff] %v5851_v48 }
 0x1b5   : > { %v5839_v34 = vsel %vm1056_vm0, %v1778_v42, %v7411_v19  ;;  %v7413_v60 = vrot.slane %v7367_v62, 1  ;;  %v1752_v13 = vadd.f32 %v1744_v45, %v1720_v53  ;;  %v5870_v53 = vmul.f32 %v5627_v18, %v5754_v0  ;;  %v5884_v18 = vld [vmem:[#allocation18 + $0x18] sm:$0xff] }
 0x1b6   : > { %v1793_v44 = vmul.f32 %v5710_v41, %v5839_v34  ;;  %v7417_v42 = vmov %v7412_v33  ;;  %v1802_v57 = vadd.f32 %v1794_v17, %v1770_v32  ;;  %v2478_v17 = vadd.f32 %v2470_v26, %v2446_v55  ;;  %7422 = vst [vmem:[#allocation64_spill] sm:$0xff] %v5884_v18  ;;  %v7425_v26 = vld [vmem:[#allocation31_spill] sm:$0xff] }
 0x1b7   : > { %v5849_v47 = vsel %vm1089_vm1, %v7413_v60, %v7412_v33  ;;  %v7416_v19 = vmov %v7413_v60  ;;  %v2304_v33 = vadd.f32 %v5767_v46, %v2303_v37  ;;  %v1753_v60 = vadd.f32 %v1745_v10, %v1721_v50  ;;  %7419 = vst [vmem:[#allocation61_spill] sm:$0xff] %v5870_v53  ;;  %v5878_v10 = vld [vmem:[%s7403_s14 + $0x1] ss:$0 sm:$0xff]  ;;  %v5882_v37 = vld [vmem:[#allocation18 + $0x10] sm:$0xff] }
 0x1b8   : > { %7414 = vst [vmem:[#allocation42_spill] sm:$0xff] %v5849_v47  ;;  %v5861_v40 = vsel %vm1089_vm1, %v7417_v42, %v7416_v19  ;;  %v1825_v25 = vmul.f32 %v5718_v39, %v5849_v47  ;;  %v1801_v19 = vadd.f32 %v1793_v44, %v1769_v56  ;;  %v2455_v42 = vrot.slane %v5803_v5, 7  ;;  %v5888_v53 = vld [vmem:[#allocation19 + $0x8] sm:$0xff] }
 0x1b9   : > { %7418 = vst [vmem:[#allocation48_spill] sm:$0xff] %v5861_v40  ;;  %v1826_v45 = vmul.f32 %v5730_v6, %v5861_v40  ;;  %2350 = vmatmul.bf16.gmra.mxu3 %v2218_v9  ;;  %v2459_v32 = vrot.slane %v2304_v33, 7  ;;  %v2471_v50 = vmul.f32 %v5851_v48, %v7407_v31  ;;  %v5886_v9 = vld [vmem:[#allocation19] sm:$0xff]  ;;  %v1841_v56 = vadd.f32 %v1752_v13, %v1671_v8 }
 0x1ba   : > { %7420 = vst [vmem:[#allocation62_spill] sm:$0xff] %v5878_v10  ;;  %v1833_v62 = vadd.f32 %v1825_v25, %v1801_v19  ;;  %v1842_v61 = vadd.f32 %v1753_v60, %v1672_v14  ;;  %v2491_v31 = vrot.slane %v2304_v33, 1  ;;  %v2502_v43 = vmul.f32 %v5886_v9, %v7425_v26 }
 0x1bb   : > { %7421 = vst [vmem:[#allocation63_spill] sm:$0xff] %v5882_v37  ;;  %v1834_v44 = vadd.f32 %v1826_v45, %v1802_v57  ;;  %v2463_v20 = vsel %vm1056_vm0, %v2455_v42, %v2459_v32  ;;  %v2467_v1 = vsel %vm1056_vm0, %v2459_v32, %v2455_v42  ;;  %v5899_v25 = vmul.f32 %v5704_v35, %v5790_v23  ;;  %v2306_v32 = vpop.f32.mrf.mxu1 }
 0x1bc   : > { %7423 = vst [vmem:[#allocation65_spill] sm:$0xff] %v5886_v9  ;;  %v2503_v57 = vmul.f32 %v5888_v53, %v7425_v26  ;;  %v2487_v13 = vrot.slane %v5803_v5, 1  ;;  %v2479_v8 = vadd.f32 %v2471_v50, %v2446_v55  ;;  %v2553_v60 = vmul.f32 %v2467_v1, %v5882_v37  ;;  %v5921_v50 = vld [vmem:[#allocation19 + $0x10] sm:$0xff] }
 0x1bd   : > { %7424 = vst [vmem:[#allocation66_spill] sm:$0xff] %v5888_v53  ;;  %v2554_v45 = vmul.f32 %v2463_v20, %v5884_v18  ;;  %v2529_v19 = vmul.f32 %v5878_v10, %v5803_v5  ;;  %v5911_v42 = vmul.f32 %v5704_v35, %v5806_v11  ;;  %v1849_v0 = vadd.f32 %v1841_v56, %v1833_v62 }
 0x1be   : > { %7426 = vst [vmem:[#allocation67_spill] sm:$0xff] %v5899_v25  ;;  %v1850_v14 = vadd.f32 %v1842_v61, %v1834_v44  ;;  %v7428_v25 = vrot.slane %v5806_v11, 7  ;;  %v7429_v26 = vrot.slane %v5790_v23, 7  ;;  %v2495_v53 = vsel %vm1089_vm1, %v2487_v13, %v2491_v31 }
 0x1bf   : > { %7427 = vst [vmem:[#allocation68_spill] sm:$0xff] %v5911_v42  ;;  %v2510_v6 = vadd.f32 %v2502_v43, %v2478_v17  ;;  %v2530_v18 = vmul.f32 %v5878_v10, %v2304_v33  ;;  %v5926_v42 = vld [vmem:[#allocation19 + $0x18] sm:$0xff]  ;;  %v5930_v62 = vsel %vm1089_vm1, %v2491_v31, %v2487_v13  ;;  %v2561_v61 = vadd.f32 %v2553_v60, %v2529_v19 }
 0x1c0   : > { %v5919_v55 = vsel %vm1056_vm0, %v7429_v26, %v7428_v25  ;;  %7431 = vst [vmem:[#allocation70_spill] sm:$0xff] %v5921_v50  ;;  %v1857_v44 = vadd.f32 %v5778_v2, %v1849_v0  ;;  %v1858_v56 = vadd.f32 %v5778_v2, %v1850_v14  ;;  %v2472_v26 = vmul.f32 %v2467_v1, %v5781_v22 }
 0x1c1   : > { %7430 = vst [vmem:[#allocation69_spill] sm:$0xff] %v5919_v55  ;;  %v2473_v25 = vmul.f32 %v2463_v20, %v5851_v48  ;;  %v2511_v55 = vadd.f32 %v2503_v57, %v2479_v8  ;;  %v2562_v11 = vadd.f32 %v2554_v45, %v2530_v18  ;;  %v2585_v43 = vmul.f32 %v2495_v53, %v5921_v50  ;;  %v5951_v57 = vld [vmem:[%s7403_s14 + $0x2] ss:$0 sm:$0xff] }
 0x1c2   : > { %7432 = vst [vmem:[#allocation71_spill] sm:$0xff] %v5926_v42  ;;  %v2307_v17 = vadd.f32 %v5767_v46, %v2306_v32  ;;  %v2198_v23 = vmax.f32 %v1857_v44, 0.0  ;;  %v1901_v31 = vmul.f32 %v5546_v3, %v5673_v16  ;;  %v2448_v13 = vmul.f32 %v5795_v54, %v5803_v5 }
 0x1c3   : > { %v2449_v0 = vmul.f32 %v5795_v54, %v2304_v33  ;;  %v2586_v1 = vmul.f32 %v5930_v62, %v5926_v42  ;;  %v2199_v14 = vmax.f32 %v1858_v56, 0.0  ;;  %v5946_v20 = vmul.f32 %v2495_v53, %v5886_v9 }
 0x1c4   : > { %v2593_v18 = vadd.f32 %v2585_v43, %v2561_v61  ;;  %v7433_v16 = vrot.slane %v5728_v7, 7  ;;  %v7434_v8 = vrot.slane %v5643_v30, 7  ;;  %v5969_v45 = vadd.f32 %v2472_v26, %v2448_v13  ;;  %v2308_v43 = vpop.f32.mrf.mxu1 }
 0x1c5   : > { %v5971_v19 = vadd.f32 %v2473_v25, %v2449_v0  ;;  %v2594_v32 = vadd.f32 %v2586_v1, %v2562_v11  ;;  %v1902_v61 = vmul.f32 %v5550_v63, %v5665_v29  ;;  %v5976_v44 = vmul.f32 %v5795_v54, %v2307_v17 }
 0x1c6   : > { %v5959_v5 = vsel %vm1056_vm0, %v7434_v8, %v7433_v16  ;;  %v7436_v33 = vmov %v7434_v8  ;;  %v7437_v60 = vmov %v7433_v16  ;;  %v2219_v56 = vpack.c.bf16 %v2199_v14, %v2198_v23  ;;  %v7439_v16 = vld [vmem:[#allocation46_spill] sm:$0xff] }
 0x1c7   : > { %7435 = vst [vmem:[#allocation72_spill] sm:$0xff] %v5959_v5  ;;  %v5967_v53 = vsel %vm1056_vm0, %v7437_v60, %v7436_v33  ;;  %v1909_v8 = vadd.f32 %v1901_v31, %v7439_v16  ;;  %v1933_v3 = vmul.f32 %v5649_v36, %v5683_v12  ;;  %v2456_v33 = vrot.slane %v2307_v17, 7 }
 0x1c8   : > { %7438 = vst [vmem:[#allocation73_spill] sm:$0xff] %v5967_v53  ;;  %v2488_v60 = vrot.slane %v2307_v17, 1  ;;  %v2531_v26 = vmul.f32 %v5878_v10, %v2307_v17  ;;  %v2309_v25 = vadd.f32 %v5767_v46, %v2308_v43  ;;  %v2684_v11 = vadd.f32 %v2593_v18, %v2510_v6 }
 0x1c9   : > { %v2612_v13 = vmul.f32 %v5951_v57, %v2307_v17  ;;  %2355 = vmatmul.bf16.gmra.mxu3 %v2219_v56  ;;  %v1982_v29 = vmul.f32 %v5576_v52, %v5839_v34  ;;  %v1983_v23 = vmul.f32 %v5580_v24, %v5830_v15  ;;  %v2685_v31 = vadd.f32 %v2594_v32, %v2511_v55  ;;  %v6007_v32 = vld [vmem:[#allocation18 + $0x20] sm:$0xff]  ;;  %v6025_v24 = vld [vmem:[#allocation19 + $0x20] sm:$0xff]  ;;  %v6027_v52 = vld [vmem:[#allocation19 + $0x28] sm:$0xff] }
 0x1ca   : > { %v2460_v0 = vrot.slane %v2309_v25, 7  ;;  %v2492_v1 = vrot.slane %v2309_v25, 1  ;;  %v1910_v12 = vadd.f32 %v1902_v61, %v5614_v28  ;;  %v7440_v14 = vrot.slane %v5728_v7, 1  ;;  %7445 = vst [vmem:[#allocation74_spill] sm:$0xff] %v6007_v32  ;;  %v6009_v61 = vld [vmem:[#allocation18 + $0x28] sm:$0xff] }
 0x1cb   : > { %v7441_v16 = vrot.slane %v5643_v30, 1  ;;  %v1934_v55 = vmul.f32 %v5653_v51, %v5689_v27  ;;  %v1941_v28 = vadd.f32 %v1933_v3, %v1909_v8  ;;  %7446 = vst [vmem:[#allocation75_spill] sm:$0xff] %v6009_v61  ;;  %v1991_v3 = vadd.f32 %v1983_v23, %v5724_v21 }
 0x1cc   : > { %v7444_v18 = vmov %v7440_v14  ;;  %v2464_v43 = vsel %vm1056_vm0, %v2456_v33, %v2460_v0  ;;  %v2014_v27 = vmul.f32 %v5693_v38, %v5849_v47  ;;  %v2015_v8 = vmul.f32 %v5697_v59, %v5861_v40  ;;  %7447 = vst [vmem:[#allocation76_spill] sm:$0xff] %v6025_v24 }
 0x1cd   : > { %v5995_v6 = vsel %vm1089_vm1, %v7441_v16, %v7440_v14  ;;  %v7443_v17 = vmov %v7441_v16  ;;  %v2468_v14 = vsel %vm1056_vm0, %v2460_v0, %v2456_v33  ;;  %v2039_v16 = vmul.f32 %v5704_v35, %v5643_v30  ;;  %7448 = vst [vmem:[#allocation77_spill] sm:$0xff] %v6027_v52 }
 0x1ce   : > { %7442 = vst [vmem:[#allocation46_spill] sm:$0xff] %v5995_v6  ;;  %v6003_v56 = vsel %vm1089_vm1, %v7444_v18, %v7443_v17  ;;  %v2063_v17 = vmul.f32 %v5710_v41, %v5967_v53  ;;  %v1990_v18 = vadd.f32 %v1982_v29, %v5631_v49  ;;  %v2496_v30 = vsel %vm1089_vm1, %v2488_v60, %v2492_v1  ;;  %v2311_v41 = vpop.f32.mrf.mxu1 }
 0x1cf   : > { %v2500_v33 = vsel %vm1089_vm1, %v2492_v1, %v2488_v60  ;;  %v2040_v49 = vmul.f32 %v5704_v35, %v5728_v7  ;;  %v2064_v21 = vmul.f32 %v5714_v4, %v5959_v5  ;;  %v2613_v29 = vmul.f32 %v5951_v57, %v2309_v25  ;;  %v7449_v5 = vld [vmem:[#allocation64_spill] sm:$0xff] }
 0x1d0   : > { %v2636_v23 = vmul.f32 %v2468_v14, %v6007_v32  ;;  %v2637_v0 = vmul.f32 %v2464_v43, %v6009_v61  ;;  %v1942_v59 = vadd.f32 %v1934_v55, %v1910_v12  ;;  %v2451_v38 = vmul.f32 %v5795_v54, %v2309_v25 }
 0x1d1   : > { %v2555_v53 = vmul.f32 %v2468_v14, %v5882_v37  ;;  %v2071_v51 = vadd.f32 %v2063_v17, %v2039_v16  ;;  %v2095_v60 = vmul.f32 %v5718_v39, %v5995_v6  ;;  %v2668_v4 = vmul.f32 %v2496_v30, %v6025_v24  ;;  %v6051_v16 = vld [vmem:[%s7450_s1] ss:$0 sm:$0xff] }
 0x1d2   : > { %v2644_v7 = vadd.f32 %v2636_v23, %v2612_v13  ;;  %v2645_v1 = vadd.f32 %v2637_v0, %v2613_v29  ;;  %v2669_v35 = vmul.f32 %v2500_v33, %v6027_v52  ;;  %v2556_v40 = vmul.f32 %v2464_v43, %v7449_v5  ;;  %v7451_v13 = vld [vmem:[#allocation36_spill] sm:$0xff] }
 0x1d3   : > { %v2022_v36 = vadd.f32 %v2014_v27, %v1990_v18  ;;  %v2023_v47 = vadd.f32 %v2015_v8, %v1991_v3  ;;  %v2072_v61 = vadd.f32 %v2064_v21, %v2040_v49  ;;  %v2474_v12 = vmul.f32 %v2468_v14, %v5781_v22 }
 0x1d4   : > { %v2676_v55 = vadd.f32 %v2668_v4, %v2644_v7  ;;  %v2677_v32 = vadd.f32 %v2669_v35, %v2645_v1  ;;  %v2096_v17 = vmul.f32 %v7451_v13, %v6003_v56  ;;  %v2475_v29 = vmul.f32 %v2464_v43, %v5851_v48 }
 0x1d5   : > { %v2532_v23 = vmul.f32 %v5878_v10, %v2309_v25  ;;  %v2587_v18 = vmul.f32 %v2496_v30, %v5921_v50  ;;  %v2103_v3 = vadd.f32 %v2095_v60, %v2071_v51  ;;  %v2563_v27 = vadd.f32 %v2555_v53, %v2531_v26 }
 0x1d6   : > { %v2588_v14 = vmul.f32 %v2500_v33, %v5926_v42  ;;  %v2692_v4 = vadd.f32 %v2684_v11, %v2676_v55  ;;  %v2693_v35 = vadd.f32 %v2685_v31, %v2677_v32  ;;  %v2104_v49 = vadd.f32 %v2096_v17, %v2072_v61  ;;  %v2313_v48 = vpop.f32.mrf.mxu1 }
 0x1d7   : > { %v2564_v8 = vadd.f32 %v2556_v40, %v2532_v23  ;;  %v2111_v21 = vadd.f32 %v2022_v36, %v1941_v28  ;;  %v2112_v0 = vadd.f32 %v2023_v47, %v1942_v59  ;;  %v2482_v7 = vadd.f32 %v2474_v12, %v5976_v44  ;;  %v7452_v40 = vld [vmem:[#allocation66_spill] sm:$0xff] }
 0x1d8   : > { %v2703_v1 = vadd.f32 %v6051_v16, %v2692_v4  ;;  %v2704_v43 = vadd.f32 %v6051_v16, %v2693_v35  ;;  %v2312_v25 = vadd.f32 %v5767_v46, %v2311_v41  ;;  %v2483_v51 = vadd.f32 %v2475_v29, %v2451_v38 }
 0x1d9   : > { %v2119_v53 = vadd.f32 %v2111_v21, %v2103_v3  ;;  %v2120_v26 = vadd.f32 %v2112_v0, %v2104_v49  ;;  %v6064_v11 = vadd.f32 %v5767_v46, %v2313_v48  ;;  %v2505_v31 = vmul.f32 %v5930_v62, %v7452_v40  ;;  %v7455_v21 = vld [vmem:[#allocation74_spill] sm:$0xff] }
 0x1da   : > { %v2506_v36 = vmul.f32 %v2496_v30, %v5886_v9  ;;  %v2507_v59 = vmul.f32 %v2500_v33, %v7452_v40  ;;  %v2595_v47 = vadd.f32 %v2587_v18, %v2563_v27  ;;  %2711 = vst [vmem:[%s6072_s16] sm:$0xff] %v2703_v1  ;;  %v2596_v38 = vadd.f32 %v2588_v14, %v2564_v8 }
 0x1db   : > { %2712 = vst [vmem:[%s6072_s16 + $0x8] sm:$0xff] %v2704_v43  ;;  %v2127_v41 = vadd.f32 %v5778_v2, %v2119_v53  ;;  %v2128_v48 = vadd.f32 %v5778_v2, %v2120_v26  ;;  %v2461_v44 = vrot.slane %v6064_v11, 7  ;;  %v2512_v62 = vadd.f32 %v5946_v20, %v5969_v45  ;;  %v7453_v20 = vld [vmem:[#allocation40_spill] sm:$0xff]  ;;  %v7459_v26 = vld [vmem:[#allocation43_spill] sm:$0xff] }
 0x1dc   : > { %v2513_v28 = vadd.f32 %v2505_v31, %v5971_v19  ;;  %v2457_v32 = vrot.slane %v2312_v25, 7  ;;  %v2493_v61 = vrot.slane %v6064_v11, 1  ;;  %v6083_v30 = vadd.f32 %v2506_v36, %v2482_v7  ;;  %v7456_v7 = vld [vmem:[#allocation75_spill] sm:$0xff] }
 0x1dd   : > { %v6085_v33 = vadd.f32 %v2507_v59, %v2483_v51  ;;  %v2200_v60 = vmax.f32 %v2127_v41, 0.0  ;;  %v2201_v12 = vmax.f32 %v2128_v48, 0.0  ;;  %v2489_v55 = vrot.slane %v2312_v25, 1  ;;  %v7457_v51 = vld [vmem:[#allocation57_spill] sm:$0xff]  ;;  %v7463_v59 = vld [vmem:[#allocation42_spill] sm:$0xff] }
 0x1de   : > { %v6089_v17 = vsel %vm1056_vm0, %v2457_v32, %v2461_v44  ;;  %v6093_v29 = vsel %vm1056_vm0, %v2461_v44, %v2457_v32  ;;  %v1903_v45 = vmul.f32 %v7453_v20, %v5839_v34  ;;  %v2686_v19 = vadd.f32 %v2595_v47, %v2512_v62  ;;  %v2316_v35 = vpop.f32.mrf.mxu1  ;;  %v7464_v47 = vld [vmem:[#allocation54_spill] sm:$0xff] }
 0x1df   : > { %v2687_v23 = vadd.f32 %v2596_v38, %v2513_v28  ;;  %v6098_v18 = vmul.f32 %v5795_v54, %v2312_v25  ;;  %v2220_v3 = vpack.c.bf16 %v2201_v12, %v2200_v60  ;;  %v2533_v27 = vmul.f32 %v5878_v10, %v2312_v25  ;;  %v7467_v60 = vld [vmem:[#allocation53_spill] sm:$0xff] }
 0x1e0   : > { %v6103_v14 = vsel %vm1089_vm1, %v2489_v55, %v2493_v61  ;;  %v6107_v4 = vsel %vm1089_vm1, %v2493_v61, %v2489_v55  ;;  %v1904_v34 = vmul.f32 %v5550_v63, %v5830_v15  ;;  %v2614_v8 = vmul.f32 %v5951_v57, %v2312_v25  ;;  %v7462_v25 = vld [vmem:[#allocation52_spill] sm:$0xff] }
 0x1e1   : > { %7454 = vst [vmem:[#allocation40_spill] sm:$0xff] %v6098_v18  ;;  %2360 = vmatmul.bf16.gmra.mxu3 %v2220_v3  ;;  %v2615_v49 = vmul.f32 %v5951_v57, %v6064_v11  ;;  %v2638_v0 = vmul.f32 %v6093_v29, %v7455_v21  ;;  %v2639_v1 = vmul.f32 %v6089_v17, %v7456_v7  ;;  %v7458_v53 = vrot.slane %v7457_v51, 7 }
 0x1e2   : > { %v2557_v43 = vmul.f32 %v6093_v29, %v5882_v37  ;;  %v7460_v31 = vrot.slane %v7459_v26, 7  ;;  %v1911_v36 = vadd.f32 %v1903_v45, %v7462_v25  ;;  %v1935_v38 = vmul.f32 %v7464_v47, %v7463_v59  ;;  %v7478_v47 = vld [vmem:[#allocation32_spill] sm:$0xff] }
 0x1e3   : > { %v2646_v41 = vadd.f32 %v2638_v0, %v2614_v8  ;;  %v2647_v48 = vadd.f32 %v2639_v1, %v2615_v49  ;;  %v2670_v44 = vmul.f32 %v6103_v14, %v6025_v24  ;;  %v2671_v62 = vmul.f32 %v6107_v4, %v6027_v52  ;;  %v7471_v8 = vld [vmem:[#allocation48_spill] sm:$0xff]  ;;  %v7472_v49 = vld [vmem:[#allocation35_spill] sm:$0xff] }
 0x1e4   : > { %v6126_v15 = vsel %vm1056_vm0, %v7460_v31, %v7458_v53  ;;  %v7465_v28 = vmov %v7460_v31  ;;  %v7466_v32 = vmov %v7458_v53  ;;  %v1912_v12 = vadd.f32 %v1904_v34, %v7467_v60 }
 0x1e5   : > { %7461 = vst [vmem:[#allocation74_spill] sm:$0xff] %v6126_v15  ;;  %v6141_v61 = vsel %vm1056_vm0, %v7466_v32, %v7465_v28  ;;  %v7468_v55 = vrot.slane %v7457_v51, 1  ;;  %v7469_v45 = vrot.slane %v7459_v26, 1  ;;  %v1936_v0 = vmul.f32 %v7472_v49, %v7471_v8  ;;  %v7475_v8 = vld [vmem:[#allocation73_spill] sm:$0xff]  ;;  %v7477_v49 = vld [vmem:[#allocation72_spill] sm:$0xff] }
 0x1e6   : > { %v2534_v1 = vmul.f32 %v5878_v10, %v6064_v11  ;;  %v2678_v53 = vadd.f32 %v2670_v44, %v2646_v41  ;;  %v2679_v31 = vadd.f32 %v2671_v62, %v2647_v48  ;;  %v2558_v28 = vmul.f32 %v6089_v17, %v7449_v5  ;;  %v2318_v63 = vpop.f32.mrf.mxu1 }
 0x1e7   : > { %v6150_v3 = vsel %vm1089_vm1, %v7469_v45, %v7468_v55  ;;  %v7473_v25 = vmov %v7469_v45  ;;  %v7474_v34 = vmov %v7468_v55  ;;  %v2565_v32 = vadd.f32 %v2557_v43, %v2533_v27  ;;  %v7479_v43 = vld [vmem:[#allocation37_spill] sm:$0xff] }
 0x1e8   : > { %7470 = vst [vmem:[#allocation75_spill] sm:$0xff] %v6150_v3  ;;  %v6162_v59 = vsel %vm1089_vm1, %v7474_v34, %v7473_v25  ;;  %v2589_v60 = vmul.f32 %v6103_v14, %v5921_v50  ;;  %v2590_v55 = vmul.f32 %v6107_v4, %v5926_v42  ;;  %v2694_v41 = vadd.f32 %v2686_v19, %v2678_v53  ;;  %v7476_v25 = vld [vmem:[#allocation29_spill] sm:$0xff] }
 0x1e9   : > { %v2695_v48 = vadd.f32 %v2687_v23, %v2679_v31  ;;  %v6171_v44 = vadd.f32 %v5767_v46, %v2316_v35  ;;  %v1943_v62 = vadd.f32 %v1935_v38, %v1911_v36  ;;  %v1944_v45 = vadd.f32 %v1936_v0, %v1912_v12  ;;  %v7480_v35 = vld [vmem:[#allocation47_spill] sm:$0xff]  ;;  %v7481_v36 = vld [vmem:[#allocation49_spill] sm:$0xff]  ;;  %v7482_v12 = vld [vmem:[#allocation44_spill] sm:$0xff] }
 0x1ea   : > { %v1984_v34 = vmul.f32 %v7476_v25, %v7475_v8  ;;  %v1985_v27 = vmul.f32 %v7478_v47, %v7477_v49  ;;  %v2016_v18 = vmul.f32 %v7479_v43, %v5995_v6  ;;  %v2705_v19 = vadd.f32 %v6051_v16, %v2694_v41  ;;  %v7483_v31 = vld [vmem:[#allocation58_spill] sm:$0xff]  ;;  %v7484_v43 = vld [vmem:[#allocation51_spill] sm:$0xff] }
 0x1eb   : > { %v2706_v23 = vadd.f32 %v6051_v16, %v2695_v48  ;;  %v2017_v53 = vmul.f32 %v7480_v35, %v6003_v56  ;;  %v2041_v38 = vmul.f32 %v7481_v36, %v7459_v26  ;;  %v2042_v47 = vmul.f32 %v7481_v36, %v7457_v51  ;;  %v7485_v41 = vld [vmem:[#allocation55_spill] sm:$0xff] }
 0x1ec   : > { %v1992_v0 = vadd.f32 %v1984_v34, %v7482_v12  ;;  %v1993_v25 = vadd.f32 %v1985_v27, %v7483_v31  ;;  %v2065_v6 = vmul.f32 %v7484_v43, %v6141_v61  ;;  %2713 = vst [vmem:[%s6072_s16 + $0x10] sm:$0xff] %v2705_v19  ;;  %v2066_v48 = vmul.f32 %v7485_v41, %v6126_v15 }
 0x1ed   : > { %v2097_v35 = vmul.f32 %v5718_v39, %v6150_v3  ;;  %v2098_v26 = vmul.f32 %v7451_v13, %v6162_v59  ;;  %v6199_v34 = vadd.f32 %v5767_v46, %v2318_v63  ;;  %v2566_v27 = vadd.f32 %v2558_v28, %v2534_v1  ;;  %2714 = vst [vmem:[%s6072_s16 + $0x18] sm:$0xff] %v2706_v23 }
 0x1ee   : > { %v2024_v12 = vadd.f32 %v2016_v18, %v1992_v0  ;;  %v2025_v31 = vadd.f32 %v2017_v53, %v1993_v25  ;;  %v2073_v36 = vadd.f32 %v2065_v6, %v2041_v38  ;;  %v2540_v51 = vrot.slane %v6171_v44, 7 }
 0x1ef   : > { %v2074_v19 = vadd.f32 %v2066_v48, %v2042_v47  ;;  %v2544_v43 = vrot.slane %v6199_v34, 7  ;;  %v2576_v41 = vrot.slane %v6199_v34, 1  ;;  %v2572_v39 = vrot.slane %v6171_v44, 1 }
 0x1f0   : > { %v2105_v3 = vadd.f32 %v2097_v35, %v2073_v36  ;;  %v2113_v15 = vadd.f32 %v2024_v12, %v1943_v62  ;;  %v2114_v13 = vadd.f32 %v2025_v31, %v1944_v45  ;;  %v2476_v63 = vmul.f32 %v6093_v29, %v5781_v22  ;;  %v2321_v62 = vpop.f32.mrf.mxu1  ;;  %v7488_v12 = vld [vmem:[#allocation45_spill] sm:$0xff] }
 0x1f1   : > { %v2106_v1 = vadd.f32 %v2098_v26, %v2074_v19  ;;  %v6210_v18 = vsel %vm1056_vm0, %v2540_v51, %v2544_v43  ;;  %v6214_v6 = vsel %vm1056_vm0, %v2544_v43, %v2540_v51  ;;  %v2597_v47 = vadd.f32 %v2589_v60, %v2565_v32 }
 0x1f2   : > { %v2598_v28 = vadd.f32 %v2590_v55, %v2566_v27  ;;  %v2121_v25 = vadd.f32 %v2113_v15, %v2105_v3  ;;  %v6218_v23 = vsel %vm1089_vm1, %v2572_v39, %v2576_v41  ;;  %v2616_v29 = vmul.f32 %v5951_v57, %v6171_v44 }
 0x1f3   : > { %7486 = vst [vmem:[#allocation52_spill] sm:$0xff] %v6218_v23  ;;  %v2122_v26 = vadd.f32 %v2114_v13, %v2106_v1  ;;  %v6224_v45 = vsel %vm1089_vm1, %v2576_v41, %v2572_v39  ;;  %v2640_v51 = vmul.f32 %v6214_v6, %v7455_v21  ;;  %v2559_v15 = vmul.f32 %v6214_v6, %v5882_v37  ;;  %v7519_v37 = vld [vmem:[#allocation68_spill] sm:$0xff] }
 0x1f4   : > { %7487 = vst [vmem:[#allocation42_spill] sm:$0xff] %v6224_v45  ;;  %v2129_v32 = vadd.f32 %v5778_v2, %v2121_v25  ;;  %v2617_v3 = vmul.f32 %v5951_v57, %v6199_v34  ;;  %v2641_v60 = vmul.f32 %v6210_v18, %v7456_v7  ;;  %v2560_v39 = vmul.f32 %v6210_v18, %v7449_v5  ;;  %v7514_v5 = vld [vmem:[#allocation55_spill] sm:$0xff] }
 0x1f5   : > { %v2130_v13 = vadd.f32 %v5778_v2, %v2122_v26  ;;  %v2648_v55 = vadd.f32 %v2640_v51, %v2616_v29  ;;  %v2672_v43 = vmul.f32 %v6218_v23, %v6025_v24  ;;  %v2688_v35 = vadd.f32 %v2597_v47, %v6083_v30 }
 0x1f6   : > { %v2202_v53 = vmax.f32 %v2129_v32, 0.0  ;;  %v2649_v36 = vadd.f32 %v2641_v60, %v2617_v3  ;;  %v2673_v38 = vmul.f32 %v6224_v45, %v6027_v52  ;;  %v2535_v0 = vmul.f32 %v5878_v10, %v6171_v44  ;;  %v7490_v60 = vld [vmem:[#allocation40_spill] sm:$0xff] }
 0x1f7   : > { %v2203_v41 = vmax.f32 %v2130_v13, 0.0  ;;  %v2536_v48 = vmul.f32 %v5878_v10, %v6199_v34  ;;  %v2680_v27 = vadd.f32 %v2672_v43, %v2648_v55  ;;  %v2477_v31 = vmul.f32 %v6089_v17, %v7488_v12 }
 0x1f8   : > { %v2689_v19 = vadd.f32 %v2598_v28, %v6085_v33  ;;  %v2681_v1 = vadd.f32 %v2673_v38, %v2649_v36  ;;  %v1905_v30 = vmul.f32 %v7453_v20, %v7475_v8  ;;  %v2567_v25 = vadd.f32 %v2559_v15, %v2535_v0  ;;  %v2323_v33 = vpop.f32.mrf.mxu1  ;;  %v7492_v36 = vld [vmem:[#allocation56_spill] sm:$0xff]  ;;  %v7493_v0 = vld [vmem:[#allocation46_spill] sm:$0xff] }
 0x1f9   : > { %v2221_v47 = vpack.c.bf16 %v2203_v41, %v2202_v53  ;;  %v2568_v29 = vadd.f32 %v2560_v39, %v2536_v48  ;;  %v2696_v26 = vadd.f32 %v2688_v35, %v2680_v27  ;;  %v2453_v51 = vmul.f32 %v5795_v54, %v6064_v11  ;;  %v7489_v11 = vld [vmem:[#allocation38_spill] sm:$0xff]  ;;  %v7491_v39 = vld [vmem:[#allocation41_spill] sm:$0xff]  ;;  %v7496_v27 = vld [vmem:[#allocation60_spill] sm:$0xff] }
 0x1fa   : > { %v2508_v32 = vmul.f32 %v6103_v14, %v5886_v9  ;;  %v2509_v17 = vmul.f32 %v6107_v4, %v7452_v40  ;;  %v2697_v3 = vadd.f32 %v2689_v19, %v2681_v1  ;;  %v2591_v20 = vmul.f32 %v6218_v23, %v5921_v50  ;;  %v7494_v41 = vld [vmem:[#allocation54_spill] sm:$0xff]  ;;  %v7498_v19 = vld [vmem:[#allocation39_spill] sm:$0xff]  ;;  %v7513_v50 = vld [vmem:[#allocation69_spill] sm:$0xff] }
 0x1fb   : > { %2365 = vmatmul.bf16.gmra.mxu3 %v2221_v47  ;;  %v2592_v8 = vmul.f32 %v6224_v45, %v5926_v42  ;;  %v2707_v28 = vadd.f32 %v6051_v16, %v2696_v26  ;;  %v1906_v15 = vmul.f32 %v7489_v11, %v7477_v49  ;;  %v2484_v14 = vadd.f32 %v2476_v63, %v7490_v60  ;;  %v7495_v49 = vld [vmem:[#allocation35_spill] sm:$0xff] }
 0x1fc   : > { %v2485_v13 = vadd.f32 %v2477_v31, %v2453_v51  ;;  %v2708_v4 = vadd.f32 %v6051_v16, %v2697_v3  ;;  %v1913_v55 = vadd.f32 %v1905_v30, %v7491_v39  ;;  %v2599_v43 = vadd.f32 %v2591_v20, %v2567_v25  ;;  %v7501_v25 = vld [vmem:[#allocation74_spill] sm:$0xff]  ;;  %v7507_v11 = vld [vmem:[#allocation75_spill] sm:$0xff] }
 0x1fd   : > { %v2600_v35 = vadd.f32 %v2592_v8, %v2568_v29  ;;  %2715 = vst [vmem:[%s6072_s16 + $0x20] sm:$0xff] %v2707_v28  ;;  %v6270_v53 = vadd.f32 %v5767_v46, %v2321_v62  ;;  %v1914_v38 = vadd.f32 %v1906_v15, %v7492_v36  ;;  %v1937_v48 = vmul.f32 %v7494_v41, %v7493_v0  ;;  %v7500_v62 = vld [vmem:[#allocation29_spill] sm:$0xff]  ;;  %v7502_v29 = vld [vmem:[#allocation32_spill] sm:$0xff]  ;;  %v7509_v36 = vld [vmem:[#allocation59_spill] sm:$0xff] }
 0x1fe   : > { %2716 = vst [vmem:[%s6072_s16 + $0x28] sm:$0xff] %v2708_v4  ;;  %v1938_v63 = vmul.f32 %v7495_v49, %v6003_v56  ;;  %v7497_v31 = vrot.slane %v7496_v27, 7  ;;  %v7499_v1 = vrot.slane %v7498_v19, 7  ;;  %v1986_v47 = vmul.f32 %v7500_v62, %v6141_v61  ;;  %v7508_v15 = vld [vmem:[#allocation37_spill] sm:$0xff]  ;;  %v7518_v45 = vld [vmem:[#allocation67_spill] sm:$0xff] }
 0x1ff   : > { %v1987_v26 = vmul.f32 %v7502_v29, %v7501_v25  ;;  %v7503_v51 = vrot.slane %v7498_v19, 1  ;;  %v7504_v3 = vrot.slane %v7496_v27, 1  ;;  %v2018_v60 = vmul.f32 %v7508_v15, %v7507_v11  ;;  %v7511_v62 = vld [vmem:[#allocation61_spill] sm:$0xff] }
 0x200   : > { %v6284_v30 = vsel %vm1056_vm0, %v7499_v1, %v7497_v31  ;;  %v1945_v4 = vadd.f32 %v1937_v48, %v1913_v55  ;;  %v1946_v39 = vadd.f32 %v1938_v63, %v1914_v38  ;;  %v1994_v0 = vadd.f32 %v1986_v47, %v7509_v36  ;;  %v7510_v31 = vld [vmem:[#allocation47_spill] sm:$0xff]  ;;  %v7516_v48 = vld [vmem:[#allocation36_spill] sm:$0xff] }
 0x201   : > { %v6296_v56 = vsel %vm1089_vm1, %v7504_v3, %v7503_v51  ;;  %v7505_v20 = vmov %v7504_v3  ;;  %v7506_v8 = vmov %v7503_v51  ;;  %v2019_v1 = vmul.f32 %v7510_v31, %v6162_v59  ;;  %v7512_v3 = vld [vmem:[#allocation51_spill] sm:$0xff] }
 0x202   : > { %v6304_v28 = vsel %vm1089_vm1, %v7506_v8, %v7505_v20  ;;  %v1995_v51 = vadd.f32 %v1987_v26, %v7511_v62  ;;  %v2067_v42 = vmul.f32 %v7512_v3, %v6284_v30  ;;  %v2068_v10 = vmul.f32 %v7514_v5, %v7513_v50  ;;  %v7515_v20 = vld [vmem:[#allocation34_spill] sm:$0xff]  ;;  %v6325_v26 = vpop.f32.mrf.mxu1 }
 0x203   : > { %v2099_v8 = vmul.f32 %v7515_v20, %v6296_v56  ;;  %v2618_v55 = vmul.f32 %v5951_v57, %v6270_v53  ;;  %v2026_v38 = vadd.f32 %v2018_v60, %v1994_v0  ;;  %v2100_v63 = vmul.f32 %v7516_v48, %v6304_v28  ;;  %7517 = vst [vmem:[#allocation53_spill] sm:$0xff] %v6325_v26 }
 0x204   : > { %v6323_v47 = vadd.f32 %v5767_v46, %v2323_v33  ;;  %v2623_v36 = vrot.slane %v6270_v53, 7  ;;  %v2027_v62 = vadd.f32 %v2019_v1, %v1995_v51  ;;  %v2075_v40 = vadd.f32 %v2067_v42, %v7518_v45 }
 0x205   : > { %v2076_v23 = vadd.f32 %v2068_v10, %v7519_v37  ;;  %v2655_v9 = vrot.slane %v6270_v53, 1  ;;  %v2115_v20 = vadd.f32 %v2026_v38, %v1945_v4  ;;  %v2517_v51 = vadd.f32 %v2509_v17, %v2485_v13  ;;  %v7521_v17 = vld [vmem:[#allocation33_spill] sm:$0xff]  ;;  %v7522_v13 = vld [vmem:[#allocation50_spill] sm:$0xff] }
 0x206   : > { %v2627_v60 = vrot.slane %v6323_v47, 7  ;;  %v2659_v0 = vrot.slane %v6323_v47, 1  ;;  %v2107_v48 = vadd.f32 %v2099_v8, %v2075_v40  ;;  %v2116_v33 = vadd.f32 %v2027_v62, %v1946_v39 }
 0x207   : > { %v2108_v5 = vadd.f32 %v2100_v63, %v2076_v23  ;;  %v2619_v26 = vmul.f32 %v5951_v57, %v6323_v47  ;;  %v2516_v39 = vadd.f32 %v2508_v32, %v2484_v14  ;;  %v7520_v32 = vld [vmem:[#allocation43_spill] sm:$0xff] }
 0x208   : > { %v6337_v1 = vsel %vm1056_vm0, %v2623_v36, %v2627_v60  ;;  %v6341_v10 = vsel %vm1056_vm0, %v2627_v60, %v2623_v36  ;;  %v6345_v37 = vsel %vm1089_vm1, %v2655_v9, %v2659_v0  ;;  %v6349_v42 = vsel %vm1089_vm1, %v2659_v0, %v2655_v9 }
 0x209   : > { %v2123_v40 = vadd.f32 %v2115_v20, %v2107_v48  ;;  %v2124_v23 = vadd.f32 %v2116_v33, %v2108_v5  ;;  %v2642_v45 = vmul.f32 %v6341_v10, %v7455_v21  ;;  %v2643_v4 = vmul.f32 %v6337_v1, %v7456_v7 }
 0x20a   : > { %v2674_v8 = vmul.f32 %v6345_v37, %v6025_v24  ;;  %v2675_v38 = vmul.f32 %v6349_v42, %v6027_v52  ;;  %v2690_v48 = vadd.f32 %v2599_v43, %v2516_v39  ;;  %v2691_v36 = vadd.f32 %v2600_v35, %v2517_v51  ;;  %v4044_v43 = vld [vmem:[#allocation13] sm:$0xff] }
 0x20b   : > { %v2131_v63 = vadd.f32 %v5778_v2, %v2123_v40  ;;  %v2132_v9 = vadd.f32 %v5778_v2, %v2124_v23  ;;  %v2650_v20 = vadd.f32 %v2642_v45, %v2618_v55  ;;  %v2651_v5 = vadd.f32 %v2643_v4, %v2619_v26  ;;  %v2328_v40 = vpop.f32.mrf.mxu1  ;;  %v7523_v4 = vld [vmem:[#allocation57_spill] sm:$0xff] }
 0x20c   : > { %v1883_v14 = vmul.f32 %v7521_v17, %v7520_v32  ;;  %v1965_v24 = vmul.f32 %v7522_v13, %v7498_v19  ;;  %v1989_v52 = vmul.f32 %v7502_v29, %v7513_v50  ;;  %v1907_v35 = vmul.f32 %v4044_v43, %v6141_v61  ;;  %v7528_v32 = vld [vmem:[#allocation34_spill] sm:$0xff]  ;;  %v7532_v43 = vld [vmem:[#allocation63_spill] sm:$0xff] }
 0x20d   : > { %v2204_v62 = vmax.f32 %v2131_v63, 0.0  ;;  %v2205_v60 = vmax.f32 %v2132_v9, 0.0  ;;  %v2682_v0 = vadd.f32 %v2674_v8, %v2650_v20  ;;  %v2683_v33 = vadd.f32 %v2675_v38, %v2651_v5  ;;  %v4045_v38 = vld [vmem:[#allocation13 + $0x8] sm:$0xff] }
 0x20e   : > { %v2751_v45 = vmul.f32 %v6214_v6, %v5781_v22  ;;  %v1884_v39 = vmul.f32 %v7521_v17, %v7523_v4  ;;  %v2752_v19 = vmul.f32 %v6210_v18, %v7488_v12  ;;  %v1964_v51 = vmul.f32 %v7522_v13, %v7496_v27 }
 0x20f   : > { %v2222_v23 = vpack.c.bf16 %v2205_v60, %v2204_v62  ;;  %v2698_v55 = vadd.f32 %v2690_v48, %v2682_v0  ;;  %v2699_v26 = vadd.f32 %v2691_v36, %v2683_v33  ;;  %v1997_v8 = vadd.f32 %v1989_v52, %v1965_v24  ;;  %v4046_v52 = vld [vmem:[#allocation13 + $0x10] sm:$0xff]  ;;  %v7524_v62 = vld [vmem:[#allocation49_spill] sm:$0xff] }
 0x210   : > { %v2727_v61 = vmul.f32 %v5795_v54, %v6171_v44  ;;  %v2728_v6 = vmul.f32 %v5795_v54, %v6199_v34  ;;  %v1908_v63 = vmul.f32 %v4045_v38, %v7501_v25  ;;  %v1915_v18 = vadd.f32 %v1907_v35, %v1883_v14  ;;  %v7527_v33 = vld [vmem:[#allocation31_spill] sm:$0xff] }
 0x211   : > { %2370 = vmatmul.bf16.gmra.mxu3 %v2222_v23  ;;  %v2709_v50 = vadd.f32 %v6051_v16, %v2698_v55  ;;  %v2710_v29 = vadd.f32 %v6051_v16, %v2699_v26  ;;  %v1939_v9 = vmul.f32 %v7494_v41, %v7507_v11  ;;  %v1940_v27 = vmul.f32 %v7495_v49, %v6162_v59  ;;  %v7525_v11 = vld [vmem:[#allocation30_spill] sm:$0xff]  ;;  %v7526_v59 = vld [vmem:[#allocation55_spill] sm:$0xff]  ;;  %v7530_v55 = vld [vmem:[#allocation65_spill] sm:$0xff] }
 0x212   : > { %v2759_v20 = vadd.f32 %v2751_v45, %v2727_v61  ;;  %v1988_v24 = vmul.f32 %v4046_v52, %v6284_v30  ;;  %v2020_v44 = vmul.f32 %v7508_v15, %v6296_v56  ;;  %v2760_v34 = vadd.f32 %v2752_v19, %v2728_v6  ;;  %v7529_v15 = vld [vmem:[#allocation36_spill] sm:$0xff]  ;;  %v7533_v45 = vld [vmem:[#allocation53_spill] sm:$0xff]  ;;  %v7534_v19 = vld [vmem:[#allocation66_spill] sm:$0xff] }
 0x213   : > { %2717 = vst [vmem:[%s6072_s16 + $0x30] sm:$0xff] %v2709_v50  ;;  %v1916_v5 = vadd.f32 %v1908_v63, %v1884_v39  ;;  %v1947_v48 = vadd.f32 %v1939_v9, %v1915_v18  ;;  %v2021_v25 = vmul.f32 %v7510_v31, %v6304_v28  ;;  %v2045_v41 = vmul.f32 0.0, %v7524_v62  ;;  %v2331_v23 = vpop.f32.mrf.mxu1  ;;  %v7535_v50 = vld [vmem:[#allocation42_spill] sm:$0xff]  ;;  %v7537_v63 = vld [vmem:[#allocation64_spill] sm:$0xff] }
 0x214   : > { %2718 = vst [vmem:[%s6072_s16 + $0x38] sm:$0xff] %v2710_v29  ;;  %v1996_v36 = vadd.f32 %v1988_v24, %v1964_v51  ;;  %v2069_v60 = vmul.f32 %v7512_v3, %v7525_v11  ;;  %v2070_v49 = vmul.f32 %v7526_v59, %v7525_v11  ;;  %v2101_v56 = vmul.f32 %v7528_v32, %v7527_v33  ;;  %v7531_v3 = vld [vmem:[#allocation52_spill] sm:$0xff]  ;;  %v7536_v6 = vld [vmem:[#allocation62_spill] sm:$0xff] }
 0x215   : > { %v1948_v0 = vadd.f32 %v1940_v27, %v1916_v5  ;;  %v2029_v30 = vadd.f32 %v2021_v25, %v1997_v8  ;;  %v2102_v17 = vmul.f32 %v7529_v15, %v7527_v33  ;;  %v6404_v31 = vadd.f32 %v5767_v46, %v2328_v40  ;;  %v7538_v59 = vld [vmem:[#allocation70_spill] sm:$0xff] }
 0x216   : > { %v2028_v14 = vadd.f32 %v2020_v44, %v1996_v36  ;;  %v2077_v13 = vadd.f32 %v2069_v60, %v2045_v41  ;;  %v2078_v28 = vadd.f32 %v2070_v49, %v2045_v41  ;;  %v2783_v26 = vmul.f32 %v7531_v3, %v7530_v55  ;;  %v6427_v36 = vpop.f32.mrf.mxu3 }
 0x217   : > { %v2831_v35 = vmul.f32 %v6341_v10, %v7532_v43  ;;  %v6412_v4 = vadd.f32 %v5767_v46, %v7533_v45  ;;  %v2118_v39 = vadd.f32 %v2029_v30, %v1948_v0  ;;  %v2784_v29 = vmul.f32 %v7535_v50, %v7534_v19 }
 0x218   : > { %v2109_v51 = vadd.f32 %v2101_v56, %v2077_v13  ;;  %v2110_v8 = vadd.f32 %v2102_v17, %v2078_v28  ;;  %v2117_v61 = vadd.f32 %v2028_v14, %v1947_v48  ;;  %v2791_v40 = vadd.f32 %v2783_v26, %v2759_v20 }
 0x219   : > { %v2807_v38 = vmul.f32 %v7536_v6, %v6270_v53  ;;  %v2832_v18 = vmul.f32 %v6337_v1, %v7537_v63  ;;  %v2741_v9 = vrot.slane %v6404_v31, 7  ;;  %v2792_v27 = vadd.f32 %v2784_v29, %v2760_v34 }
 0x21a   : > { %v2729_v52 = vmul.f32 %v5795_v54, %v6270_v53  ;;  %v2125_v24 = vadd.f32 %v2117_v61, %v2109_v51  ;;  %v2126_v44 = vadd.f32 %v2118_v39, %v2110_v8  ;;  %v2808_v5 = vmul.f32 %v7536_v6, %v6323_v47  ;;  %v7540_v8 = vld [vmem:[#allocation76_spill] sm:$0xff] }
 0x21b   : > { %v2839_v25 = vadd.f32 %v2831_v35, %v2807_v38  ;;  %v2737_v20 = vrot.slane %v6412_v4, 7  ;;  %v2773_v48 = vrot.slane %v6404_v31, 1  ;;  %v2730_v62 = vmul.f32 %v5795_v54, %v6323_v47  ;;  %v2333_v3 = vpop.f32.mrf.mxu1 }
 0x21c   : > { %v2753_v34 = vmul.f32 %v6341_v10, %v5781_v22  ;;  %v2133_v53 = vadd.f32 %v5778_v2, %v2125_v24  ;;  %v2134_v41 = vadd.f32 %v5778_v2, %v2126_v44  ;;  %v2840_v60 = vadd.f32 %v2832_v18, %v2808_v5  ;;  %v7539_v10 = vld [vmem:[#allocation71_spill] sm:$0xff] }
 0x21d   : > { %v2863_v49 = vmul.f32 %v6345_v37, %v7538_v59  ;;  %v2769_v0 = vrot.slane %v6412_v4, 1  ;;  %v2749_v30 = vsel %vm1056_vm0, %v2741_v9, %v2737_v20  ;;  %v2754_v32 = vmul.f32 %v6337_v1, %v7488_v12 }
 0x21e   : > { %v2206_v54 = vmax.f32 %v2133_v53, 0.0  ;;  %v2207_v47 = vmax.f32 %v2134_v41, 0.0  ;;  %v2745_v22 = vsel %vm1056_vm0, %v2737_v20, %v2741_v9  ;;  %v2864_v2 = vmul.f32 %v6349_v42, %v7539_v10  ;;  %v7541_v9 = vld [vmem:[#allocation77_spill] sm:$0xff]  ;;  %v2343_v41 = vpop.f32.mrf.mxu3 }
 0x21f   : > { %v2871_v56 = vadd.f32 %v2863_v49, %v2839_v25  ;;  %v2887_v15 = vmul.f32 %v5951_v57, %v6412_v4  ;;  %v6450_v17 = vsel %vm1089_vm1, %v2769_v0, %v2773_v48  ;;  %v6454_v1 = vsel %vm1089_vm1, %v2773_v48, %v2769_v0 }
 0x220   : > { %v2223_v14 = vpack.c.bf16 %v2207_v47, %v2206_v54  ;;  %v2833_v13 = vmul.f32 %v2749_v30, %v7532_v43  ;;  %v2911_v28 = vmul.f32 %v2749_v30, %v7455_v21  ;;  %v2761_v26 = vadd.f32 %v2753_v34, %v2729_v52 }
 0x221   : > { %v2872_v35 = vadd.f32 %v2864_v2, %v2840_v60  ;;  %v2888_v45 = vmul.f32 %v5951_v57, %v6404_v31  ;;  %v2912_v39 = vmul.f32 %v2745_v22, %v7456_v7  ;;  %v2762_v50 = vadd.f32 %v2754_v32, %v2730_v62 }
 0x222   : > { %v2809_v29 = vmul.f32 %v7536_v6, %v6412_v4  ;;  %2375 = vmatmul.bf16.gmra.mxu3 %v2223_v14  ;;  %v2919_v51 = vadd.f32 %v2911_v28, %v2887_v15  ;;  %v2943_v61 = vmul.f32 %v6450_v17, %v7540_v8  ;;  %v2834_v38 = vmul.f32 %v2745_v22, %v7537_v63 }
 0x223   : > { %v2920_v18 = vadd.f32 %v2912_v39, %v2888_v45  ;;  %v2944_v52 = vmul.f32 %v6454_v1, %v7541_v9  ;;  %v6469_v24 = vadd.f32 %v5767_v46, %v2331_v23  ;;  %v2959_v44 = vadd.f32 %v2871_v56, %v2791_v40  ;;  %v2336_v45 = vpop.f32.mrf.mxu1 }
 0x224   : > { %v2841_v5 = vadd.f32 %v2833_v13, %v2809_v29  ;;  %v2951_v25 = vadd.f32 %v2943_v61, %v2919_v51  ;;  %v2334_v20 = vadd.f32 %v5767_v46, %v2333_v3  ;;  %v2785_v48 = vmul.f32 %v6345_v37, %v7530_v55  ;;  %v6493_v13 = vld [vmem:[%s7403_s14] ss:$0 sm:$0xff] }
 0x225   : > { %v2960_v62 = vadd.f32 %v2872_v35, %v2792_v27  ;;  %v2810_v34 = vmul.f32 %v7536_v6, %v6404_v31  ;;  %v2952_v53 = vadd.f32 %v2944_v52, %v2920_v18  ;;  %v2786_v60 = vmul.f32 %v6349_v42, %v7534_v19 }
 0x226   : > { %v2865_v23 = vmul.f32 %v6450_v17, %v7538_v59  ;;  %v2967_v40 = vadd.f32 %v2959_v44, %v2951_v25  ;;  %v2742_v49 = vrot.slane %v2334_v20, 7  ;;  %v2738_v46 = vrot.slane %v6469_v24, 7 }
 0x227   : > { %v2842_v0 = vadd.f32 %v2834_v38, %v2810_v34  ;;  %v2968_v32 = vadd.f32 %v2960_v62, %v2952_v53  ;;  %v2774_v37 = vrot.slane %v2334_v20, 1  ;;  %v2793_v55 = vadd.f32 %v2785_v48, %v2761_v26  ;;  %v6499_v26 = vld [vmem:[#allocation18] sm:$0xff] }
 0x228   : > { %v2866_v27 = vmul.f32 %v6454_v1, %v7539_v10  ;;  %v2873_v54 = vadd.f32 %v2865_v23, %v2841_v5  ;;  %v2975_v47 = vadd.f32 %v6051_v16, %v2967_v40  ;;  %v2770_v2 = vrot.slane %v6469_v24, 1 }
 0x229   : > { %v2976_v42 = vadd.f32 %v6051_v16, %v2968_v32  ;;  %v2746_v56 = vsel %vm1056_vm0, %v2738_v46, %v2742_v49  ;;  %v2750_v15 = vsel %vm1056_vm0, %v2742_v49, %v2738_v46  ;;  %v2794_v14 = vadd.f32 %v2786_v60, %v2762_v50  ;;  %v6525_v60 = vld [vmem:[%s7400_s28] ss:$0 sm:$0xff] }
 0x22a   : > { %v2731_v28 = vmul.f32 %v6493_v13, %v6412_v4  ;;  %v2732_v3 = vmul.f32 %v6493_v13, %v6404_v31  ;;  %v2755_v35 = vmul.f32 %v6499_v26, %v2749_v30  ;;  %3808 = vst [vmem:[%s6072_s16 + $0x40] sm:$0xff] %v2975_v47  ;;  %v2756_v39 = vmul.f32 %v2745_v22, %v7488_v12 }
 0x22b   : > { %v2874_v50 = vadd.f32 %v2866_v27, %v2842_v0  ;;  %3809 = vst [vmem:[%s6072_s16 + $0x48] sm:$0xff] %v2976_v42  ;;  %v2778_v29 = vsel %vm1089_vm1, %v2770_v2, %v2774_v37  ;;  %v2782_v51 = vsel %vm1089_vm1, %v2774_v37, %v2770_v2  ;;  %v2889_v4 = vmul.f32 %v5951_v57, %v6469_v24 }
 0x22c   : > { %v2890_v31 = vmul.f32 %v5951_v57, %v2334_v20  ;;  %v2913_v61 = vmul.f32 %v2750_v15, %v7455_v21  ;;  %v2914_v30 = vmul.f32 %v2746_v56, %v7456_v7  ;;  %v2961_v38 = vadd.f32 %v2873_v54, %v2793_v55 }
 0x22d   : > { %v2811_v22 = vmul.f32 %v7536_v6, %v6469_v24  ;;  %v2835_v18 = vmul.f32 %v2750_v15, %v7532_v43  ;;  %v2836_v52 = vmul.f32 %v2746_v56, %v7537_v63  ;;  %v2945_v25 = vmul.f32 %v2778_v29, %v7540_v8  ;;  %v6530_v63 = vpop.f32.mrf.mxu3 }
 0x22e   : > { %v2921_v44 = vadd.f32 %v2913_v61, %v2889_v4  ;;  %v2922_v5 = vadd.f32 %v2914_v30, %v2890_v31  ;;  %v2946_v48 = vmul.f32 %v2782_v51, %v7541_v9  ;;  %v2962_v62 = vadd.f32 %v2874_v50, %v2794_v14  ;;  %v6543_v14 = vld [vmem:[#allocation19] sm:$0xff] }
 0x22f   : > { %v2757_v34 = vmul.f32 %v6499_v26, %v2750_v15  ;;  %v2758_v53 = vmul.f32 %v2746_v56, %v7488_v12  ;;  %v6528_v43 = vadd.f32 %v6525_v60, %v2343_v41  ;;  %v2812_v23 = vmul.f32 %v7536_v6, %v2334_v20 }
 0x230   : > { %v2953_v40 = vadd.f32 %v2945_v25, %v2921_v44  ;;  %v2954_v49 = vadd.f32 %v2946_v48, %v2922_v5  ;;  %v2342_v0 = vadd.f32 %v6525_v60, %v6427_v36  ;;  %v2763_v32 = vadd.f32 %v2755_v35, %v2731_v28 }
 0x231   : > { %v2764_v46 = vadd.f32 %v2756_v39, %v2732_v3  ;;  %v2733_v12 = vmul.f32 %v6493_v13, %v6469_v24  ;;  %v2734_v37 = vmul.f32 %v6493_v13, %v2334_v20  ;;  %v2843_v55 = vadd.f32 %v2835_v18, %v2811_v22  ;;  %v2338_v20 = vpop.f32.mrf.mxu1  ;;  %v6575_v18 = vld [vmem:[%s7403_s14 + $0x1] ss:$0 sm:$0xff] }
 0x232   : > { %v2844_v27 = vadd.f32 %v2836_v52, %v2812_v23  ;;  %v2969_v41 = vadd.f32 %v2961_v38, %v2953_v40  ;;  %v2970_v54 = vadd.f32 %v2962_v62, %v2954_v49  ;;  %v2867_v6 = vmul.f32 %v2778_v29, %v7538_v59 }
 0x233   : > { %v2765_v47 = vadd.f32 %v2757_v34, %v2733_v12  ;;  %v2766_v42 = vadd.f32 %v2758_v53, %v2734_v37  ;;  %v2902_v2 = vrot.slane %v6528_v43, 7  ;;  %v2868_v36 = vmul.f32 %v2782_v51, %v7539_v10 }
 0x234   : > { %v2977_v56 = vadd.f32 %v6051_v16, %v2969_v41  ;;  %v2978_v24 = vadd.f32 %v6051_v16, %v2970_v54  ;;  %v2898_v15 = vrot.slane %v2342_v0, 7  ;;  %v2787_v28 = vmul.f32 %v6543_v14, %v6450_v17  ;;  %v6604_v41 = vld [vmem:[#allocation18 + $0x10] sm:$0xff] }
 0x235   : > { %v2788_v3 = vmul.f32 %v6454_v1, %v7534_v19  ;;  %v2789_v59 = vmul.f32 %v6543_v14, %v2778_v29  ;;  %v2337_v35 = vadd.f32 %v6525_v60, %v2336_v45  ;;  %v2790_v10 = vmul.f32 %v2782_v51, %v7534_v19  ;;  %v6562_v29 = vpop.f32.mrf.mxu3 }
 0x236   : > { %v2875_v39 = vadd.f32 %v2867_v6, %v2843_v55  ;;  %v2876_v50 = vadd.f32 %v2868_v36, %v2844_v27  ;;  %3810 = vst [vmem:[%s6072_s16 + $0x50] sm:$0xff] %v2977_v56  ;;  %v6555_v4 = vsel %vm1056_vm0, %v2902_v2, %v2898_v15  ;;  %v2795_v31 = vadd.f32 %v2787_v28, %v2763_v32 }
 0x237   : > { %v2796_v61 = vadd.f32 %v2788_v3, %v2764_v46  ;;  %3811 = vst [vmem:[%s6072_s16 + $0x58] sm:$0xff] %v2978_v24  ;;  %v2893_v17 = vmul.f32 %v5951_v57, %v2342_v0  ;;  %v6560_v1 = vadd.f32 %v6525_v60, %v2338_v20  ;;  %v2797_v45 = vadd.f32 %v2789_v59, %v2765_v47  ;;  %v6607_v47 = vld [vmem:[#allocation18 + $0x18] sm:$0xff]  ;;  %v6622_v59 = vld [vmem:[#allocation19 + $0x10] sm:$0xff] }
 0x238   : > { %v2798_v30 = vadd.f32 %v2790_v10, %v2766_v42  ;;  %v6566_v19 = vsel %vm1056_vm0, %v2898_v15, %v2902_v2  ;;  %v2934_v51 = vrot.slane %v6528_v43, 1  ;;  %v2930_v38 = vrot.slane %v2342_v0, 1 }
 0x239   : > { %v6570_v22 = vmul.f32 %v6493_v13, %v2342_v0  ;;  %v6578_v52 = vmul.f32 %v6575_v18, %v2342_v0  ;;  %v2917_v44 = vmul.f32 %v6555_v4, %v7455_v21  ;;  %v2963_v5 = vadd.f32 %v2875_v39, %v2795_v31  ;;  %v6625_v39 = vld [vmem:[#allocation19 + $0x18] sm:$0xff] }
 0x23a   : > { %v2964_v25 = vadd.f32 %v2876_v50, %v2796_v61  ;;  %v2813_v48 = vmul.f32 %v6575_v18, %v2337_v35  ;;  %v2818_v62 = vrot.slane %v2337_v35, 7  ;;  %v2850_v34 = vrot.slane %v2337_v35, 1 }
 0x23b   : > { %v2891_v53 = vmul.f32 %v5951_v57, %v2337_v35  ;;  %v2918_v23 = vmul.f32 %v6566_v19, %v7456_v7  ;;  %v2822_v40 = vrot.slane %v6560_v1, 7  ;;  %v2894_v49 = vmul.f32 %v5951_v57, %v6528_v43 }
 0x23c   : > { %v6591_v0 = vsel %vm1089_vm1, %v2930_v38, %v2934_v51  ;;  %v6595_v32 = vsel %vm1089_vm1, %v2934_v51, %v2930_v38  ;;  %v2854_v46 = vrot.slane %v6560_v1, 1  ;;  %v2925_v12 = vadd.f32 %v2917_v44, %v2893_v17 }
 0x23d   : > { %v2814_v37 = vmul.f32 %v6575_v18, %v6560_v1  ;;  %v2826_v55 = vsel %vm1056_vm0, %v2818_v62, %v2822_v40  ;;  %v2830_v27 = vsel %vm1056_vm0, %v2822_v40, %v2818_v62  ;;  %v2926_v36 = vadd.f32 %v2918_v23, %v2894_v49  ;;  %v6620_v20 = vpop.f32.mrf.mxu3 }
 0x23e   : > { %v2837_v54 = vmul.f32 %v6604_v41, %v2830_v27  ;;  %v2838_v42 = vmul.f32 %v6607_v47, %v2826_v55  ;;  %v2858_v6 = vsel %vm1089_vm1, %v2850_v34, %v2854_v46  ;;  %v6614_v2 = vsel %vm1089_vm1, %v2854_v46, %v2850_v34 }
 0x23f   : > { %v2892_v56 = vmul.f32 %v5951_v57, %v6560_v1  ;;  %v2915_v24 = vmul.f32 %v2830_v27, %v7455_v21  ;;  %v2916_v15 = vmul.f32 %v2826_v55, %v7456_v7  ;;  %v2869_v10 = vmul.f32 %v6622_v59, %v2858_v6 }
 0x240   : > { %v2845_v28 = vadd.f32 %v2837_v54, %v2813_v48  ;;  %v2846_v3 = vadd.f32 %v2838_v42, %v2814_v37  ;;  %v2870_v50 = vmul.f32 %v6625_v39, %v6614_v2  ;;  %v2947_v57 = vmul.f32 %v2858_v6, %v7540_v8 }
 0x241   : > { %v2923_v31 = vadd.f32 %v2915_v24, %v2891_v53  ;;  %v2924_v61 = vadd.f32 %v2916_v15, %v2892_v56  ;;  %v2948_v21 = vmul.f32 %v6614_v2, %v7541_v9  ;;  %v2949_v7 = vmul.f32 %v6591_v0, %v7540_v8  ;;  %v6646_v56 = vld [vmem:[#allocation18 + $0x8] sm:$0xff] }
 0x242   : > { %v2950_v17 = vmul.f32 %v6595_v32, %v7541_v9  ;;  %v2877_v51 = vadd.f32 %v2869_v10, %v2845_v28  ;;  %v2878_v38 = vadd.f32 %v2870_v50, %v2846_v3  ;;  %v3000_v44 = vmul.f32 %v6493_v13, %v2337_v35 }
 0x243   : > { %v3003_v48 = vmul.f32 %v6493_v13, %v6528_v43  ;;  %v2955_v62 = vadd.f32 %v2947_v57, %v2923_v31  ;;  %v2956_v34 = vadd.f32 %v2948_v21, %v2924_v61  ;;  %v2957_v53 = vadd.f32 %v2949_v7, %v2925_v12 }
 0x244   : > { %v2958_v23 = vadd.f32 %v2950_v17, %v2926_v36  ;;  %v2965_v40 = vadd.f32 %v2877_v51, %v2797_v45  ;;  %v2966_v49 = vadd.f32 %v2878_v38, %v2798_v30  ;;  %v3024_v8 = vmul.f32 %v6499_v26, %v2830_v27 }
 0x245   : > { %v2971_v46 = vadd.f32 %v2963_v5, %v2955_v62  ;;  %v2972_v37 = vadd.f32 %v2964_v25, %v2956_v34  ;;  %v6642_v9 = vadd.f32 %v6525_v60, %v6530_v63  ;;  %v3026_v35 = vmul.f32 %v6499_v26, %v6555_v4  ;;  %v2353_v12 = vpop.f32.mrf.mxu3  ;;  %v6709_v34 = vld [vmem:[#allocation18 + $0x20] sm:$0xff] }
 0x246   : > { %v2973_v54 = vadd.f32 %v2965_v40, %v2957_v53  ;;  %v2974_v42 = vadd.f32 %v2966_v49, %v2958_v23  ;;  %v3025_v45 = vmul.f32 %v6646_v56, %v2826_v55  ;;  %v3104_v30 = vmul.f32 %v6604_v41, %v6555_v4  ;;  %v6712_v23 = vld [vmem:[#allocation18 + $0x28] sm:$0xff] }
 0x247   : > { %v3105_v5 = vmul.f32 %v6607_v47, %v6566_v19  ;;  %v2979_v63 = vadd.f32 %v6051_v16, %v2971_v46  ;;  %v2980_v25 = vadd.f32 %v6051_v16, %v2972_v37  ;;  %v3001_v24 = vmul.f32 %v6493_v13, %v6560_v1 }
 0x248   : > { %v2981_v27 = vadd.f32 %v6051_v16, %v2973_v54  ;;  %v2982_v36 = vadd.f32 %v6051_v16, %v2974_v42  ;;  %v6661_v55 = vadd.f32 %v6525_v60, %v6562_v29  ;;  %v3027_v4 = vmul.f32 %v6646_v56, %v6566_v19 }
 0x249   : > { %v3058_v15 = vmul.f32 %v6543_v14, %v6591_v0  ;;  %v3081_v28 = vmul.f32 %v6575_v18, %v6528_v43  ;;  %3812 = vst [vmem:[%s6072_s16 + $0x60] sm:$0xff] %v2979_v63  ;;  %v3032_v16 = vadd.f32 %v3024_v8, %v3000_v44  ;;  %v3033_v3 = vadd.f32 %v3025_v45, %v3001_v24  ;;  %v6679_v43 = vld [vmem:[#allocation19 + $0x8] sm:$0xff] }
 0x24a   : > { %3813 = vst [vmem:[%s6072_s16 + $0x68] sm:$0xff] %v2980_v25  ;;  %v3010_v1 = vrot.slane %v6642_v9, 7  ;;  %v3014_v10 = vrot.slane %v6661_v55, 7  ;;  %v3046_v29 = vrot.slane %v6661_v55, 1  ;;  %v3034_v50 = vadd.f32 %v3026_v35, %v6570_v22  ;;  %v6727_v63 = vld [vmem:[#allocation19 + $0x28] sm:$0xff] }
 0x24b   : > { %v3112_v19 = vadd.f32 %v3104_v30, %v6578_v52  ;;  %v3113_v31 = vadd.f32 %v3105_v5, %v3081_v28  ;;  %3814 = vst [vmem:[%s6072_s16 + $0x70] sm:$0xff] %v2981_v27  ;;  %v3056_v61 = vmul.f32 %v6543_v14, %v2858_v6  ;;  %v3057_v57 = vmul.f32 %v6679_v43, %v6614_v2  ;;  %v6695_v2 = vld [vmem:[%s7403_s14 + $0x2] ss:$0 sm:$0xff]  ;;  %v6723_v30 = vld [vmem:[#allocation19 + $0x20] sm:$0xff] }
 0x24c   : > { %3815 = vst [vmem:[%s6072_s16 + $0x78] sm:$0xff] %v2982_v36  ;;  %v3042_v21 = vrot.slane %v6642_v9, 1  ;;  %v3018_v7 = vsel %vm1056_vm0, %v3010_v1, %v3014_v10  ;;  %v3022_v22 = vsel %vm1056_vm0, %v3014_v10, %v3010_v1  ;;  %v3035_v17 = vadd.f32 %v3027_v4, %v3003_v48 }
 0x24d   : > { %v3136_v52 = vmul.f32 %v6622_v59, %v6591_v0  ;;  %v3137_v6 = vmul.f32 %v6625_v39, %v6595_v32  ;;  %v3064_v51 = vadd.f32 %v3056_v61, %v3032_v16  ;;  %v3065_v38 = vadd.f32 %v3057_v57, %v3033_v3  ;;  %v2356_v46 = vpop.f32.mrf.mxu3 }
 0x24e   : > { %v3160_v44 = vmul.f32 %v6695_v2, %v6642_v9  ;;  %v6701_v62 = vsel %vm1089_vm1, %v3042_v21, %v3046_v29  ;;  %v6705_v0 = vsel %vm1089_vm1, %v3046_v29, %v3042_v21  ;;  %v3161_v48 = vmul.f32 %v6695_v2, %v6661_v55 }
 0x24f   : > { %v3184_v53 = vmul.f32 %v6709_v34, %v3022_v22  ;;  %v3185_v40 = vmul.f32 %v6712_v23, %v3018_v7  ;;  %v6716_v49 = vadd.f32 %v6525_v60, %v2353_v12  ;;  %v3144_v37 = vadd.f32 %v3136_v52, %v3112_v19 }
 0x250   : > { %v3145_v8 = vadd.f32 %v3137_v6, %v3113_v31  ;;  %v3106_v35 = vmul.f32 %v6604_v41, %v3022_v22  ;;  %v6721_v54 = vadd.f32 %v6525_v60, %v6620_v20  ;;  %v3216_v5 = vmul.f32 %v6723_v30, %v6701_v62 }
 0x251   : > { %v3192_v42 = vadd.f32 %v3184_v53, %v3160_v44  ;;  %v3193_v45 = vadd.f32 %v3185_v40, %v3161_v48  ;;  %v3217_v25 = vmul.f32 %v6727_v63, %v6705_v0  ;;  %v3059_v12 = vmul.f32 %v6679_v43, %v6595_v32 }
 0x252   : > { %v3232_v27 = vadd.f32 %v3144_v37, %v3064_v51  ;;  %v3082_v20 = vmul.f32 %v6575_v18, %v6642_v9  ;;  %v3107_v36 = vmul.f32 %v6607_v47, %v3018_v7  ;;  %v3233_v24 = vadd.f32 %v3145_v8, %v3065_v38 }
 0x253   : > { %v3224_v4 = vadd.f32 %v3216_v5, %v3192_v42  ;;  %v3225_v28 = vadd.f32 %v3217_v25, %v3193_v45  ;;  %v3015_v16 = vrot.slane %v6716_v49, 7  ;;  %v3083_v3 = vmul.f32 %v6575_v18, %v6661_v55 }
 0x254   : > { %v3114_v1 = vadd.f32 %v3106_v35, %v3082_v20  ;;  %v3011_v10 = vrot.slane %v6721_v54, 7  ;;  %v3047_v29 = vrot.slane %v6716_v49, 1  ;;  %v3066_v32 = vadd.f32 %v3058_v15, %v3034_v50  ;;  %v6753_v15 = vld [vmem:[%s7450_s1] ss:$0 sm:$0xff] }
 0x255   : > { %v3067_v19 = vadd.f32 %v3059_v12, %v3035_v17  ;;  %v3240_v31 = vadd.f32 %v3232_v27, %v3224_v4  ;;  %v3241_v61 = vadd.f32 %v3233_v24, %v3225_v28  ;;  %v3115_v57 = vadd.f32 %v3107_v36, %v3083_v3 }
 0x256   : > { %v3138_v21 = vmul.f32 %v6622_v59, %v6701_v62  ;;  %v3043_v52 = vrot.slane %v6721_v54, 1  ;;  %v6746_v6 = vsel %vm1056_vm0, %v3015_v16, %v3011_v10  ;;  %v3004_v51 = vmul.f32 %v6493_v13, %v6642_v9 }
 0x257   : > { %v3248_v50 = vadd.f32 %v6753_v15, %v3240_v31  ;;  %v3249_v17 = vadd.f32 %v6753_v15, %v3241_v61  ;;  %v6759_v38 = vsel %vm1056_vm0, %v3011_v10, %v3015_v16  ;;  %v3005_v44 = vmul.f32 %v6493_v13, %v6661_v55  ;;  %v2358_v55 = vpop.f32.mrf.mxu3 }
 0x258   : > { %v3139_v9 = vmul.f32 %v6625_v39, %v6705_v0  ;;  %v3146_v48 = vadd.f32 %v3138_v21, %v3114_v1  ;;  %v6767_v53 = vsel %vm1089_vm1, %v3043_v52, %v3047_v29  ;;  %v3028_v40 = vmul.f32 %v6499_v26, %v3022_v22 }
 0x259   : > { %v3029_v37 = vmul.f32 %v6646_v56, %v3018_v7  ;;  %3816 = vst [vmem:[%s6072_s16 + $0x80] sm:$0xff] %v3248_v50  ;;  %v3162_v8 = vmul.f32 %v6695_v2, %v6721_v54  ;;  %v3186_v35 = vmul.f32 %v6709_v34, %v6746_v6  ;;  %v6779_v45 = vsel %vm1089_vm1, %v3047_v29, %v3043_v52 }
 0x25a   : > { %v3147_v42 = vadd.f32 %v3139_v9, %v3115_v57  ;;  %3817 = vst [vmem:[%s6072_s16 + $0x88] sm:$0xff] %v3249_v17  ;;  %v3108_v5 = vmul.f32 %v6604_v41, %v6746_v6  ;;  %v3109_v7 = vmul.f32 %v6607_v47, %v6759_v38  ;;  %v3163_v22 = vmul.f32 %v6695_v2, %v6716_v49 }
 0x25b   : > { %v3187_v25 = vmul.f32 %v6712_v23, %v6759_v38  ;;  %v3194_v12 = vadd.f32 %v3186_v35, %v3162_v8  ;;  %v3218_v27 = vmul.f32 %v6723_v30, %v6767_v53  ;;  %v3234_v20 = vadd.f32 %v3146_v48, %v3066_v32 }
 0x25c   : > { %v3084_v36 = vmul.f32 %v6575_v18, %v6721_v54  ;;  %v6794_v24 = vadd.f32 %v6525_v60, %v2356_v46  ;;  %v6797_v4 = vadd.f32 %v6525_v60, %v2358_v55  ;;  %v3085_v28 = vmul.f32 %v6575_v18, %v6716_v49 }
 0x25d   : > { %v3195_v16 = vadd.f32 %v3187_v25, %v3163_v22  ;;  %v3219_v3 = vmul.f32 %v6727_v63, %v6779_v45  ;;  %v3226_v1 = vadd.f32 %v3218_v27, %v3194_v12  ;;  %v3036_v10 = vadd.f32 %v3028_v40, %v3004_v51 }
 0x25e   : > { %v3037_v29 = vadd.f32 %v3029_v37, %v3005_v44  ;;  %v3060_v32 = vmul.f32 %v6543_v14, %v6701_v62  ;;  %v3116_v31 = vadd.f32 %v3108_v5, %v3084_v36  ;;  %v3235_v61 = vadd.f32 %v3147_v42, %v3067_v19 }
 0x25f   : > { %v3117_v46 = vadd.f32 %v3109_v7, %v3085_v28  ;;  %v3227_v57 = vadd.f32 %v3219_v3, %v3195_v16  ;;  %v3242_v21 = vadd.f32 %v3234_v20, %v3226_v1  ;;  %v3140_v52 = vmul.f32 %v6622_v59, %v6767_v53 }
 0x260   : > { %v3091_v50 = vrot.slane %v6794_v24, 7  ;;  %v3095_v17 = vrot.slane %v6797_v4, 7  ;;  %v3127_v9 = vrot.slane %v6797_v4, 1  ;;  %v3141_v51 = vmul.f32 %v6625_v39, %v6779_v45 }
 0x261   : > { %v3243_v44 = vadd.f32 %v3235_v61, %v3227_v57  ;;  %v3250_v62 = vadd.f32 %v6753_v15, %v3242_v21  ;;  %v3123_v19 = vrot.slane %v6794_v24, 1  ;;  %v3061_v48 = vmul.f32 %v6679_v43, %v6705_v0 }
 0x262   : > { %v3148_v40 = vadd.f32 %v3140_v52, %v3116_v31  ;;  %v6818_v37 = vsel %vm1056_vm0, %v3091_v50, %v3095_v17  ;;  %v6822_v8 = vsel %vm1056_vm0, %v3095_v17, %v3091_v50  ;;  %v3149_v35 = vadd.f32 %v3141_v51, %v3117_v46 }
 0x263   : > { %v3251_v55 = vadd.f32 %v6753_v15, %v3243_v44  ;;  %3818 = vst [vmem:[%s6072_s16 + $0x90] sm:$0xff] %v3250_v62  ;;  %v6828_v42 = vsel %vm1089_vm1, %v3123_v19, %v3127_v9  ;;  %v6832_v0 = vsel %vm1089_vm1, %v3127_v9, %v3123_v19  ;;  %v3164_v5 = vmul.f32 %v6695_v2, %v6794_v24 }
 0x264   : > { %v3165_v7 = vmul.f32 %v6695_v2, %v6797_v4  ;;  %v3188_v22 = vmul.f32 %v6709_v34, %v6822_v8  ;;  %v3189_v25 = vmul.f32 %v6712_v23, %v6818_v37  ;;  %v3068_v12 = vadd.f32 %v3060_v32, %v3036_v10  ;;  %v2361_v3 = vpop.f32.mrf.mxu3 }
 0x265   : > { %v3069_v27 = vadd.f32 %v3061_v48, %v3037_v29  ;;  %3819 = vst [vmem:[%s6072_s16 + $0x98] sm:$0xff] %v3251_v55  ;;  %v3220_v28 = vmul.f32 %v6723_v30, %v6828_v42  ;;  %v3221_v16 = vmul.f32 %v6727_v63, %v6832_v0  ;;  %v3110_v57 = vmul.f32 %v6604_v41, %v6822_v8 }
 0x266   : > { %v3196_v20 = vadd.f32 %v3188_v22, %v3164_v5  ;;  %v3197_v36 = vadd.f32 %v3189_v25, %v3165_v7  ;;  %v3236_v1 = vadd.f32 %v3148_v40, %v3068_v12  ;;  %v3111_v10 = vmul.f32 %v6607_v47, %v6818_v37 }
 0x267   : > { %v3237_v31 = vadd.f32 %v3149_v35, %v3069_v27  ;;  %v3030_v21 = vmul.f32 %v6499_v26, %v6746_v6  ;;  %v3031_v52 = vmul.f32 %v6646_v56, %v6759_v38  ;;  %v3086_v50 = vmul.f32 %v6575_v18, %v6794_v24 }
 0x268   : > { %v3228_v61 = vadd.f32 %v3220_v28, %v3196_v20  ;;  %v3229_v46 = vadd.f32 %v3221_v16, %v3197_v36  ;;  %v3087_v17 = vmul.f32 %v6575_v18, %v6797_v4  ;;  %v6862_v44 = vadd.f32 %v6525_v60, %v2361_v3 }
 0x269   : > { %v3006_v62 = vmul.f32 %v6493_v13, %v6721_v54  ;;  %v3007_v6 = vmul.f32 %v6493_v13, %v6716_v49  ;;  %v3118_v38 = vadd.f32 %v3110_v57, %v3086_v50  ;;  %v3142_v5 = vmul.f32 %v6622_v59, %v6828_v42 }
 0x26a   : > { %v3244_v29 = vadd.f32 %v3236_v1, %v3228_v61  ;;  %v3245_v32 = vadd.f32 %v3237_v31, %v3229_v46  ;;  %v3119_v19 = vadd.f32 %v3111_v10, %v3087_v17  ;;  %v3143_v7 = vmul.f32 %v6625_v39, %v6832_v0 }
 0x26b   : > { %v3038_v35 = vadd.f32 %v3030_v21, %v3006_v62  ;;  %v3039_v55 = vadd.f32 %v3031_v52, %v3007_v6  ;;  %v3171_v54 = vrot.slane %v6862_v44, 7  ;;  %v3203_v49 = vrot.slane %v6862_v44, 1 }
 0x26c   : > { %v3252_v9 = vadd.f32 %v6753_v15, %v3244_v29  ;;  %v3253_v51 = vadd.f32 %v6753_v15, %v3245_v32  ;;  %v2363_v48 = vpop.f32.mrf.mxu3  ;;  %v3062_v12 = vmul.f32 %v6543_v14, %v6767_v53  ;;  %v3063_v27 = vmul.f32 %v6679_v43, %v6779_v45 }
 0x26d   : > { %v6871_v40 = vadd.f32 %v6525_v60, %v2363_v48  ;;  %v3150_v20 = vadd.f32 %v3142_v5, %v3118_v38  ;;  %v3151_v36 = vadd.f32 %v3143_v7, %v3119_v19  ;;  %v3166_v45 = vmul.f32 %v6695_v2, %v6862_v44 }
 0x26e   : > { %3820 = vst [vmem:[%s6072_s16 + $0xa0] sm:$0xff] %v3252_v9  ;;  %v3070_v46 = vadd.f32 %v3062_v12, %v3038_v35  ;;  %v3071_v57 = vadd.f32 %v3063_v27, %v3039_v55  ;;  %v3297_v5 = vmul.f32 %v6499_v26, %v6822_v8  ;;  %v3298_v7 = vmul.f32 %v6646_v56, %v6818_v37 }
 0x26f   : > { %3821 = vst [vmem:[%s6072_s16 + $0xa8] sm:$0xff] %v3253_v51  ;;  %v3175_v22 = vrot.slane %v6871_v40, 7  ;;  %v3207_v25 = vrot.slane %v6871_v40, 1  ;;  %v3167_v1 = vmul.f32 %v6695_v2, %v6871_v40  ;;  %v3273_v12 = vmul.f32 %v6493_v13, %v6794_v24 }
 0x270   : > { %v3238_v52 = vadd.f32 %v3150_v20, %v3070_v46  ;;  %v3239_v50 = vadd.f32 %v3151_v36, %v3071_v57  ;;  %v3274_v27 = vmul.f32 %v6493_v13, %v6797_v4 }
 0x271   : > { %v6887_v28 = vsel %vm1056_vm0, %v3171_v54, %v3175_v22  ;;  %v6891_v16 = vsel %vm1056_vm0, %v3175_v22, %v3171_v54  ;;  %v6895_v3 = vsel %vm1089_vm1, %v3203_v49, %v3207_v25  ;;  %v6899_v53 = vsel %vm1089_vm1, %v3207_v25, %v3203_v49 }
 0x272   : > { %v3190_v31 = vmul.f32 %v6709_v34, %v6891_v16  ;;  %v3191_v61 = vmul.f32 %v6712_v23, %v6887_v28  ;;  %v3222_v32 = vmul.f32 %v6723_v30, %v6895_v3  ;;  %v3223_v21 = vmul.f32 %v6727_v63, %v6899_v53 }
 0x273   : > { %v3377_v48 = vmul.f32 %v6604_v41, %v6891_v16  ;;  %v3378_v35 = vmul.f32 %v6607_v47, %v6887_v28  ;;  %v3353_v54 = vmul.f32 %v6575_v18, %v6862_v44  ;;  %v3354_v22 = vmul.f32 %v6575_v18, %v6871_v40 }
 0x274   : > { %v3198_v10 = vadd.f32 %v3190_v31, %v3166_v45  ;;  %v3199_v29 = vadd.f32 %v3191_v61, %v3167_v1  ;;  %v3305_v1 = vadd.f32 %v3297_v5, %v3273_v12  ;;  %v3306_v31 = vadd.f32 %v3298_v7, %v3274_v27 }
 0x275   : > { %v3385_v8 = vadd.f32 %v3377_v48, %v3353_v54  ;;  %v3386_v20 = vadd.f32 %v3378_v35, %v3354_v22  ;;  %v3409_v61 = vmul.f32 %v6622_v59, %v6895_v3  ;;  %v3410_v46 = vmul.f32 %v6625_v39, %v6899_v53 }
 0x276   : > { %v3230_v17 = vadd.f32 %v3222_v32, %v3198_v10  ;;  %v3231_v9 = vadd.f32 %v3223_v21, %v3199_v29  ;;  %v3329_v10 = vmul.f32 %v6543_v14, %v6828_v42  ;;  %v3330_v29 = vmul.f32 %v6679_v43, %v6832_v0 }
 0x277   : > { %v3417_v32 = vadd.f32 %v3409_v61, %v3385_v8  ;;  %v3418_v21 = vadd.f32 %v3410_v46, %v3386_v20  ;;  %v3300_v61 = vmul.f32 %v6646_v56, %v6887_v28 }
 0x278   : > { %v3246_v51 = vadd.f32 %v3238_v52, %v3230_v17  ;;  %v3247_v62 = vadd.f32 %v3239_v50, %v3231_v9 }
 0x27a   : > { %v3254_v6 = vadd.f32 %v6753_v15, %v3246_v51  ;;  %v3255_v38 = vadd.f32 %v6753_v15, %v3247_v62  ;;  %v3337_v51 = vadd.f32 %v3329_v10, %v3305_v1  ;;  %v3338_v62 = vadd.f32 %v3330_v29, %v3306_v31 }
 0x27b   : > { %v3275_v10 = vmul.f32 %v6493_v13, %v6862_v44  ;;  %v3276_v29 = vmul.f32 %v6493_v13, %v6871_v40 }
 0x27c   : > { %3822 = vst [vmem:[%s6072_s16 + $0xb0] sm:$0xff] %v3254_v6  ;;  %v3505_v35 = vadd.f32 %v3417_v32, %v3337_v51  ;;  %v3506_v5 = vadd.f32 %v3418_v21, %v3338_v62 }
 0x27d   : > { %3823 = vst [vmem:[%s6072_s16 + $0xb8] sm:$0xff] %v3255_v38  ;;  %v3308_v51 = vadd.f32 %v3300_v61, %v3276_v29 }
 0x27e   : > { %v2366_v19 = vpop.f32.mrf.mxu3 }
 0x27f   : > { %v6922_v55 = vadd.f32 %v6525_v60, %v2366_v19 }
 0x281   : > { %v3283_v37 = vrot.slane %v6922_v55, 7  ;;  %v3315_v24 = vrot.slane %v6922_v55, 1  ;;  %v3433_v17 = vmul.f32 %v6695_v2, %v6922_v55  ;;  %v3355_v1 = vmul.f32 %v6575_v18, %v6922_v55 }
 0x286   : > { %v2368_v49 = vpop.f32.mrf.mxu3 }
 0x287   : > { %v6933_v25 = vadd.f32 %v6525_v60, %v2368_v49 }
 0x289   : > { %v3287_v36 = vrot.slane %v6933_v25, 7  ;;  %v3319_v45 = vrot.slane %v6933_v25, 1  ;;  %v3434_v9 = vmul.f32 %v6695_v2, %v6933_v25  ;;  %v3356_v46 = vmul.f32 %v6575_v18, %v6933_v25 }
 0x28b   : > { %v6949_v4 = vsel %vm1056_vm0, %v3283_v37, %v3287_v36  ;;  %v6953_v57 = vsel %vm1056_vm0, %v3287_v36, %v3283_v37  ;;  %v6961_v52 = vsel %vm1089_vm1, %v3315_v24, %v3319_v45  ;;  %v6965_v50 = vsel %vm1089_vm1, %v3319_v45, %v3315_v24 }
 0x28c   : > { %v3457_v42 = vmul.f32 %v6709_v34, %v6953_v57  ;;  %v3458_v0 = vmul.f32 %v6712_v23, %v6949_v4  ;;  %v3489_v19 = vmul.f32 %v6723_v30, %v6961_v52  ;;  %v3490_v48 = vmul.f32 %v6727_v63, %v6965_v50 }
 0x28d   : > { %v3379_v20 = vmul.f32 %v6604_v41, %v6953_v57  ;;  %v3380_v37 = vmul.f32 %v6607_v47, %v6949_v4  ;;  %v3299_v45 = vmul.f32 %v6499_v26, %v6891_v16  ;;  %v3412_v44 = vmul.f32 %v6625_v39, %v6965_v50 }
 0x28e   : > { %v3465_v6 = vadd.f32 %v3457_v42, %v3433_v17  ;;  %v3466_v38 = vadd.f32 %v3458_v0, %v3434_v9  ;;  %v3411_v42 = vmul.f32 %v6622_v59, %v6961_v52 }
 0x28f   : > { %v3387_v16 = vadd.f32 %v3379_v20, %v3355_v1  ;;  %v3388_v32 = vadd.f32 %v3380_v37, %v3356_v46  ;;  %v3307_v9 = vadd.f32 %v3299_v45, %v3275_v10  ;;  %v3301_v20 = vmul.f32 %v6499_v26, %v6953_v57 }
 0x290   : > { %v3497_v7 = vadd.f32 %v3489_v19, %v3465_v6  ;;  %v3498_v54 = vadd.f32 %v3490_v48, %v3466_v38  ;;  %v3331_v6 = vmul.f32 %v6543_v14, %v6895_v3  ;;  %v3332_v38 = vmul.f32 %v6679_v43, %v6899_v53 }
 0x291   : > { %v3419_v19 = vadd.f32 %v3411_v42, %v3387_v16  ;;  %v3302_v37 = vmul.f32 %v6646_v56, %v6949_v4  ;;  %v3439_v16 = vmul.f32 0.0, %v6695_v2  ;;  %v3463_v57 = vmul.f32 %v6709_v34, %v7525_v11 }
 0x292   : > { %v3513_v22 = vadd.f32 %v3505_v35, %v3497_v7  ;;  %v3514_v12 = vadd.f32 %v3506_v5, %v3498_v54  ;;  %v3420_v35 = vadd.f32 %v3412_v44, %v3388_v32  ;;  %v3464_v4 = vmul.f32 %v6712_v23, %v7525_v11 }
 0x293   : > { %v3333_v32 = vmul.f32 %v6543_v14, %v6961_v52  ;;  %v3495_v11 = vmul.f32 %v6723_v30, %v7527_v33  ;;  %v3471_v44 = vadd.f32 %v3463_v57, %v3439_v16 }
 0x294   : > { %v2371_v49 = vpop.f32.mrf.mxu3  ;;  %v3521_v27 = vadd.f32 %v6753_v15, %v3513_v22  ;;  %v3522_v8 = vadd.f32 %v6753_v15, %v3514_v12  ;;  %v3340_v22 = vadd.f32 %v3332_v38, %v3308_v51  ;;  %v3277_v12 = vmul.f32 %v6493_v13, %v6922_v55 }
 0x295   : > { %v6988_v36 = vadd.f32 %v6525_v60, %v2371_v49  ;;  %v3339_v49 = vadd.f32 %v3331_v6, %v3307_v9  ;;  %v3472_v6 = vadd.f32 %v3464_v4, %v3439_v16  ;;  %v3496_v38 = vmul.f32 %v6727_v63, %v7527_v33 }
 0x296   : > { %3824 = vst [vmem:[%s6072_s16 + $0xc0] sm:$0xff] %v3521_v27  ;;  %v3508_v46 = vadd.f32 %v3420_v35, %v3340_v22 }
 0x297   : > { %3825 = vst [vmem:[%s6072_s16 + $0xc8] sm:$0xff] %v3522_v8  ;;  %v3284_v21 = vrot.slane %v6988_v36, 7  ;;  %v3316_v0 = vrot.slane %v6988_v36, 1  ;;  %v3435_v5 = vmul.f32 %v6695_v2, %v6988_v36  ;;  %v3507_v61 = vadd.f32 %v3419_v19, %v3339_v49 }
 0x29c   : > { %v2373_v31 = vpop.f32.mrf.mxu3 }
 0x29d   : > { %v6999_v24 = vadd.f32 %v6525_v60, %v2373_v31  ;;  %v3278_v31 = vmul.f32 %v6493_v13, %v6933_v25 }
 0x29f   : > { %v3288_v17 = vrot.slane %v6999_v24, 7  ;;  %v3320_v28 = vrot.slane %v6999_v24, 1  ;;  %v3436_v3 = vmul.f32 %v6695_v2, %v6999_v24  ;;  %v3310_v25 = vadd.f32 %v3302_v37, %v3278_v31 }
 0x2a0   : > { %v3358_v35 = vmul.f32 %v6575_v18, %v6999_v24 }
 0x2a1   : > { %v3292_v40 = vsel %vm1056_vm0, %v3284_v21, %v3288_v17  ;;  %v3296_v62 = vsel %vm1056_vm0, %v3288_v17, %v3284_v21  ;;  %v3324_v48 = vsel %vm1089_vm1, %v3316_v0, %v3320_v28  ;;  %v7027_v7 = vsel %vm1089_vm1, %v3320_v28, %v3316_v0 }
 0x2a2   : > { %v3459_v54 = vmul.f32 %v6709_v34, %v3296_v62  ;;  %v3460_v53 = vmul.f32 %v6712_v23, %v3292_v40  ;;  %v3491_v8 = vmul.f32 %v6723_v30, %v3324_v48  ;;  %v3492_v1 = vmul.f32 %v6727_v63, %v7027_v7 }
 0x2a3   : > { %v3309_v17 = vadd.f32 %v3301_v20, %v3277_v12  ;;  %v3334_v28 = vmul.f32 %v6679_v43, %v6965_v50  ;;  %v3381_v42 = vmul.f32 %v6604_v41, %v3296_v62  ;;  %v3382_v0 = vmul.f32 %v6607_v47, %v3292_v40 }
 0x2a4   : > { %v3467_v27 = vadd.f32 %v3459_v54, %v3435_v5  ;;  %v3468_v45 = vadd.f32 %v3460_v53, %v3436_v3  ;;  %v3357_v50 = vmul.f32 %v6575_v18, %v6988_v36  ;;  %v3303_v19 = vmul.f32 %v6499_v26, %v3296_v62 }
 0x2a5   : > { %v2376_v55 = vpop.f32.mrf.mxu3  ;;  %v3341_v5 = vadd.f32 %v3333_v32, %v3309_v17  ;;  %v3342_v54 = vadd.f32 %v3334_v28, %v3310_v25  ;;  %v3279_v3 = vmul.f32 %v6493_v13, %v6988_v36  ;;  %v3304_v53 = vmul.f32 %v6646_v56, %v3292_v40 }
 0x2a6   : > { %v3499_v10 = vadd.f32 %v3491_v8, %v3467_v27  ;;  %v3500_v29 = vadd.f32 %v3492_v1, %v3468_v45  ;;  %v2377_v49 = vadd.f32 %v6525_v60, %v2376_v55  ;;  %v3389_v33 = vadd.f32 %v3381_v42, %v3357_v50 }
 0x2a7   : > { %v3390_v22 = vadd.f32 %v3382_v0, %v3358_v35  ;;  %v3280_v26 = vmul.f32 %v6493_v13, %v6999_v24  ;;  %v3503_v27 = vadd.f32 %v3495_v11, %v3471_v44  ;;  %v3504_v8 = vadd.f32 %v3496_v38, %v3472_v6 }
 0x2a8   : > { %v3515_v21 = vadd.f32 %v3507_v61, %v3499_v10  ;;  %v3516_v9 = vadd.f32 %v3508_v46, %v3500_v29  ;;  %v3311_v20 = vadd.f32 %v3303_v19, %v3279_v3  ;;  %v3335_v37 = vmul.f32 %v6543_v14, %v3324_v48 }
 0x2a9   : > { %v3413_v45 = vmul.f32 %v6622_v59, %v3324_v48  ;;  %v3414_v36 = vmul.f32 %v6625_v39, %v7027_v7  ;;  %v3364_v1 = vrot.slane %v2377_v49, 7  ;;  %v3396_v56 = vrot.slane %v2377_v49, 1 }
 0x2aa   : > { %v3523_v51 = vadd.f32 %v6753_v15, %v3515_v21  ;;  %v3524_v52 = vadd.f32 %v6753_v15, %v3516_v9  ;;  %v3312_v61 = vadd.f32 %v3304_v53, %v3280_v26  ;;  %v3336_v13 = vmul.f32 %v6679_v43, %v7027_v7 }
 0x2ab   : > { %v3421_v46 = vadd.f32 %v3413_v45, %v3389_v33  ;;  %v3422_v10 = vadd.f32 %v3414_v36, %v3390_v22  ;;  %v3359_v55 = vmul.f32 %v6575_v18, %v2377_v49  ;;  %v3437_v7 = vmul.f32 %v6695_v2, %v2377_v49 }
 0x2ac   : > { %3826 = vst [vmem:[%s6072_s16 + $0xd0] sm:$0xff] %v3523_v51  ;;  %v3343_v9 = vadd.f32 %v3335_v37, %v3311_v20 }
 0x2ad   : > { %3827 = vst [vmem:[%s6072_s16 + $0xd8] sm:$0xff] %v3524_v52  ;;  %v2378_v12 = vpop.f32.mrf.mxu3  ;;  %v3509_v51 = vadd.f32 %v3421_v46, %v3341_v5  ;;  %v3510_v11 = vadd.f32 %v3422_v10, %v3342_v54 }
 0x2ae   : > { %v2379_v62 = vadd.f32 %v6525_v60, %v2378_v12 }
 0x2b0   : > { %v3368_v40 = vrot.slane %v2379_v62, 7  ;;  %v3400_v31 = vrot.slane %v2379_v62, 1  ;;  %v3360_v29 = vmul.f32 %v6575_v18, %v2379_v62  ;;  %v3438_v57 = vmul.f32 %v6695_v2, %v2379_v62 }
 0x2b1   : > { %v3344_v2 = vadd.f32 %v3336_v13, %v3312_v61 }
 0x2b2   : > { %v3372_v60 = vsel %vm1056_vm0, %v3364_v1, %v3368_v40  ;;  %v3376_v14 = vsel %vm1056_vm0, %v3368_v40, %v3364_v1  ;;  %v3404_v24 = vsel %vm1089_vm1, %v3396_v56, %v3400_v31  ;;  %v3408_v48 = vsel %vm1089_vm1, %v3400_v31, %v3396_v56 }
 0x2b3   : > { %v3383_v16 = vmul.f32 %v6604_v41, %v3376_v14  ;;  %v3384_v43 = vmul.f32 %v6607_v47, %v3372_v60  ;;  %v3461_v4 = vmul.f32 %v6709_v34, %v3376_v14  ;;  %v3462_v32 = vmul.f32 %v6712_v23, %v3372_v60 }
 0x2b4   : > { %v3415_v58 = vmul.f32 %v6622_v59, %v3404_v24  ;;  %v3416_v25 = vmul.f32 %v6625_v39, %v3408_v48  ;;  %v3493_v41 = vmul.f32 %v6723_v30, %v3404_v24  ;;  %v3494_v47 = vmul.f32 %v6727_v63, %v3408_v48 }
 0x2b5   : > { %v3391_v21 = vadd.f32 %v3383_v16, %v3359_v55  ;;  %v3392_v17 = vadd.f32 %v3384_v43, %v3360_v29  ;;  %v3469_v18 = vadd.f32 %v3461_v4, %v3437_v7  ;;  %v3470_v28 = vadd.f32 %v3462_v32, %v3438_v57 }
 0x2b7   : > { %v3423_v42 = vadd.f32 %v3415_v58, %v3391_v21  ;;  %v3424_v34 = vadd.f32 %v3416_v25, %v3392_v17  ;;  %v3501_v0 = vadd.f32 %v3493_v41, %v3469_v18  ;;  %v3502_v23 = vadd.f32 %v3494_v47, %v3470_v28 }
 0x2b9   : > { %v3511_v59 = vadd.f32 %v3423_v42, %v3343_v9  ;;  %v3512_v39 = vadd.f32 %v3424_v34, %v3344_v2  ;;  %v3517_v30 = vadd.f32 %v3509_v51, %v3501_v0  ;;  %v3518_v63 = vadd.f32 %v3510_v11, %v3502_v23 }
 0x2bb   : > { %v3519_v52 = vadd.f32 %v3511_v59, %v3503_v27  ;;  %v3520_v44 = vadd.f32 %v3512_v39, %v3504_v8  ;;  %v3525_v6 = vadd.f32 %v6753_v15, %v3517_v30  ;;  %v3526_v38 = vadd.f32 %v6753_v15, %v3518_v63 }
 0x2bd   : > { %v3527_v50 = vadd.f32 %v6753_v15, %v3519_v52  ;;  %v3528_v19 = vadd.f32 %v6753_v15, %v3520_v44  ;;  %3828 = vst [vmem:[%s6072_s16 + $0xe0] sm:$0xff] %v3525_v6 }
 0x2be   : > { %3829 = vst [vmem:[%s6072_s16 + $0xe8] sm:$0xff] %v3526_v38 }
 0x2bf   : > { %3830 = vst [vmem:[%s6072_s16 + $0xf0] sm:$0xff] %v3527_v50 }
 0x2c0   : > { %3831 = vst [vmem:[%s6072_s16 + $0xf8] sm:$0xff] %v3528_v19 }
 0x2c1   : > { %4391 = shalt.err (!%p4388_p9)
}
 0x2c2   : > { %s4466_s15 = smov 128   ;;  %s4467_s16 = smov 8  }
 0x2c3   : > { %3909 = dma.vmem_to_hbm [thread:$0]  (%p4666_p13), %s3552_s26, 4096, %s3554_s17, %s3539_s3, %s4466_s15, %s4466_s15, %s4467_s16  }
 0x2c4 PF: > { %s3568_s1 = sand.u32 1, %s4438_s18   ;;  %p7543_p10 = scmp.ge.s32.totalorder %s4450_s21, 2 }
 0x2c5   : > { %s3569_s0 = scalar_lea.sflag [#allocation6], %s3568_s1 }
 0x2c6   : > { %p3944_p11 = pnand %p7543_p10, %p4671_p5 }
 0x2c8   : > { %p3945_p0 = pneg %p3944_p11 }
 0x2ca   : > { %4433 = dma.done.wait (%p3945_p0), %s3569_s0, 4096  }
 0x2cb   : > { %4435 = vsyncadd (%p3945_p0), %s3569_s0, 4294963200  ;;  %p33_p2 = scmp.ge.s32.totalorder %s4646_s23, 4   ;;  %s7544_s18 = smov %s4442_s19 }
 0x2cc   : > { %s7545_s19 = smov %s4446_s20  ;;  %s7546_s20 = smov %s4658_s27 }
 0x2cd   : > { %s7547_s21 = smov %s4646_s23  ;;  %35 = sbr.rel (!%p33_p2) target bundleno = 21 (0x15), region = 191 }
 0x2d2   :  { %3575 = vsyncpa [#allocation5], 1 }
 0x2d3   :  { %3577 = vsyncpa [#allocation5 + $0x1], 1 }
 0x2d4   :  { %3578 = vsyncpa [#allocation8], 1 }
 0x2d5   :  { %3579 = vsyncpa [#allocation11], 1 }
 0x2d6   :  { %3580 = vsyncpa [#allocation14], 1 }
 0x2d7   :  { %3581 = vsyncpa [#allocation17], 1 }
 0x2d8   :  { %3582 = vsyncpa [#allocation20], 1 }
 0x2d9   :  { %3583 = vsyncpa [#allocation6], 1 }
 0x2da   :  { %3585 = vsyncpa [#allocation6 + $0x1], 1 }

</bundles_post_ra>
